<compile_context>
chip_gen: v6e
topology: v6e:2x2x1
jax: 0.10.0
libtpu: 0.0.40
codegen_flags: <defaults>
</compile_context>

<pallas_src>
import math
import functools

import jax
import jax.numpy as jnp
from jax import lax
from jax.experimental import pallas as pl
from jax.experimental.pallas import tpu as pltpu

# ---- synthetic config (stands in for a pretrained BERT checkpoint) ----
VOCAB = 100
HIDDEN = 32
N_HEADS = 4
HEAD_DIM = HIDDEN // N_HEADS
N_LAYERS = 2
INTER = 64
MAX_POS = 16
N_CLASSES = 3
LN_EPS = 1e-12
LOGITS_PAD = 128   # kernel writes lane-dense (B, 128) logits; JAX slices [:, :N_CLASSES]

LAYER_PARAM_ORDER = (
    'wq', 'wk', 'wv', 'bq', 'bk', 'bv', 'wo', 'bo',
    'ln1_g', 'ln1_b', 'w1', 'b1', 'w2', 'b2', 'ln2_g', 'ln2_b',
)


# ---------------- in-kernel helpers (trace-time, operate on values) ----------------

def _layernorm_f32(h, gamma, beta):
    mu = jnp.mean(h, axis=-1, keepdims=True)
    var = jnp.mean((h - mu) ** 2, axis=-1, keepdims=True)
    return (h - mu) * lax.rsqrt(var + LN_EPS) * gamma + beta


# ---------------- the single fused Pallas kernel ----------------

def _bert_forward_kernel(*refs, B, S, NH, DH, n_layers, scale):
    """Whole BERTClassifier forward: emb-add + LN, n_layers encoder layers, CLS + classifier."""
    H = NH * DH
    refs = list(refs)
    idx = 0

    def take():
        nonlocal idx
        r = refs[idx]
        idx += 1
        return r

    we_ref = take(); pe_ref = take(); te_ref = take()
    emb_g_ref = take(); emb_b_ref = take(); mask_ref = take()
    layers = []
    for _ in range(n_layers):
        layers.append({name: take() for name in LAYER_PARAM_ORDER})
    clsw_ref = take(); clsb_ref = take()
    logits_ref = take()
    assert idx == len(refs)

    # ---- embeddings: word + position + token-type, then LayerNorm (all in-kernel) ----
    we = we_ref[...].astype(jnp.float32)                                   # (B*S, H)
    pe = pe_ref[...].astype(jnp.float32)                                   # (S, H)
    te = te_ref[...].astype(jnp.float32)                                   # (1, H)
    emb = (we.reshape(B, S, H) + pe[None, :, :] + te[None, :, :]).reshape(B * S, H)
    x = _layernorm_f32(emb, emb_g_ref[...], emb_b_ref[...])               # (B*S, H)

    mask = mask_ref[...].astype(jnp.float32)                               # (B, S) additive bias

    for lp in layers:
        # ---- multi-head self-attention ----
        # Head-blocked weights (NH, H, DH): per-head Q/K/V tiles come straight out of
        # their own matmul — no lane-axis slices of a fused (B*S, 3H) activation.
        q_heads = [jnp.dot(x, lp['wq'][h], preferred_element_type=jnp.float32) + lp['bq'][h]
                   for h in range(NH)]                                     # NH x (B*S, DH)
        k_heads = [jnp.dot(x, lp['wk'][h], preferred_element_type=jnp.float32) + lp['bk'][h]
                   for h in range(NH)]
        v_heads = [jnp.dot(x, lp['wv'][h], preferred_element_type=jnp.float32) + lp['bv'][h]
                   for h in range(NH)]

        wo = lp['wo'][...]                                                 # (H, H)
        attn_rows = []
        # B*NH = 8: trace-time unroll is fine at this size (fori_loop / grid axis at scale).
        for b in range(B):
            r0 = b * S
            bias_b = mask[b:b + 1, :]                                      # (1, S) over keys
            ctx_heads = []
            for h in range(NH):
                q_bh = q_heads[h][r0:r0 + S, :]                            # (S, DH) sublane slice
                k_bh = k_heads[h][r0:r0 + S, :]
                v_bh = v_heads[h][r0:r0 + S, :]
                # scores: contract last dims directly — no explicit k.T relayout
                s = lax.dot_general(q_bh, k_bh, (((1,), (1,)), ((), ())),
                                    preferred_element_type=jnp.float32) * scale
                s = s + bias_b                                             # broadcast over queries
                s = s - jnp.max(s, axis=-1, keepdims=True)
                p = jnp.exp(s)
                p = p * pl.reciprocal(jnp.sum(p, axis=-1, keepdims=True), approx=True)
                ctx_heads.append(jnp.dot(p, v_bh, preferred_element_type=jnp.float32))  # (S, DH)
            # one lane concat to (S, H), then ONE (S,H)x(H,H) output projection per batch
            ctx_b = jnp.concatenate(ctx_heads, axis=-1)                    # (S, H)
            attn_rows.append(jnp.dot(ctx_b, wo, preferred_element_type=jnp.float32))
        attn_out = jnp.concatenate(attn_rows, axis=0) + lp['bo'][...]      # (B*S, H)

        # ---- add & LayerNorm 1 ----
        h1 = _layernorm_f32(attn_out + x, lp['ln1_g'][...], lp['ln1_b'][...])

        # ---- FFN ----
        ff = jnp.dot(h1, lp['w1'][...], preferred_element_type=jnp.float32) + lp['b1'][...]
        # TODO(synk): BERT uses exact erf-GELU; tanh approximation kept (EUP-friendly, tiny deviation).
        ff = jax.nn.gelu(ff, approximate=True)
        ff = jnp.dot(ff, lp['w2'][...], preferred_element_type=jnp.float32) + lp['b2'][...]

        # ---- add & LayerNorm 2 ----
        x = _layernorm_f32(ff + h1, lp['ln2_g'][...], lp['ln2_b'][...])

    # ---- CLS rows + classifier head, emitted from the same kernel ----
    cls = jnp.concatenate([x[b * S:b * S + 1, :] for b in range(B)], axis=0)   # (B, H)
    # nn.Dropout(p=0.3): identity at inference (eval mode)
    logits = jnp.dot(cls, clsw_ref[...], preferred_element_type=jnp.float32) + clsb_ref[...]
    logits_ref[...] = logits.astype(logits_ref.dtype)                     # (B, 128) lane-dense store


# ---------------- Pallas wrapper ----------------

def _bert_forward_pallas(params, we, pe, te, mask_bias, B, S):
    inputs = [we, pe, te, params['emb_ln_g'], params['emb_ln_b'], mask_bias]
    for lp in params['layers']:
        inputs.extend(lp[name] for name in LAYER_PARAM_ORDER)
    inputs.extend([params['cls_w_pad'], params['cls_b_pad']])

    kernel = functools.partial(
        _bert_forward_kernel,
        B=B, S=S, NH=N_HEADS, DH=HEAD_DIM,
        n_layers=len(params['layers']), scale=1.0 / math.sqrt(HEAD_DIM))

    # Explicit full-array VMEM residency for every operand (tiny: well under 100 KiB total).
    # TODO(synk): at real BERT sizes, add a row-tile grid axis marked "parallel" (v7x has
    # 2 TensorCores), move weights to bf16 with f32 accumulation, K-tile the matmuls with a
    # pl.when-guarded VMEM accumulator, and set vmem_limit_bytes against v7x's 64 MiB VMEM.
    return pl.pallas_call(
        kernel,
        out_shape=jax.ShapeDtypeStruct((B, LOGITS_PAD), jnp.float32),
        in_specs=[pl.BlockSpec(memory_space=pltpu.MemorySpace.VMEM) for _ in inputs],
        out_specs=pl.BlockSpec(memory_space=pltpu.MemorySpace.VMEM),
    )(*inputs)


# ---------------- Model ----------------

def _head_blocked(w):
    """(H, NH*DH) dense weight -> (NH, H, DH): column-block h becomes head h's matrix."""
    return jnp.transpose(w.reshape(HIDDEN, N_HEADS, HEAD_DIM), (1, 0, 2))


def init_params(key):
    keys = iter(jax.random.split(key, 8 + N_LAYERS * 8))

    def dense(fan_in, fan_out):
        return jax.random.normal(next(keys), (fan_in, fan_out), jnp.float32) * 0.02

    cls_w = dense(HIDDEN, N_CLASSES)     # self.out = nn.Linear(hidden, n_classes)
    params = {
        'word_emb': jax.random.normal(next(keys), (VOCAB, HIDDEN), jnp.float32) * 0.02,
        'pos_emb': jax.random.normal(next(keys), (MAX_POS, HIDDEN), jnp.float32) * 0.02,
        'type_emb': jax.random.normal(next(keys), (2, HIDDEN), jnp.float32) * 0.02,
        'emb_ln_g': jnp.ones((1, HIDDEN), jnp.float32),
        'emb_ln_b': jnp.zeros((1, HIDDEN), jnp.float32),
        # classifier weight/bias zero-padded to 128 output lanes (lane-dense kernel store)
        'cls_w_pad': jnp.zeros((HIDDEN, LOGITS_PAD), jnp.float32).at[:, :N_CLASSES].set(cls_w),
        'cls_b_pad': jnp.zeros((1, LOGITS_PAD), jnp.float32),
        'layers': [],
    }
    for _ in range(N_LAYERS):
        lp = {
            'wq': _head_blocked(dense(HIDDEN, HIDDEN)),
            'wk': _head_blocked(dense(HIDDEN, HIDDEN)),
            'wv': _head_blocked(dense(HIDDEN, HIDDEN)),
            'bq': jnp.zeros((N_HEADS, 1, HEAD_DIM), jnp.float32),
            'bk': jnp.zeros((N_HEADS, 1, HEAD_DIM), jnp.float32),
            'bv': jnp.zeros((N_HEADS, 1, HEAD_DIM), jnp.float32),
            'wo': dense(HIDDEN, HIDDEN), 'bo': jnp.zeros((1, HIDDEN), jnp.float32),
            'ln1_g': jnp.ones((1, HIDDEN), jnp.float32), 'ln1_b': jnp.zeros((1, HIDDEN), jnp.float32),
            'w1': dense(HIDDEN, INTER), 'b1': jnp.zeros((1, INTER), jnp.float32),
            'w2': dense(INTER, HIDDEN), 'b2': jnp.zeros((1, HIDDEN), jnp.float32),
            'ln2_g': jnp.ones((1, HIDDEN), jnp.float32), 'ln2_b': jnp.zeros((1, HIDDEN), jnp.float32),
        }
        params['layers'].append(lp)
    return params


def bert_classifier_forward(params, input_ids, attention_mask):
    """forward(input_ids, attention_mask) -> logits (B, n_classes)."""
    B, S = input_ids.shape

    # Embedding-table gather stays in JAX glue (data-dependent row gather).
    we = jnp.take(params['word_emb'], input_ids.reshape(-1), axis=0)       # (B*S, H)
    pe = params['pos_emb'][:S]                                             # (S, H)
    te = params['type_emb'][0:1]                                           # (1, H); token_type_ids == 0

    # additive attention bias, kept at (B, S) and broadcast inside the kernel
    mask_bias = (1.0 - attention_mask.astype(jnp.float32)) * (-1e9)        # (B, S)

    logits_pad = _bert_forward_pallas(params, we, pe, te, mask_bias, B, S)  # (B, 128)
    return logits_pad[:, :N_CLASSES]


if __name__ == "__main__":
    key = jax.random.PRNGKey(0)
    pkey, ikey = jax.random.split(key)
    params = init_params(pkey)

    B, S = 2, 8
    input_ids = jax.random.randint(ikey, (B, S), 0, VOCAB, dtype=jnp.int32)
    attention_mask = jnp.array([[1, 1, 1, 1, 1, 1, 1, 1],
                                [1, 1, 1, 1, 1, 1, 0, 0]], dtype=jnp.int32)

    logits = jax.jit(bert_classifier_forward)(params, input_ids, attention_mask)
    jax.block_until_ready(logits)
    assert logits.shape == (B, N_CLASSES)
    assert bool(jnp.all(jnp.isfinite(logits)))
    print("KERNEL_OK")
</pallas_src>

<mosaic_0001>
module attributes {stable_mosaic.version = 11 : i64} {
  func.func @_bert_forward_kernel(%arg0: memref<16x32xf32, #tpu.memory_space<vmem>>, %arg1: memref<8x32xf32, #tpu.memory_space<vmem>>, %arg2: memref<1x32xf32, #tpu.memory_space<vmem>>, %arg3: memref<1x32xf32, #tpu.memory_space<vmem>>, %arg4: memref<1x32xf32, #tpu.memory_space<vmem>>, %arg5: memref<2x8xf32, #tpu.memory_space<vmem>>, %arg6: memref<4x32x8xf32, #tpu.memory_space<vmem>>, %arg7: memref<4x32x8xf32, #tpu.memory_space<vmem>>, %arg8: memref<4x32x8xf32, #tpu.memory_space<vmem>>, %arg9: memref<4x1x8xf32, #tpu.memory_space<vmem>>, %arg10: memref<4x1x8xf32, #tpu.memory_space<vmem>>, %arg11: memref<4x1x8xf32, #tpu.memory_space<vmem>>, %arg12: memref<32x32xf32, #tpu.memory_space<vmem>>, %arg13: memref<1x32xf32, #tpu.memory_space<vmem>>, %arg14: memref<1x32xf32, #tpu.memory_space<vmem>>, %arg15: memref<1x32xf32, #tpu.memory_space<vmem>>, %arg16: memref<32x64xf32, #tpu.memory_space<vmem>>, %arg17: memref<1x64xf32, #tpu.memory_space<vmem>>, %arg18: memref<64x32xf32, #tpu.memory_space<vmem>>, %arg19: memref<1x32xf32, #tpu.memory_space<vmem>>, %arg20: memref<1x32xf32, #tpu.memory_space<vmem>>, %arg21: memref<1x32xf32, #tpu.memory_space<vmem>>, %arg22: memref<4x32x8xf32, #tpu.memory_space<vmem>>, %arg23: memref<4x32x8xf32, #tpu.memory_space<vmem>>, %arg24: memref<4x32x8xf32, #tpu.memory_space<vmem>>, %arg25: memref<4x1x8xf32, #tpu.memory_space<vmem>>, %arg26: memref<4x1x8xf32, #tpu.memory_space<vmem>>, %arg27: memref<4x1x8xf32, #tpu.memory_space<vmem>>, %arg28: memref<32x32xf32, #tpu.memory_space<vmem>>, %arg29: memref<1x32xf32, #tpu.memory_space<vmem>>, %arg30: memref<1x32xf32, #tpu.memory_space<vmem>>, %arg31: memref<1x32xf32, #tpu.memory_space<vmem>>, %arg32: memref<32x64xf32, #tpu.memory_space<vmem>>, %arg33: memref<1x64xf32, #tpu.memory_space<vmem>>, %arg34: memref<64x32xf32, #tpu.memory_space<vmem>>, %arg35: memref<1x32xf32, #tpu.memory_space<vmem>>, %arg36: memref<1x32xf32, #tpu.memory_space<vmem>>, %arg37: memref<1x32xf32, #tpu.memory_space<vmem>>, %arg38: memref<32x128xf32, #tpu.memory_space<vmem>>, %arg39: memref<1x128xf32, #tpu.memory_space<vmem>>, %arg40: memref<2x128xf32, #tpu.memory_space<vmem>>) attributes {dimension_semantics = [], scalar_prefetch = 0 : i64, scratch_operands = 0 : i64, tpu.core_type = #tpu.core_type<tc>} {
    %c0 = arith.constant 0 : index
    %c0_0 = arith.constant 0 : index
    %0 = vector.load %arg0[%c0, %c0_0] : memref<16x32xf32, #tpu.memory_space<vmem>>, vector<16x32xf32>
    %c0_1 = arith.constant 0 : index
    %c0_2 = arith.constant 0 : index
    %1 = vector.load %arg1[%c0_1, %c0_2] : memref<8x32xf32, #tpu.memory_space<vmem>>, vector<8x32xf32>
    %c0_3 = arith.constant 0 : index
    %c0_4 = arith.constant 0 : index
    %2 = vector.load %arg2[%c0_3, %c0_4] : memref<1x32xf32, #tpu.memory_space<vmem>>, vector<1x32xf32>
    %3 = vector.shape_cast %0 : vector<16x32xf32> to vector<2x8x32xf32>
    %4 = vector.shape_cast %1 : vector<8x32xf32> to vector<1x8x32xf32>
    %5 = vector.broadcast %4 : vector<1x8x32xf32> to vector<2x8x32xf32>
    %6 = arith.addf %3, %5 : vector<2x8x32xf32>
    %7 = vector.shape_cast %2 : vector<1x32xf32> to vector<1x1x32xf32>
    %8 = vector.broadcast %7 : vector<1x1x32xf32> to vector<2x8x32xf32>
    %9 = arith.addf %6, %8 : vector<2x8x32xf32>
    %10 = vector.shape_cast %9 : vector<2x8x32xf32> to vector<16x32xf32>
    %c0_5 = arith.constant 0 : index
    %c0_6 = arith.constant 0 : index
    %11 = vector.load %arg3[%c0_5, %c0_6] : memref<1x32xf32, #tpu.memory_space<vmem>>, vector<1x32xf32>
    %c0_7 = arith.constant 0 : index
    %c0_8 = arith.constant 0 : index
    %12 = vector.load %arg4[%c0_7, %c0_8] : memref<1x32xf32, #tpu.memory_space<vmem>>, vector<1x32xf32>
    %cst = arith.constant dense<0.000000e+00> : vector<16xf32>
    %13 = vector.multi_reduction <add>, %10, %cst [1] : vector<16x32xf32> to vector<16xf32>
    %14 = vector.shape_cast %13 : vector<16xf32> to vector<16x1xf32>
    %cst_9 = arith.constant 3.200000e+01 : f32
    %15 = vector.broadcast %cst_9 : f32 to vector<16x1xf32>
    %16 = arith.divf %14, %15 : vector<16x1xf32>
    %17 = vector.broadcast %16 : vector<16x1xf32> to vector<16x32xf32>
    %18 = arith.subf %10, %17 : vector<16x32xf32>
    %19 = arith.mulf %18, %18 : vector<16x32xf32>
    %cst_10 = arith.constant dense<0.000000e+00> : vector<16xf32>
    %20 = vector.multi_reduction <add>, %19, %cst_10 [1] : vector<16x32xf32> to vector<16xf32>
    %21 = vector.shape_cast %20 : vector<16xf32> to vector<16x1xf32>
    %cst_11 = arith.constant 3.200000e+01 : f32
    %22 = vector.broadcast %cst_11 : f32 to vector<16x1xf32>
    %23 = arith.divf %21, %22 : vector<16x1xf32>
    %24 = vector.broadcast %16 : vector<16x1xf32> to vector<16x32xf32>
    %25 = arith.subf %10, %24 : vector<16x32xf32>
    %cst_12 = arith.constant 9.99999996E-13 : f32
    %26 = vector.broadcast %cst_12 : f32 to vector<16x1xf32>
    %27 = arith.addf %23, %26 : vector<16x1xf32>
    %28 = math.rsqrt %27 : vector<16x1xf32>
    %29 = vector.broadcast %28 : vector<16x1xf32> to vector<16x32xf32>
    %30 = arith.mulf %25, %29 : vector<16x32xf32>
    %31 = vector.broadcast %11 : vector<1x32xf32> to vector<16x32xf32>
    %32 = arith.mulf %30, %31 : vector<16x32xf32>
    %33 = vector.broadcast %12 : vector<1x32xf32> to vector<16x32xf32>
    %34 = arith.addf %32, %33 : vector<16x32xf32>
    %c0_13 = arith.constant 0 : index
    %c0_14 = arith.constant 0 : index
    %35 = vector.load %arg5[%c0_13, %c0_14] : memref<2x8xf32, #tpu.memory_space<vmem>>, vector<2x8xf32>
    %c0_15 = arith.constant 0 : index
    %c0_16 = arith.constant 0 : index
    %c0_17 = arith.constant 0 : index
    %36 = vector.load %arg6[%c0_15, %c0_16, %c0_17] : memref<4x32x8xf32, #tpu.memory_space<vmem>>, vector<1x32x8xf32>
    %37 = vector.shape_cast %36 : vector<1x32x8xf32> to vector<32x8xf32>
    %cst_18 = arith.constant dense<0.000000e+00> : vector<16x8xf32>
    %38 = tpu.matmul %34, %37, %cst_18 {dimension_numbers = #tpu.dot_dimension_numbers<[1], [0], [0], [1], [0, 0, 1, 1], [], []>} : vector<16x32xf32>, vector<32x8xf32>, vector<16x8xf32> -> vector<16x8xf32>
    %c0_19 = arith.constant 0 : index
    %c0_20 = arith.constant 0 : index
    %c0_21 = arith.constant 0 : index
    %39 = vector.load %arg9[%c0_19, %c0_20, %c0_21] : memref<4x1x8xf32, #tpu.memory_space<vmem>>, vector<1x1x8xf32>
    %40 = vector.shape_cast %39 : vector<1x1x8xf32> to vector<1x8xf32>
    %41 = vector.broadcast %40 : vector<1x8xf32> to vector<16x8xf32>
    %42 = arith.addf %38, %41 : vector<16x8xf32>
    %c1 = arith.constant 1 : index
    %c0_22 = arith.constant 0 : index
    %c0_23 = arith.constant 0 : index
    %43 = vector.load %arg6[%c1, %c0_22, %c0_23] : memref<4x32x8xf32, #tpu.memory_space<vmem>>, vector<1x32x8xf32>
    %44 = vector.shape_cast %43 : vector<1x32x8xf32> to vector<32x8xf32>
    %cst_24 = arith.constant dense<0.000000e+00> : vector<16x8xf32>
    %45 = tpu.matmul %34, %44, %cst_24 {dimension_numbers = #tpu.dot_dimension_numbers<[1], [0], [0], [1], [0, 0, 1, 1], [], []>} : vector<16x32xf32>, vector<32x8xf32>, vector<16x8xf32> -> vector<16x8xf32>
    %c1_25 = arith.constant 1 : index
    %c0_26 = arith.constant 0 : index
    %c0_27 = arith.constant 0 : index
    %46 = vector.load %arg9[%c1_25, %c0_26, %c0_27] : memref<4x1x8xf32, #tpu.memory_space<vmem>>, vector<1x1x8xf32>
    %47 = vector.shape_cast %46 : vector<1x1x8xf32> to vector<1x8xf32>
    %48 = vector.broadcast %47 : vector<1x8xf32> to vector<16x8xf32>
    %49 = arith.addf %45, %48 : vector<16x8xf32>
    %c2 = arith.constant 2 : index
    %c0_28 = arith.constant 0 : index
    %c0_29 = arith.constant 0 : index
    %50 = vector.load %arg6[%c2, %c0_28, %c0_29] : memref<4x32x8xf32, #tpu.memory_space<vmem>>, vector<1x32x8xf32>
    %51 = vector.shape_cast %50 : vector<1x32x8xf32> to vector<32x8xf32>
    %cst_30 = arith.constant dense<0.000000e+00> : vector<16x8xf32>
    %52 = tpu.matmul %34, %51, %cst_30 {dimension_numbers = #tpu.dot_dimension_numbers<[1], [0], [0], [1], [0, 0, 1, 1], [], []>} : vector<16x32xf32>, vector<32x8xf32>, vector<16x8xf32> -> vector<16x8xf32>
    %c2_31 = arith.constant 2 : index
    %c0_32 = arith.constant 0 : index
    %c0_33 = arith.constant 0 : index
    %53 = vector.load %arg9[%c2_31, %c0_32, %c0_33] : memref<4x1x8xf32, #tpu.memory_space<vmem>>, vector<1x1x8xf32>
    %54 = vector.shape_cast %53 : vector<1x1x8xf32> to vector<1x8xf32>
    %55 = vector.broadcast %54 : vector<1x8xf32> to vector<16x8xf32>
    %56 = arith.addf %52, %55 : vector<16x8xf32>
    %c3 = arith.constant 3 : index
    %c0_34 = arith.constant 0 : index
    %c0_35 = arith.constant 0 : index
    %57 = vector.load %arg6[%c3, %c0_34, %c0_35] : memref<4x32x8xf32, #tpu.memory_space<vmem>>, vector<1x32x8xf32>
    %58 = vector.shape_cast %57 : vector<1x32x8xf32> to vector<32x8xf32>
    %cst_36 = arith.constant dense<0.000000e+00> : vector<16x8xf32>
    %59 = tpu.matmul %34, %58, %cst_36 {dimension_numbers = #tpu.dot_dimension_numbers<[1], [0], [0], [1], [0, 0, 1, 1], [], []>} : vector<16x32xf32>, vector<32x8xf32>, vector<16x8xf32> -> vector<16x8xf32>
    %c3_37 = arith.constant 3 : index
    %c0_38 = arith.constant 0 : index
    %c0_39 = arith.constant 0 : index
    %60 = vector.load %arg9[%c3_37, %c0_38, %c0_39] : memref<4x1x8xf32, #tpu.memory_space<vmem>>, vector<1x1x8xf32>
    %61 = vector.shape_cast %60 : vector<1x1x8xf32> to vector<1x8xf32>
    %62 = vector.broadcast %61 : vector<1x8xf32> to vector<16x8xf32>
    %63 = arith.addf %59, %62 : vector<16x8xf32>
    %c0_40 = arith.constant 0 : index
    %c0_41 = arith.constant 0 : index
    %c0_42 = arith.constant 0 : index
    %64 = vector.load %arg7[%c0_40, %c0_41, %c0_42] : memref<4x32x8xf32, #tpu.memory_space<vmem>>, vector<1x32x8xf32>
    %65 = vector.shape_cast %64 : vector<1x32x8xf32> to vector<32x8xf32>
    %cst_43 = arith.constant dense<0.000000e+00> : vector<16x8xf32>
    %66 = tpu.matmul %34, %65, %cst_43 {dimension_numbers = #tpu.dot_dimension_numbers<[1], [0], [0], [1], [0, 0, 1, 1], [], []>} : vector<16x32xf32>, vector<32x8xf32>, vector<16x8xf32> -> vector<16x8xf32>
    %c0_44 = arith.constant 0 : index
    %c0_45 = arith.constant 0 : index
    %c0_46 = arith.constant 0 : index
    %67 = vector.load %arg10[%c0_44, %c0_45, %c0_46] : memref<4x1x8xf32, #tpu.memory_space<vmem>>, vector<1x1x8xf32>
    %68 = vector.shape_cast %67 : vector<1x1x8xf32> to vector<1x8xf32>
    %69 = vector.broadcast %68 : vector<1x8xf32> to vector<16x8xf32>
    %70 = arith.addf %66, %69 : vector<16x8xf32>
    %c1_47 = arith.constant 1 : index
    %c0_48 = arith.constant 0 : index
    %c0_49 = arith.constant 0 : index
    %71 = vector.load %arg7[%c1_47, %c0_48, %c0_49] : memref<4x32x8xf32, #tpu.memory_space<vmem>>, vector<1x32x8xf32>
    %72 = vector.shape_cast %71 : vector<1x32x8xf32> to vector<32x8xf32>
    %cst_50 = arith.constant dense<0.000000e+00> : vector<16x8xf32>
    %73 = tpu.matmul %34, %72, %cst_50 {dimension_numbers = #tpu.dot_dimension_numbers<[1], [0], [0], [1], [0, 0, 1, 1], [], []>} : vector<16x32xf32>, vector<32x8xf32>, vector<16x8xf32> -> vector<16x8xf32>
    %c1_51 = arith.constant 1 : index
    %c0_52 = arith.constant 0 : index
    %c0_53 = arith.constant 0 : index
    %74 = vector.load %arg10[%c1_51, %c0_52, %c0_53] : memref<4x1x8xf32, #tpu.memory_space<vmem>>, vector<1x1x8xf32>
    %75 = vector.shape_cast %74 : vector<1x1x8xf32> to vector<1x8xf32>
    %76 = vector.broadcast %75 : vector<1x8xf32> to vector<16x8xf32>
    %77 = arith.addf %73, %76 : vector<16x8xf32>
    %c2_54 = arith.constant 2 : index
    %c0_55 = arith.constant 0 : index
    %c0_56 = arith.constant 0 : index
    %78 = vector.load %arg7[%c2_54, %c0_55, %c0_56] : memref<4x32x8xf32, #tpu.memory_space<vmem>>, vector<1x32x8xf32>
    %79 = vector.shape_cast %78 : vector<1x32x8xf32> to vector<32x8xf32>
    %cst_57 = arith.constant dense<0.000000e+00> : vector<16x8xf32>
    %80 = tpu.matmul %34, %79, %cst_57 {dimension_numbers = #tpu.dot_dimension_numbers<[1], [0], [0], [1], [0, 0, 1, 1], [], []>} : vector<16x32xf32>, vector<32x8xf32>, vector<16x8xf32> -> vector<16x8xf32>
    %c2_58 = arith.constant 2 : index
    %c0_59 = arith.constant 0 : index
    %c0_60 = arith.constant 0 : index
    %81 = vector.load %arg10[%c2_58, %c0_59, %c0_60] : memref<4x1x8xf32, #tpu.memory_space<vmem>>, vector<1x1x8xf32>
    %82 = vector.shape_cast %81 : vector<1x1x8xf32> to vector<1x8xf32>
    %83 = vector.broadcast %82 : vector<1x8xf32> to vector<16x8xf32>
    %84 = arith.addf %80, %83 : vector<16x8xf32>
    %c3_61 = arith.constant 3 : index
    %c0_62 = arith.constant 0 : index
    %c0_63 = arith.constant 0 : index
    %85 = vector.load %arg7[%c3_61, %c0_62, %c0_63] : memref<4x32x8xf32, #tpu.memory_space<vmem>>, vector<1x32x8xf32>
    %86 = vector.shape_cast %85 : vector<1x32x8xf32> to vector<32x8xf32>
    %cst_64 = arith.constant dense<0.000000e+00> : vector<16x8xf32>
    %87 = tpu.matmul %34, %86, %cst_64 {dimension_numbers = #tpu.dot_dimension_numbers<[1], [0], [0], [1], [0, 0, 1, 1], [], []>} : vector<16x32xf32>, vector<32x8xf32>, vector<16x8xf32> -> vector<16x8xf32>
    %c3_65 = arith.constant 3 : index
    %c0_66 = arith.constant 0 : index
    %c0_67 = arith.constant 0 : index
    %88 = vector.load %arg10[%c3_65, %c0_66, %c0_67] : memref<4x1x8xf32, #tpu.memory_space<vmem>>, vector<1x1x8xf32>
    %89 = vector.shape_cast %88 : vector<1x1x8xf32> to vector<1x8xf32>
    %90 = vector.broadcast %89 : vector<1x8xf32> to vector<16x8xf32>
    %91 = arith.addf %87, %90 : vector<16x8xf32>
    %c0_68 = arith.constant 0 : index
    %c0_69 = arith.constant 0 : index
    %c0_70 = arith.constant 0 : index
    %92 = vector.load %arg8[%c0_68, %c0_69, %c0_70] : memref<4x32x8xf32, #tpu.memory_space<vmem>>, vector<1x32x8xf32>
    %93 = vector.shape_cast %92 : vector<1x32x8xf32> to vector<32x8xf32>
    %cst_71 = arith.constant dense<0.000000e+00> : vector<16x8xf32>
    %94 = tpu.matmul %34, %93, %cst_71 {dimension_numbers = #tpu.dot_dimension_numbers<[1], [0], [0], [1], [0, 0, 1, 1], [], []>} : vector<16x32xf32>, vector<32x8xf32>, vector<16x8xf32> -> vector<16x8xf32>
    %c0_72 = arith.constant 0 : index
    %c0_73 = arith.constant 0 : index
    %c0_74 = arith.constant 0 : index
    %95 = vector.load %arg11[%c0_72, %c0_73, %c0_74] : memref<4x1x8xf32, #tpu.memory_space<vmem>>, vector<1x1x8xf32>
    %96 = vector.shape_cast %95 : vector<1x1x8xf32> to vector<1x8xf32>
    %97 = vector.broadcast %96 : vector<1x8xf32> to vector<16x8xf32>
    %98 = arith.addf %94, %97 : vector<16x8xf32>
    %c1_75 = arith.constant 1 : index
    %c0_76 = arith.constant 0 : index
    %c0_77 = arith.constant 0 : index
    %99 = vector.load %arg8[%c1_75, %c0_76, %c0_77] : memref<4x32x8xf32, #tpu.memory_space<vmem>>, vector<1x32x8xf32>
    %100 = vector.shape_cast %99 : vector<1x32x8xf32> to vector<32x8xf32>
    %cst_78 = arith.constant dense<0.000000e+00> : vector<16x8xf32>
    %101 = tpu.matmul %34, %100, %cst_78 {dimension_numbers = #tpu.dot_dimension_numbers<[1], [0], [0], [1], [0, 0, 1, 1], [], []>} : vector<16x32xf32>, vector<32x8xf32>, vector<16x8xf32> -> vector<16x8xf32>
    %c1_79 = arith.constant 1 : index
    %c0_80 = arith.constant 0 : index
    %c0_81 = arith.constant 0 : index
    %102 = vector.load %arg11[%c1_79, %c0_80, %c0_81] : memref<4x1x8xf32, #tpu.memory_space<vmem>>, vector<1x1x8xf32>
    %103 = vector.shape_cast %102 : vector<1x1x8xf32> to vector<1x8xf32>
    %104 = vector.broadcast %103 : vector<1x8xf32> to vector<16x8xf32>
    %105 = arith.addf %101, %104 : vector<16x8xf32>
    %c2_82 = arith.constant 2 : index
    %c0_83 = arith.constant 0 : index
    %c0_84 = arith.constant 0 : index
    %106 = vector.load %arg8[%c2_82, %c0_83, %c0_84] : memref<4x32x8xf32, #tpu.memory_space<vmem>>, vector<1x32x8xf32>
    %107 = vector.shape_cast %106 : vector<1x32x8xf32> to vector<32x8xf32>
    %cst_85 = arith.constant dense<0.000000e+00> : vector<16x8xf32>
    %108 = tpu.matmul %34, %107, %cst_85 {dimension_numbers = #tpu.dot_dimension_numbers<[1], [0], [0], [1], [0, 0, 1, 1], [], []>} : vector<16x32xf32>, vector<32x8xf32>, vector<16x8xf32> -> vector<16x8xf32>
    %c2_86 = arith.constant 2 : index
    %c0_87 = arith.constant 0 : index
    %c0_88 = arith.constant 0 : index
    %109 = vector.load %arg11[%c2_86, %c0_87, %c0_88] : memref<4x1x8xf32, #tpu.memory_space<vmem>>, vector<1x1x8xf32>
    %110 = vector.shape_cast %109 : vector<1x1x8xf32> to vector<1x8xf32>
    %111 = vector.broadcast %110 : vector<1x8xf32> to vector<16x8xf32>
    %112 = arith.addf %108, %111 : vector<16x8xf32>
    %c3_89 = arith.constant 3 : index
    %c0_90 = arith.constant 0 : index
    %c0_91 = arith.constant 0 : index
    %113 = vector.load %arg8[%c3_89, %c0_90, %c0_91] : memref<4x32x8xf32, #tpu.memory_space<vmem>>, vector<1x32x8xf32>
    %114 = vector.shape_cast %113 : vector<1x32x8xf32> to vector<32x8xf32>
    %cst_92 = arith.constant dense<0.000000e+00> : vector<16x8xf32>
    %115 = tpu.matmul %34, %114, %cst_92 {dimension_numbers = #tpu.dot_dimension_numbers<[1], [0], [0], [1], [0, 0, 1, 1], [], []>} : vector<16x32xf32>, vector<32x8xf32>, vector<16x8xf32> -> vector<16x8xf32>
    %c3_93 = arith.constant 3 : index
    %c0_94 = arith.constant 0 : index
    %c0_95 = arith.constant 0 : index
    %116 = vector.load %arg11[%c3_93, %c0_94, %c0_95] : memref<4x1x8xf32, #tpu.memory_space<vmem>>, vector<1x1x8xf32>
    %117 = vector.shape_cast %116 : vector<1x1x8xf32> to vector<1x8xf32>
    %118 = vector.broadcast %117 : vector<1x8xf32> to vector<16x8xf32>
    %119 = arith.addf %115, %118 : vector<16x8xf32>
    %c0_96 = arith.constant 0 : index
    %c0_97 = arith.constant 0 : index
    %120 = vector.load %arg12[%c0_96, %c0_97] : memref<32x32xf32, #tpu.memory_space<vmem>>, vector<32x32xf32>
    %121 = vector.extract_strided_slice %35 {offsets = [0, 0], sizes = [1, 8], strides = [1, 1]} : vector<2x8xf32> to vector<1x8xf32>
    %122 = vector.extract_strided_slice %42 {offsets = [0, 0], sizes = [8, 8], strides = [1, 1]} : vector<16x8xf32> to vector<8x8xf32>
    %123 = vector.extract_strided_slice %70 {offsets = [0, 0], sizes = [8, 8], strides = [1, 1]} : vector<16x8xf32> to vector<8x8xf32>
    %124 = vector.extract_strided_slice %98 {offsets = [0, 0], sizes = [8, 8], strides = [1, 1]} : vector<16x8xf32> to vector<8x8xf32>
    %cst_98 = arith.constant dense<0.000000e+00> : vector<8x8xf32>
    %125 = tpu.matmul %122, %123, %cst_98 {dimension_numbers = #tpu.dot_dimension_numbers<[1], [1], [0], [0], [0, 0, 1, 0], [], []>} : vector<8x8xf32>, vector<8x8xf32>, vector<8x8xf32> -> vector<8x8xf32>
    %cst_99 = arith.constant 0.353553385 : f32
    %126 = vector.broadcast %cst_99 : f32 to vector<8x8xf32>
    %127 = arith.mulf %125, %126 : vector<8x8xf32>
    %128 = vector.broadcast %121 : vector<1x8xf32> to vector<8x8xf32>
    %129 = arith.addf %127, %128 : vector<8x8xf32>
    %cst_100 = arith.constant dense<0xFF800000> : vector<8xf32>
    %130 = vector.multi_reduction <maximumf>, %129, %cst_100 [1] : vector<8x8xf32> to vector<8xf32>
    %131 = vector.shape_cast %130 : vector<8xf32> to vector<8x1xf32>
    %132 = vector.broadcast %131 : vector<8x1xf32> to vector<8x8xf32>
    %133 = arith.subf %129, %132 : vector<8x8xf32>
    %134 = math.exp %133 : vector<8x8xf32>
    %cst_101 = arith.constant dense<0.000000e+00> : vector<8xf32>
    %135 = vector.multi_reduction <add>, %134, %cst_101 [1] : vector<8x8xf32> to vector<8xf32>
    %136 = vector.shape_cast %135 : vector<8xf32> to vector<8x1xf32>
    %137 = tpu.reciprocal %136 {approx = true} : vector<8x1xf32> -> vector<8x1xf32>
    %138 = vector.broadcast %137 : vector<8x1xf32> to vector<8x8xf32>
    %139 = arith.mulf %134, %138 : vector<8x8xf32>
    %cst_102 = arith.constant dense<0.000000e+00> : vector<8x8xf32>
    %140 = tpu.matmul %139, %124, %cst_102 {dimension_numbers = #tpu.dot_dimension_numbers<[1], [0], [0], [1], [0, 0, 1, 1], [], []>} : vector<8x8xf32>, vector<8x8xf32>, vector<8x8xf32> -> vector<8x8xf32>
    %141 = vector.extract_strided_slice %49 {offsets = [0, 0], sizes = [8, 8], strides = [1, 1]} : vector<16x8xf32> to vector<8x8xf32>
    %142 = vector.extract_strided_slice %77 {offsets = [0, 0], sizes = [8, 8], strides = [1, 1]} : vector<16x8xf32> to vector<8x8xf32>
    %143 = vector.extract_strided_slice %105 {offsets = [0, 0], sizes = [8, 8], strides = [1, 1]} : vector<16x8xf32> to vector<8x8xf32>
    %cst_103 = arith.constant dense<0.000000e+00> : vector<8x8xf32>
    %144 = tpu.matmul %141, %142, %cst_103 {dimension_numbers = #tpu.dot_dimension_numbers<[1], [1], [0], [0], [0, 0, 1, 0], [], []>} : vector<8x8xf32>, vector<8x8xf32>, vector<8x8xf32> -> vector<8x8xf32>
    %cst_104 = arith.constant 0.353553385 : f32
    %145 = vector.broadcast %cst_104 : f32 to vector<8x8xf32>
    %146 = arith.mulf %144, %145 : vector<8x8xf32>
    %147 = vector.broadcast %121 : vector<1x8xf32> to vector<8x8xf32>
    %148 = arith.addf %146, %147 : vector<8x8xf32>
    %cst_105 = arith.constant dense<0xFF800000> : vector<8xf32>
    %149 = vector.multi_reduction <maximumf>, %148, %cst_105 [1] : vector<8x8xf32> to vector<8xf32>
    %150 = vector.shape_cast %149 : vector<8xf32> to vector<8x1xf32>
    %151 = vector.broadcast %150 : vector<8x1xf32> to vector<8x8xf32>
    %152 = arith.subf %148, %151 : vector<8x8xf32>
    %153 = math.exp %152 : vector<8x8xf32>
    %cst_106 = arith.constant dense<0.000000e+00> : vector<8xf32>
    %154 = vector.multi_reduction <add>, %153, %cst_106 [1] : vector<8x8xf32> to vector<8xf32>
    %155 = vector.shape_cast %154 : vector<8xf32> to vector<8x1xf32>
    %156 = tpu.reciprocal %155 {approx = true} : vector<8x1xf32> -> vector<8x1xf32>
    %157 = vector.broadcast %156 : vector<8x1xf32> to vector<8x8xf32>
    %158 = arith.mulf %153, %157 : vector<8x8xf32>
    %cst_107 = arith.constant dense<0.000000e+00> : vector<8x8xf32>
    %159 = tpu.matmul %158, %143, %cst_107 {dimension_numbers = #tpu.dot_dimension_numbers<[1], [0], [0], [1], [0, 0, 1, 1], [], []>} : vector<8x8xf32>, vector<8x8xf32>, vector<8x8xf32> -> vector<8x8xf32>
    %160 = vector.extract_strided_slice %56 {offsets = [0, 0], sizes = [8, 8], strides = [1, 1]} : vector<16x8xf32> to vector<8x8xf32>
    %161 = vector.extract_strided_slice %84 {offsets = [0, 0], sizes = [8, 8], strides = [1, 1]} : vector<16x8xf32> to vector<8x8xf32>
    %162 = vector.extract_strided_slice %112 {offsets = [0, 0], sizes = [8, 8], strides = [1, 1]} : vector<16x8xf32> to vector<8x8xf32>
    %cst_108 = arith.constant dense<0.000000e+00> : vector<8x8xf32>
    %163 = tpu.matmul %160, %161, %cst_108 {dimension_numbers = #tpu.dot_dimension_numbers<[1], [1], [0], [0], [0, 0, 1, 0], [], []>} : vector<8x8xf32>, vector<8x8xf32>, vector<8x8xf32> -> vector<8x8xf32>
    %cst_109 = arith.constant 0.353553385 : f32
    %164 = vector.broadcast %cst_109 : f32 to vector<8x8xf32>
    %165 = arith.mulf %163, %164 : vector<8x8xf32>
    %166 = vector.broadcast %121 : vector<1x8xf32> to vector<8x8xf32>
    %167 = arith.addf %165, %166 : vector<8x8xf32>
    %cst_110 = arith.constant dense<0xFF800000> : vector<8xf32>
    %168 = vector.multi_reduction <maximumf>, %167, %cst_110 [1] : vector<8x8xf32> to vector<8xf32>
    %169 = vector.shape_cast %168 : vector<8xf32> to vector<8x1xf32>
    %170 = vector.broadcast %169 : vector<8x1xf32> to vector<8x8xf32>
    %171 = arith.subf %167, %170 : vector<8x8xf32>
    %172 = math.exp %171 : vector<8x8xf32>
    %cst_111 = arith.constant dense<0.000000e+00> : vector<8xf32>
    %173 = vector.multi_reduction <add>, %172, %cst_111 [1] : vector<8x8xf32> to vector<8xf32>
    %174 = vector.shape_cast %173 : vector<8xf32> to vector<8x1xf32>
    %175 = tpu.reciprocal %174 {approx = true} : vector<8x1xf32> -> vector<8x1xf32>
    %176 = vector.broadcast %175 : vector<8x1xf32> to vector<8x8xf32>
    %177 = arith.mulf %172, %176 : vector<8x8xf32>
    %cst_112 = arith.constant dense<0.000000e+00> : vector<8x8xf32>
    %178 = tpu.matmul %177, %162, %cst_112 {dimension_numbers = #tpu.dot_dimension_numbers<[1], [0], [0], [1], [0, 0, 1, 1], [], []>} : vector<8x8xf32>, vector<8x8xf32>, vector<8x8xf32> -> vector<8x8xf32>
    %179 = vector.extract_strided_slice %63 {offsets = [0, 0], sizes = [8, 8], strides = [1, 1]} : vector<16x8xf32> to vector<8x8xf32>
    %180 = vector.extract_strided_slice %91 {offsets = [0, 0], sizes = [8, 8], strides = [1, 1]} : vector<16x8xf32> to vector<8x8xf32>
    %181 = vector.extract_strided_slice %119 {offsets = [0, 0], sizes = [8, 8], strides = [1, 1]} : vector<16x8xf32> to vector<8x8xf32>
    %cst_113 = arith.constant dense<0.000000e+00> : vector<8x8xf32>
    %182 = tpu.matmul %179, %180, %cst_113 {dimension_numbers = #tpu.dot_dimension_numbers<[1], [1], [0], [0], [0, 0, 1, 0], [], []>} : vector<8x8xf32>, vector<8x8xf32>, vector<8x8xf32> -> vector<8x8xf32>
    %cst_114 = arith.constant 0.353553385 : f32
    %183 = vector.broadcast %cst_114 : f32 to vector<8x8xf32>
    %184 = arith.mulf %182, %183 : vector<8x8xf32>
    %185 = vector.broadcast %121 : vector<1x8xf32> to vector<8x8xf32>
    %186 = arith.addf %184, %185 : vector<8x8xf32>
    %cst_115 = arith.constant dense<0xFF800000> : vector<8xf32>
    %187 = vector.multi_reduction <maximumf>, %186, %cst_115 [1] : vector<8x8xf32> to vector<8xf32>
    %188 = vector.shape_cast %187 : vector<8xf32> to vector<8x1xf32>
    %189 = vector.broadcast %188 : vector<8x1xf32> to vector<8x8xf32>
    %190 = arith.subf %186, %189 : vector<8x8xf32>
    %191 = math.exp %190 : vector<8x8xf32>
    %cst_116 = arith.constant dense<0.000000e+00> : vector<8xf32>
    %192 = vector.multi_reduction <add>, %191, %cst_116 [1] : vector<8x8xf32> to vector<8xf32>
    %193 = vector.shape_cast %192 : vector<8xf32> to vector<8x1xf32>
    %194 = tpu.reciprocal %193 {approx = true} : vector<8x1xf32> -> vector<8x1xf32>
    %195 = vector.broadcast %194 : vector<8x1xf32> to vector<8x8xf32>
    %196 = arith.mulf %191, %195 : vector<8x8xf32>
    %cst_117 = arith.constant dense<0.000000e+00> : vector<8x8xf32>
    %197 = tpu.matmul %196, %181, %cst_117 {dimension_numbers = #tpu.dot_dimension_numbers<[1], [0], [0], [1], [0, 0, 1, 1], [], []>} : vector<8x8xf32>, vector<8x8xf32>, vector<8x8xf32> -> vector<8x8xf32>
    %198 = tpu.concatenate %140, %159, %178, %197 in 1 : vector<8x8xf32>, vector<8x8xf32>, vector<8x8xf32>, vector<8x8xf32> -> vector<8x32xf32>
    %cst_118 = arith.constant dense<0.000000e+00> : vector<8x32xf32>
    %199 = tpu.matmul %198, %120, %cst_118 {dimension_numbers = #tpu.dot_dimension_numbers<[1], [0], [0], [1], [0, 0, 1, 1], [], []>} : vector<8x32xf32>, vector<32x32xf32>, vector<8x32xf32> -> vector<8x32xf32>
    %200 = vector.extract_strided_slice %35 {offsets = [1, 0], sizes = [1, 8], strides = [1, 1]} : vector<2x8xf32> to vector<1x8xf32>
    %201 = vector.extract_strided_slice %42 {offsets = [8, 0], sizes = [8, 8], strides = [1, 1]} : vector<16x8xf32> to vector<8x8xf32>
    %202 = vector.extract_strided_slice %70 {offsets = [8, 0], sizes = [8, 8], strides = [1, 1]} : vector<16x8xf32> to vector<8x8xf32>
    %203 = vector.extract_strided_slice %98 {offsets = [8, 0], sizes = [8, 8], strides = [1, 1]} : vector<16x8xf32> to vector<8x8xf32>
    %cst_119 = arith.constant dense<0.000000e+00> : vector<8x8xf32>
    %204 = tpu.matmul %201, %202, %cst_119 {dimension_numbers = #tpu.dot_dimension_numbers<[1], [1], [0], [0], [0, 0, 1, 0], [], []>} : vector<8x8xf32>, vector<8x8xf32>, vector<8x8xf32> -> vector<8x8xf32>
    %cst_120 = arith.constant 0.353553385 : f32
    %205 = vector.broadcast %cst_120 : f32 to vector<8x8xf32>
    %206 = arith.mulf %204, %205 : vector<8x8xf32>
    %207 = vector.broadcast %200 : vector<1x8xf32> to vector<8x8xf32>
    %208 = arith.addf %206, %207 : vector<8x8xf32>
    %cst_121 = arith.constant dense<0xFF800000> : vector<8xf32>
    %209 = vector.multi_reduction <maximumf>, %208, %cst_121 [1] : vector<8x8xf32> to vector<8xf32>
    %210 = vector.shape_cast %209 : vector<8xf32> to vector<8x1xf32>
    %211 = vector.broadcast %210 : vector<8x1xf32> to vector<8x8xf32>
    %212 = arith.subf %208, %211 : vector<8x8xf32>
    %213 = math.exp %212 : vector<8x8xf32>
    %cst_122 = arith.constant dense<0.000000e+00> : vector<8xf32>
    %214 = vector.multi_reduction <add>, %213, %cst_122 [1] : vector<8x8xf32> to vector<8xf32>
    %215 = vector.shape_cast %214 : vector<8xf32> to vector<8x1xf32>
    %216 = tpu.reciprocal %215 {approx = true} : vector<8x1xf32> -> vector<8x1xf32>
    %217 = vector.broadcast %216 : vector<8x1xf32> to vector<8x8xf32>
    %218 = arith.mulf %213, %217 : vector<8x8xf32>
    %cst_123 = arith.constant dense<0.000000e+00> : vector<8x8xf32>
    %219 = tpu.matmul %218, %203, %cst_123 {dimension_numbers = #tpu.dot_dimension_numbers<[1], [0], [0], [1], [0, 0, 1, 1], [], []>} : vector<8x8xf32>, vector<8x8xf32>, vector<8x8xf32> -> vector<8x8xf32>
    %220 = vector.extract_strided_slice %49 {offsets = [8, 0], sizes = [8, 8], strides = [1, 1]} : vector<16x8xf32> to vector<8x8xf32>
    %221 = vector.extract_strided_slice %77 {offsets = [8, 0], sizes = [8, 8], strides = [1, 1]} : vector<16x8xf32> to vector<8x8xf32>
    %222 = vector.extract_strided_slice %105 {offsets = [8, 0], sizes = [8, 8], strides = [1, 1]} : vector<16x8xf32> to vector<8x8xf32>
    %cst_124 = arith.constant dense<0.000000e+00> : vector<8x8xf32>
    %223 = tpu.matmul %220, %221, %cst_124 {dimension_numbers = #tpu.dot_dimension_numbers<[1], [1], [0], [0], [0, 0, 1, 0], [], []>} : vector<8x8xf32>, vector<8x8xf32>, vector<8x8xf32> -> vector<8x8xf32>
    %cst_125 = arith.constant 0.353553385 : f32
    %224 = vector.broadcast %cst_125 : f32 to vector<8x8xf32>
    %225 = arith.mulf %223, %224 : vector<8x8xf32>
    %226 = vector.broadcast %200 : vector<1x8xf32> to vector<8x8xf32>
    %227 = arith.addf %225, %226 : vector<8x8xf32>
    %cst_126 = arith.constant dense<0xFF800000> : vector<8xf32>
    %228 = vector.multi_reduction <maximumf>, %227, %cst_126 [1] : vector<8x8xf32> to vector<8xf32>
    %229 = vector.shape_cast %228 : vector<8xf32> to vector<8x1xf32>
    %230 = vector.broadcast %229 : vector<8x1xf32> to vector<8x8xf32>
    %231 = arith.subf %227, %230 : vector<8x8xf32>
    %232 = math.exp %231 : vector<8x8xf32>
    %cst_127 = arith.constant dense<0.000000e+00> : vector<8xf32>
    %233 = vector.multi_reduction <add>, %232, %cst_127 [1] : vector<8x8xf32> to vector<8xf32>
    %234 = vector.shape_cast %233 : vector<8xf32> to vector<8x1xf32>
    %235 = tpu.reciprocal %234 {approx = true} : vector<8x1xf32> -> vector<8x1xf32>
    %236 = vector.broadcast %235 : vector<8x1xf32> to vector<8x8xf32>
    %237 = arith.mulf %232, %236 : vector<8x8xf32>
    %cst_128 = arith.constant dense<0.000000e+00> : vector<8x8xf32>
    %238 = tpu.matmul %237, %222, %cst_128 {dimension_numbers = #tpu.dot_dimension_numbers<[1], [0], [0], [1], [0, 0, 1, 1], [], []>} : vector<8x8xf32>, vector<8x8xf32>, vector<8x8xf32> -> vector<8x8xf32>
    %239 = vector.extract_strided_slice %56 {offsets = [8, 0], sizes = [8, 8], strides = [1, 1]} : vector<16x8xf32> to vector<8x8xf32>
    %240 = vector.extract_strided_slice %84 {offsets = [8, 0], sizes = [8, 8], strides = [1, 1]} : vector<16x8xf32> to vector<8x8xf32>
    %241 = vector.extract_strided_slice %112 {offsets = [8, 0], sizes = [8, 8], strides = [1, 1]} : vector<16x8xf32> to vector<8x8xf32>
    %cst_129 = arith.constant dense<0.000000e+00> : vector<8x8xf32>
    %242 = tpu.matmul %239, %240, %cst_129 {dimension_numbers = #tpu.dot_dimension_numbers<[1], [1], [0], [0], [0, 0, 1, 0], [], []>} : vector<8x8xf32>, vector<8x8xf32>, vector<8x8xf32> -> vector<8x8xf32>
    %cst_130 = arith.constant 0.353553385 : f32
    %243 = vector.broadcast %cst_130 : f32 to vector<8x8xf32>
    %244 = arith.mulf %242, %243 : vector<8x8xf32>
    %245 = vector.broadcast %200 : vector<1x8xf32> to vector<8x8xf32>
    %246 = arith.addf %244, %245 : vector<8x8xf32>
    %cst_131 = arith.constant dense<0xFF800000> : vector<8xf32>
    %247 = vector.multi_reduction <maximumf>, %246, %cst_131 [1] : vector<8x8xf32> to vector<8xf32>
    %248 = vector.shape_cast %247 : vector<8xf32> to vector<8x1xf32>
    %249 = vector.broadcast %248 : vector<8x1xf32> to vector<8x8xf32>
    %250 = arith.subf %246, %249 : vector<8x8xf32>
    %251 = math.exp %250 : vector<8x8xf32>
    %cst_132 = arith.constant dense<0.000000e+00> : vector<8xf32>
    %252 = vector.multi_reduction <add>, %251, %cst_132 [1] : vector<8x8xf32> to vector<8xf32>
    %253 = vector.shape_cast %252 : vector<8xf32> to vector<8x1xf32>
    %254 = tpu.reciprocal %253 {approx = true} : vector<8x1xf32> -> vector<8x1xf32>
    %255 = vector.broadcast %254 : vector<8x1xf32> to vector<8x8xf32>
    %256 = arith.mulf %251, %255 : vector<8x8xf32>
    %cst_133 = arith.constant dense<0.000000e+00> : vector<8x8xf32>
    %257 = tpu.matmul %256, %241, %cst_133 {dimension_numbers = #tpu.dot_dimension_numbers<[1], [0], [0], [1], [0, 0, 1, 1], [], []>} : vector<8x8xf32>, vector<8x8xf32>, vector<8x8xf32> -> vector<8x8xf32>
    %258 = vector.extract_strided_slice %63 {offsets = [8, 0], sizes = [8, 8], strides = [1, 1]} : vector<16x8xf32> to vector<8x8xf32>
    %259 = vector.extract_strided_slice %91 {offsets = [8, 0], sizes = [8, 8], strides = [1, 1]} : vector<16x8xf32> to vector<8x8xf32>
    %260 = vector.extract_strided_slice %119 {offsets = [8, 0], sizes = [8, 8], strides = [1, 1]} : vector<16x8xf32> to vector<8x8xf32>
    %cst_134 = arith.constant dense<0.000000e+00> : vector<8x8xf32>
    %261 = tpu.matmul %258, %259, %cst_134 {dimension_numbers = #tpu.dot_dimension_numbers<[1], [1], [0], [0], [0, 0, 1, 0], [], []>} : vector<8x8xf32>, vector<8x8xf32>, vector<8x8xf32> -> vector<8x8xf32>
    %cst_135 = arith.constant 0.353553385 : f32
    %262 = vector.broadcast %cst_135 : f32 to vector<8x8xf32>
    %263 = arith.mulf %261, %262 : vector<8x8xf32>
    %264 = vector.broadcast %200 : vector<1x8xf32> to vector<8x8xf32>
    %265 = arith.addf %263, %264 : vector<8x8xf32>
    %cst_136 = arith.constant dense<0xFF800000> : vector<8xf32>
    %266 = vector.multi_reduction <maximumf>, %265, %cst_136 [1] : vector<8x8xf32> to vector<8xf32>
    %267 = vector.shape_cast %266 : vector<8xf32> to vector<8x1xf32>
    %268 = vector.broadcast %267 : vector<8x1xf32> to vector<8x8xf32>
    %269 = arith.subf %265, %268 : vector<8x8xf32>
    %270 = math.exp %269 : vector<8x8xf32>
    %cst_137 = arith.constant dense<0.000000e+00> : vector<8xf32>
    %271 = vector.multi_reduction <add>, %270, %cst_137 [1] : vector<8x8xf32> to vector<8xf32>
    %272 = vector.shape_cast %271 : vector<8xf32> to vector<8x1xf32>
    %273 = tpu.reciprocal %272 {approx = true} : vector<8x1xf32> -> vector<8x1xf32>
    %274 = vector.broadcast %273 : vector<8x1xf32> to vector<8x8xf32>
    %275 = arith.mulf %270, %274 : vector<8x8xf32>
    %cst_138 = arith.constant dense<0.000000e+00> : vector<8x8xf32>
    %276 = tpu.matmul %275, %260, %cst_138 {dimension_numbers = #tpu.dot_dimension_numbers<[1], [0], [0], [1], [0, 0, 1, 1], [], []>} : vector<8x8xf32>, vector<8x8xf32>, vector<8x8xf32> -> vector<8x8xf32>
    %277 = tpu.concatenate %219, %238, %257, %276 in 1 : vector<8x8xf32>, vector<8x8xf32>, vector<8x8xf32>, vector<8x8xf32> -> vector<8x32xf32>
    %cst_139 = arith.constant dense<0.000000e+00> : vector<8x32xf32>
    %278 = tpu.matmul %277, %120, %cst_139 {dimension_numbers = #tpu.dot_dimension_numbers<[1], [0], [0], [1], [0, 0, 1, 1], [], []>} : vector<8x32xf32>, vector<32x32xf32>, vector<8x32xf32> -> vector<8x32xf32>
    %279 = tpu.concatenate %199, %278 in 0 : vector<8x32xf32>, vector<8x32xf32> -> vector<16x32xf32>
    %c0_140 = arith.constant 0 : index
    %c0_141 = arith.constant 0 : index
    %280 = vector.load %arg13[%c0_140, %c0_141] : memref<1x32xf32, #tpu.memory_space<vmem>>, vector<1x32xf32>
    %281 = vector.broadcast %280 : vector<1x32xf32> to vector<16x32xf32>
    %282 = arith.addf %279, %281 : vector<16x32xf32>
    %283 = arith.addf %282, %34 : vector<16x32xf32>
    %c0_142 = arith.constant 0 : index
    %c0_143 = arith.constant 0 : index
    %284 = vector.load %arg14[%c0_142, %c0_143] : memref<1x32xf32, #tpu.memory_space<vmem>>, vector<1x32xf32>
    %c0_144 = arith.constant 0 : index
    %c0_145 = arith.constant 0 : index
    %285 = vector.load %arg15[%c0_144, %c0_145] : memref<1x32xf32, #tpu.memory_space<vmem>>, vector<1x32xf32>
    %cst_146 = arith.constant dense<0.000000e+00> : vector<16xf32>
    %286 = vector.multi_reduction <add>, %283, %cst_146 [1] : vector<16x32xf32> to vector<16xf32>
    %287 = vector.shape_cast %286 : vector<16xf32> to vector<16x1xf32>
    %cst_147 = arith.constant 3.200000e+01 : f32
    %288 = vector.broadcast %cst_147 : f32 to vector<16x1xf32>
    %289 = arith.divf %287, %288 : vector<16x1xf32>
    %290 = vector.broadcast %289 : vector<16x1xf32> to vector<16x32xf32>
    %291 = arith.subf %283, %290 : vector<16x32xf32>
    %292 = arith.mulf %291, %291 : vector<16x32xf32>
    %cst_148 = arith.constant dense<0.000000e+00> : vector<16xf32>
    %293 = vector.multi_reduction <add>, %292, %cst_148 [1] : vector<16x32xf32> to vector<16xf32>
    %294 = vector.shape_cast %293 : vector<16xf32> to vector<16x1xf32>
    %cst_149 = arith.constant 3.200000e+01 : f32
    %295 = vector.broadcast %cst_149 : f32 to vector<16x1xf32>
    %296 = arith.divf %294, %295 : vector<16x1xf32>
    %297 = vector.broadcast %289 : vector<16x1xf32> to vector<16x32xf32>
    %298 = arith.subf %283, %297 : vector<16x32xf32>
    %cst_150 = arith.constant 9.99999996E-13 : f32
    %299 = vector.broadcast %cst_150 : f32 to vector<16x1xf32>
    %300 = arith.addf %296, %299 : vector<16x1xf32>
    %301 = math.rsqrt %300 : vector<16x1xf32>
    %302 = vector.broadcast %301 : vector<16x1xf32> to vector<16x32xf32>
    %303 = arith.mulf %298, %302 : vector<16x32xf32>
    %304 = vector.broadcast %284 : vector<1x32xf32> to vector<16x32xf32>
    %305 = arith.mulf %303, %304 : vector<16x32xf32>
    %306 = vector.broadcast %285 : vector<1x32xf32> to vector<16x32xf32>
    %307 = arith.addf %305, %306 : vector<16x32xf32>
    %c0_151 = arith.constant 0 : index
    %c0_152 = arith.constant 0 : index
    %308 = vector.load %arg16[%c0_151, %c0_152] : memref<32x64xf32, #tpu.memory_space<vmem>>, vector<32x64xf32>
    %cst_153 = arith.constant dense<0.000000e+00> : vector<16x64xf32>
    %309 = tpu.matmul %307, %308, %cst_153 {dimension_numbers = #tpu.dot_dimension_numbers<[1], [0], [0], [1], [0, 0, 1, 1], [], []>} : vector<16x32xf32>, vector<32x64xf32>, vector<16x64xf32> -> vector<16x64xf32>
    %c0_154 = arith.constant 0 : index
    %c0_155 = arith.constant 0 : index
    %310 = vector.load %arg17[%c0_154, %c0_155] : memref<1x64xf32, #tpu.memory_space<vmem>>, vector<1x64xf32>
    %311 = vector.broadcast %310 : vector<1x64xf32> to vector<16x64xf32>
    %312 = arith.addf %309, %311 : vector<16x64xf32>
    %313 = arith.mulf %312, %312 : vector<16x64xf32>
    %314 = arith.mulf %312, %313 : vector<16x64xf32>
    %cst_156 = arith.constant 4.471500e-02 : f32
    %315 = vector.broadcast %cst_156 : f32 to vector<16x64xf32>
    %316 = arith.mulf %315, %314 : vector<16x64xf32>
    %317 = arith.addf %312, %316 : vector<16x64xf32>
    %cst_157 = arith.constant 0.797884583 : f32
    %318 = vector.broadcast %cst_157 : f32 to vector<16x64xf32>
    %319 = arith.mulf %318, %317 : vector<16x64xf32>
    %320 = math.tanh %319 : vector<16x64xf32>
    %cst_158 = arith.constant 1.000000e+00 : f32
    %321 = vector.broadcast %cst_158 : f32 to vector<16x64xf32>
    %322 = arith.addf %321, %320 : vector<16x64xf32>
    %cst_159 = arith.constant 5.000000e-01 : f32
    %323 = vector.broadcast %cst_159 : f32 to vector<16x64xf32>
    %324 = arith.mulf %323, %322 : vector<16x64xf32>
    %325 = arith.mulf %312, %324 : vector<16x64xf32>
    %c0_160 = arith.constant 0 : index
    %c0_161 = arith.constant 0 : index
    %326 = vector.load %arg18[%c0_160, %c0_161] : memref<64x32xf32, #tpu.memory_space<vmem>>, vector<64x32xf32>
    %cst_162 = arith.constant dense<0.000000e+00> : vector<16x32xf32>
    %327 = tpu.matmul %325, %326, %cst_162 {dimension_numbers = #tpu.dot_dimension_numbers<[1], [0], [0], [1], [0, 0, 1, 1], [], []>} : vector<16x64xf32>, vector<64x32xf32>, vector<16x32xf32> -> vector<16x32xf32>
    %c0_163 = arith.constant 0 : index
    %c0_164 = arith.constant 0 : index
    %328 = vector.load %arg19[%c0_163, %c0_164] : memref<1x32xf32, #tpu.memory_space<vmem>>, vector<1x32xf32>
    %329 = vector.broadcast %328 : vector<1x32xf32> to vector<16x32xf32>
    %330 = arith.addf %327, %329 : vector<16x32xf32>
    %331 = arith.addf %330, %307 : vector<16x32xf32>
    %c0_165 = arith.constant 0 : index
    %c0_166 = arith.constant 0 : index
    %332 = vector.load %arg20[%c0_165, %c0_166] : memref<1x32xf32, #tpu.memory_space<vmem>>, vector<1x32xf32>
    %c0_167 = arith.constant 0 : index
    %c0_168 = arith.constant 0 : index
    %333 = vector.load %arg21[%c0_167, %c0_168] : memref<1x32xf32, #tpu.memory_space<vmem>>, vector<1x32xf32>
    %cst_169 = arith.constant dense<0.000000e+00> : vector<16xf32>
    %334 = vector.multi_reduction <add>, %331, %cst_169 [1] : vector<16x32xf32> to vector<16xf32>
    %335 = vector.shape_cast %334 : vector<16xf32> to vector<16x1xf32>
    %cst_170 = arith.constant 3.200000e+01 : f32
    %336 = vector.broadcast %cst_170 : f32 to vector<16x1xf32>
    %337 = arith.divf %335, %336 : vector<16x1xf32>
    %338 = vector.broadcast %337 : vector<16x1xf32> to vector<16x32xf32>
    %339 = arith.subf %331, %338 : vector<16x32xf32>
    %340 = arith.mulf %339, %339 : vector<16x32xf32>
    %cst_171 = arith.constant dense<0.000000e+00> : vector<16xf32>
    %341 = vector.multi_reduction <add>, %340, %cst_171 [1] : vector<16x32xf32> to vector<16xf32>
    %342 = vector.shape_cast %341 : vector<16xf32> to vector<16x1xf32>
    %cst_172 = arith.constant 3.200000e+01 : f32
    %343 = vector.broadcast %cst_172 : f32 to vector<16x1xf32>
    %344 = arith.divf %342, %343 : vector<16x1xf32>
    %345 = vector.broadcast %337 : vector<16x1xf32> to vector<16x32xf32>
    %346 = arith.subf %331, %345 : vector<16x32xf32>
    %cst_173 = arith.constant 9.99999996E-13 : f32
    %347 = vector.broadcast %cst_173 : f32 to vector<16x1xf32>
    %348 = arith.addf %344, %347 : vector<16x1xf32>
    %349 = math.rsqrt %348 : vector<16x1xf32>
    %350 = vector.broadcast %349 : vector<16x1xf32> to vector<16x32xf32>
    %351 = arith.mulf %346, %350 : vector<16x32xf32>
    %352 = vector.broadcast %332 : vector<1x32xf32> to vector<16x32xf32>
    %353 = arith.mulf %351, %352 : vector<16x32xf32>
    %354 = vector.broadcast %333 : vector<1x32xf32> to vector<16x32xf32>
    %355 = arith.addf %353, %354 : vector<16x32xf32>
    %c0_174 = arith.constant 0 : index
    %c0_175 = arith.constant 0 : index
    %c0_176 = arith.constant 0 : index
    %356 = vector.load %arg22[%c0_174, %c0_175, %c0_176] : memref<4x32x8xf32, #tpu.memory_space<vmem>>, vector<1x32x8xf32>
    %357 = vector.shape_cast %356 : vector<1x32x8xf32> to vector<32x8xf32>
    %cst_177 = arith.constant dense<0.000000e+00> : vector<16x8xf32>
    %358 = tpu.matmul %355, %357, %cst_177 {dimension_numbers = #tpu.dot_dimension_numbers<[1], [0], [0], [1], [0, 0, 1, 1], [], []>} : vector<16x32xf32>, vector<32x8xf32>, vector<16x8xf32> -> vector<16x8xf32>
    %c0_178 = arith.constant 0 : index
    %c0_179 = arith.constant 0 : index
    %c0_180 = arith.constant 0 : index
    %359 = vector.load %arg25[%c0_178, %c0_179, %c0_180] : memref<4x1x8xf32, #tpu.memory_space<vmem>>, vector<1x1x8xf32>
    %360 = vector.shape_cast %359 : vector<1x1x8xf32> to vector<1x8xf32>
    %361 = vector.broadcast %360 : vector<1x8xf32> to vector<16x8xf32>
    %362 = arith.addf %358, %361 : vector<16x8xf32>
    %c1_181 = arith.constant 1 : index
    %c0_182 = arith.constant 0 : index
    %c0_183 = arith.constant 0 : index
    %363 = vector.load %arg22[%c1_181, %c0_182, %c0_183] : memref<4x32x8xf32, #tpu.memory_space<vmem>>, vector<1x32x8xf32>
    %364 = vector.shape_cast %363 : vector<1x32x8xf32> to vector<32x8xf32>
    %cst_184 = arith.constant dense<0.000000e+00> : vector<16x8xf32>
    %365 = tpu.matmul %355, %364, %cst_184 {dimension_numbers = #tpu.dot_dimension_numbers<[1], [0], [0], [1], [0, 0, 1, 1], [], []>} : vector<16x32xf32>, vector<32x8xf32>, vector<16x8xf32> -> vector<16x8xf32>
    %c1_185 = arith.constant 1 : index
    %c0_186 = arith.constant 0 : index
    %c0_187 = arith.constant 0 : index
    %366 = vector.load %arg25[%c1_185, %c0_186, %c0_187] : memref<4x1x8xf32, #tpu.memory_space<vmem>>, vector<1x1x8xf32>
    %367 = vector.shape_cast %366 : vector<1x1x8xf32> to vector<1x8xf32>
    %368 = vector.broadcast %367 : vector<1x8xf32> to vector<16x8xf32>
    %369 = arith.addf %365, %368 : vector<16x8xf32>
    %c2_188 = arith.constant 2 : index
    %c0_189 = arith.constant 0 : index
    %c0_190 = arith.constant 0 : index
    %370 = vector.load %arg22[%c2_188, %c0_189, %c0_190] : memref<4x32x8xf32, #tpu.memory_space<vmem>>, vector<1x32x8xf32>
    %371 = vector.shape_cast %370 : vector<1x32x8xf32> to vector<32x8xf32>
    %cst_191 = arith.constant dense<0.000000e+00> : vector<16x8xf32>
    %372 = tpu.matmul %355, %371, %cst_191 {dimension_numbers = #tpu.dot_dimension_numbers<[1], [0], [0], [1], [0, 0, 1, 1], [], []>} : vector<16x32xf32>, vector<32x8xf32>, vector<16x8xf32> -> vector<16x8xf32>
    %c2_192 = arith.constant 2 : index
    %c0_193 = arith.constant 0 : index
    %c0_194 = arith.constant 0 : index
    %373 = vector.load %arg25[%c2_192, %c0_193, %c0_194] : memref<4x1x8xf32, #tpu.memory_space<vmem>>, vector<1x1x8xf32>
    %374 = vector.shape_cast %373 : vector<1x1x8xf32> to vector<1x8xf32>
    %375 = vector.broadcast %374 : vector<1x8xf32> to vector<16x8xf32>
    %376 = arith.addf %372, %375 : vector<16x8xf32>
    %c3_195 = arith.constant 3 : index
    %c0_196 = arith.constant 0 : index
    %c0_197 = arith.constant 0 : index
    %377 = vector.load %arg22[%c3_195, %c0_196, %c0_197] : memref<4x32x8xf32, #tpu.memory_space<vmem>>, vector<1x32x8xf32>
    %378 = vector.shape_cast %377 : vector<1x32x8xf32> to vector<32x8xf32>
    %cst_198 = arith.constant dense<0.000000e+00> : vector<16x8xf32>
    %379 = tpu.matmul %355, %378, %cst_198 {dimension_numbers = #tpu.dot_dimension_numbers<[1], [0], [0], [1], [0, 0, 1, 1], [], []>} : vector<16x32xf32>, vector<32x8xf32>, vector<16x8xf32> -> vector<16x8xf32>
    %c3_199 = arith.constant 3 : index
    %c0_200 = arith.constant 0 : index
    %c0_201 = arith.constant 0 : index
    %380 = vector.load %arg25[%c3_199, %c0_200, %c0_201] : memref<4x1x8xf32, #tpu.memory_space<vmem>>, vector<1x1x8xf32>
    %381 = vector.shape_cast %380 : vector<1x1x8xf32> to vector<1x8xf32>
    %382 = vector.broadcast %381 : vector<1x8xf32> to vector<16x8xf32>
    %383 = arith.addf %379, %382 : vector<16x8xf32>
    %c0_202 = arith.constant 0 : index
    %c0_203 = arith.constant 0 : index
    %c0_204 = arith.constant 0 : index
    %384 = vector.load %arg23[%c0_202, %c0_203, %c0_204] : memref<4x32x8xf32, #tpu.memory_space<vmem>>, vector<1x32x8xf32>
    %385 = vector.shape_cast %384 : vector<1x32x8xf32> to vector<32x8xf32>
    %cst_205 = arith.constant dense<0.000000e+00> : vector<16x8xf32>
    %386 = tpu.matmul %355, %385, %cst_205 {dimension_numbers = #tpu.dot_dimension_numbers<[1], [0], [0], [1], [0, 0, 1, 1], [], []>} : vector<16x32xf32>, vector<32x8xf32>, vector<16x8xf32> -> vector<16x8xf32>
    %c0_206 = arith.constant 0 : index
    %c0_207 = arith.constant 0 : index
    %c0_208 = arith.constant 0 : index
    %387 = vector.load %arg26[%c0_206, %c0_207, %c0_208] : memref<4x1x8xf32, #tpu.memory_space<vmem>>, vector<1x1x8xf32>
    %388 = vector.shape_cast %387 : vector<1x1x8xf32> to vector<1x8xf32>
    %389 = vector.broadcast %388 : vector<1x8xf32> to vector<16x8xf32>
    %390 = arith.addf %386, %389 : vector<16x8xf32>
    %c1_209 = arith.constant 1 : index
    %c0_210 = arith.constant 0 : index
    %c0_211 = arith.constant 0 : index
    %391 = vector.load %arg23[%c1_209, %c0_210, %c0_211] : memref<4x32x8xf32, #tpu.memory_space<vmem>>, vector<1x32x8xf32>
    %392 = vector.shape_cast %391 : vector<1x32x8xf32> to vector<32x8xf32>
    %cst_212 = arith.constant dense<0.000000e+00> : vector<16x8xf32>
    %393 = tpu.matmul %355, %392, %cst_212 {dimension_numbers = #tpu.dot_dimension_numbers<[1], [0], [0], [1], [0, 0, 1, 1], [], []>} : vector<16x32xf32>, vector<32x8xf32>, vector<16x8xf32> -> vector<16x8xf32>
    %c1_213 = arith.constant 1 : index
    %c0_214 = arith.constant 0 : index
    %c0_215 = arith.constant 0 : index
    %394 = vector.load %arg26[%c1_213, %c0_214, %c0_215] : memref<4x1x8xf32, #tpu.memory_space<vmem>>, vector<1x1x8xf32>
    %395 = vector.shape_cast %394 : vector<1x1x8xf32> to vector<1x8xf32>
    %396 = vector.broadcast %395 : vector<1x8xf32> to vector<16x8xf32>
    %397 = arith.addf %393, %396 : vector<16x8xf32>
    %c2_216 = arith.constant 2 : index
    %c0_217 = arith.constant 0 : index
    %c0_218 = arith.constant 0 : index
    %398 = vector.load %arg23[%c2_216, %c0_217, %c0_218] : memref<4x32x8xf32, #tpu.memory_space<vmem>>, vector<1x32x8xf32>
    %399 = vector.shape_cast %398 : vector<1x32x8xf32> to vector<32x8xf32>
    %cst_219 = arith.constant dense<0.000000e+00> : vector<16x8xf32>
    %400 = tpu.matmul %355, %399, %cst_219 {dimension_numbers = #tpu.dot_dimension_numbers<[1], [0], [0], [1], [0, 0, 1, 1], [], []>} : vector<16x32xf32>, vector<32x8xf32>, vector<16x8xf32> -> vector<16x8xf32>
    %c2_220 = arith.constant 2 : index
    %c0_221 = arith.constant 0 : index
    %c0_222 = arith.constant 0 : index
    %401 = vector.load %arg26[%c2_220, %c0_221, %c0_222] : memref<4x1x8xf32, #tpu.memory_space<vmem>>, vector<1x1x8xf32>
    %402 = vector.shape_cast %401 : vector<1x1x8xf32> to vector<1x8xf32>
    %403 = vector.broadcast %402 : vector<1x8xf32> to vector<16x8xf32>
    %404 = arith.addf %400, %403 : vector<16x8xf32>
    %c3_223 = arith.constant 3 : index
    %c0_224 = arith.constant 0 : index
    %c0_225 = arith.constant 0 : index
    %405 = vector.load %arg23[%c3_223, %c0_224, %c0_225] : memref<4x32x8xf32, #tpu.memory_space<vmem>>, vector<1x32x8xf32>
    %406 = vector.shape_cast %405 : vector<1x32x8xf32> to vector<32x8xf32>
    %cst_226 = arith.constant dense<0.000000e+00> : vector<16x8xf32>
    %407 = tpu.matmul %355, %406, %cst_226 {dimension_numbers = #tpu.dot_dimension_numbers<[1], [0], [0], [1], [0, 0, 1, 1], [], []>} : vector<16x32xf32>, vector<32x8xf32>, vector<16x8xf32> -> vector<16x8xf32>
    %c3_227 = arith.constant 3 : index
    %c0_228 = arith.constant 0 : index
    %c0_229 = arith.constant 0 : index
    %408 = vector.load %arg26[%c3_227, %c0_228, %c0_229] : memref<4x1x8xf32, #tpu.memory_space<vmem>>, vector<1x1x8xf32>
    %409 = vector.shape_cast %408 : vector<1x1x8xf32> to vector<1x8xf32>
    %410 = vector.broadcast %409 : vector<1x8xf32> to vector<16x8xf32>
    %411 = arith.addf %407, %410 : vector<16x8xf32>
    %c0_230 = arith.constant 0 : index
    %c0_231 = arith.constant 0 : index
    %c0_232 = arith.constant 0 : index
    %412 = vector.load %arg24[%c0_230, %c0_231, %c0_232] : memref<4x32x8xf32, #tpu.memory_space<vmem>>, vector<1x32x8xf32>
    %413 = vector.shape_cast %412 : vector<1x32x8xf32> to vector<32x8xf32>
    %cst_233 = arith.constant dense<0.000000e+00> : vector<16x8xf32>
    %414 = tpu.matmul %355, %413, %cst_233 {dimension_numbers = #tpu.dot_dimension_numbers<[1], [0], [0], [1], [0, 0, 1, 1], [], []>} : vector<16x32xf32>, vector<32x8xf32>, vector<16x8xf32> -> vector<16x8xf32>
    %c0_234 = arith.constant 0 : index
    %c0_235 = arith.constant 0 : index
    %c0_236 = arith.constant 0 : index
    %415 = vector.load %arg27[%c0_234, %c0_235, %c0_236] : memref<4x1x8xf32, #tpu.memory_space<vmem>>, vector<1x1x8xf32>
    %416 = vector.shape_cast %415 : vector<1x1x8xf32> to vector<1x8xf32>
    %417 = vector.broadcast %416 : vector<1x8xf32> to vector<16x8xf32>
    %418 = arith.addf %414, %417 : vector<16x8xf32>
    %c1_237 = arith.constant 1 : index
    %c0_238 = arith.constant 0 : index
    %c0_239 = arith.constant 0 : index
    %419 = vector.load %arg24[%c1_237, %c0_238, %c0_239] : memref<4x32x8xf32, #tpu.memory_space<vmem>>, vector<1x32x8xf32>
    %420 = vector.shape_cast %419 : vector<1x32x8xf32> to vector<32x8xf32>
    %cst_240 = arith.constant dense<0.000000e+00> : vector<16x8xf32>
    %421 = tpu.matmul %355, %420, %cst_240 {dimension_numbers = #tpu.dot_dimension_numbers<[1], [0], [0], [1], [0, 0, 1, 1], [], []>} : vector<16x32xf32>, vector<32x8xf32>, vector<16x8xf32> -> vector<16x8xf32>
    %c1_241 = arith.constant 1 : index
    %c0_242 = arith.constant 0 : index
    %c0_243 = arith.constant 0 : index
    %422 = vector.load %arg27[%c1_241, %c0_242, %c0_243] : memref<4x1x8xf32, #tpu.memory_space<vmem>>, vector<1x1x8xf32>
    %423 = vector.shape_cast %422 : vector<1x1x8xf32> to vector<1x8xf32>
    %424 = vector.broadcast %423 : vector<1x8xf32> to vector<16x8xf32>
    %425 = arith.addf %421, %424 : vector<16x8xf32>
    %c2_244 = arith.constant 2 : index
    %c0_245 = arith.constant 0 : index
    %c0_246 = arith.constant 0 : index
    %426 = vector.load %arg24[%c2_244, %c0_245, %c0_246] : memref<4x32x8xf32, #tpu.memory_space<vmem>>, vector<1x32x8xf32>
    %427 = vector.shape_cast %426 : vector<1x32x8xf32> to vector<32x8xf32>
    %cst_247 = arith.constant dense<0.000000e+00> : vector<16x8xf32>
    %428 = tpu.matmul %355, %427, %cst_247 {dimension_numbers = #tpu.dot_dimension_numbers<[1], [0], [0], [1], [0, 0, 1, 1], [], []>} : vector<16x32xf32>, vector<32x8xf32>, vector<16x8xf32> -> vector<16x8xf32>
    %c2_248 = arith.constant 2 : index
    %c0_249 = arith.constant 0 : index
    %c0_250 = arith.constant 0 : index
    %429 = vector.load %arg27[%c2_248, %c0_249, %c0_250] : memref<4x1x8xf32, #tpu.memory_space<vmem>>, vector<1x1x8xf32>
    %430 = vector.shape_cast %429 : vector<1x1x8xf32> to vector<1x8xf32>
    %431 = vector.broadcast %430 : vector<1x8xf32> to vector<16x8xf32>
    %432 = arith.addf %428, %431 : vector<16x8xf32>
    %c3_251 = arith.constant 3 : index
    %c0_252 = arith.constant 0 : index
    %c0_253 = arith.constant 0 : index
    %433 = vector.load %arg24[%c3_251, %c0_252, %c0_253] : memref<4x32x8xf32, #tpu.memory_space<vmem>>, vector<1x32x8xf32>
    %434 = vector.shape_cast %433 : vector<1x32x8xf32> to vector<32x8xf32>
    %cst_254 = arith.constant dense<0.000000e+00> : vector<16x8xf32>
    %435 = tpu.matmul %355, %434, %cst_254 {dimension_numbers = #tpu.dot_dimension_numbers<[1], [0], [0], [1], [0, 0, 1, 1], [], []>} : vector<16x32xf32>, vector<32x8xf32>, vector<16x8xf32> -> vector<16x8xf32>
    %c3_255 = arith.constant 3 : index
    %c0_256 = arith.constant 0 : index
    %c0_257 = arith.constant 0 : index
    %436 = vector.load %arg27[%c3_255, %c0_256, %c0_257] : memref<4x1x8xf32, #tpu.memory_space<vmem>>, vector<1x1x8xf32>
    %437 = vector.shape_cast %436 : vector<1x1x8xf32> to vector<1x8xf32>
    %438 = vector.broadcast %437 : vector<1x8xf32> to vector<16x8xf32>
    %439 = arith.addf %435, %438 : vector<16x8xf32>
    %c0_258 = arith.constant 0 : index
    %c0_259 = arith.constant 0 : index
    %440 = vector.load %arg28[%c0_258, %c0_259] : memref<32x32xf32, #tpu.memory_space<vmem>>, vector<32x32xf32>
    %441 = vector.extract_strided_slice %35 {offsets = [0, 0], sizes = [1, 8], strides = [1, 1]} : vector<2x8xf32> to vector<1x8xf32>
    %442 = vector.extract_strided_slice %362 {offsets = [0, 0], sizes = [8, 8], strides = [1, 1]} : vector<16x8xf32> to vector<8x8xf32>
    %443 = vector.extract_strided_slice %390 {offsets = [0, 0], sizes = [8, 8], strides = [1, 1]} : vector<16x8xf32> to vector<8x8xf32>
    %444 = vector.extract_strided_slice %418 {offsets = [0, 0], sizes = [8, 8], strides = [1, 1]} : vector<16x8xf32> to vector<8x8xf32>
    %cst_260 = arith.constant dense<0.000000e+00> : vector<8x8xf32>
    %445 = tpu.matmul %442, %443, %cst_260 {dimension_numbers = #tpu.dot_dimension_numbers<[1], [1], [0], [0], [0, 0, 1, 0], [], []>} : vector<8x8xf32>, vector<8x8xf32>, vector<8x8xf32> -> vector<8x8xf32>
    %cst_261 = arith.constant 0.353553385 : f32
    %446 = vector.broadcast %cst_261 : f32 to vector<8x8xf32>
    %447 = arith.mulf %445, %446 : vector<8x8xf32>
    %448 = vector.broadcast %441 : vector<1x8xf32> to vector<8x8xf32>
    %449 = arith.addf %447, %448 : vector<8x8xf32>
    %cst_262 = arith.constant dense<0xFF800000> : vector<8xf32>
    %450 = vector.multi_reduction <maximumf>, %449, %cst_262 [1] : vector<8x8xf32> to vector<8xf32>
    %451 = vector.shape_cast %450 : vector<8xf32> to vector<8x1xf32>
    %452 = vector.broadcast %451 : vector<8x1xf32> to vector<8x8xf32>
    %453 = arith.subf %449, %452 : vector<8x8xf32>
    %454 = math.exp %453 : vector<8x8xf32>
    %cst_263 = arith.constant dense<0.000000e+00> : vector<8xf32>
    %455 = vector.multi_reduction <add>, %454, %cst_263 [1] : vector<8x8xf32> to vector<8xf32>
    %456 = vector.shape_cast %455 : vector<8xf32> to vector<8x1xf32>
    %457 = tpu.reciprocal %456 {approx = true} : vector<8x1xf32> -> vector<8x1xf32>
    %458 = vector.broadcast %457 : vector<8x1xf32> to vector<8x8xf32>
    %459 = arith.mulf %454, %458 : vector<8x8xf32>
    %cst_264 = arith.constant dense<0.000000e+00> : vector<8x8xf32>
    %460 = tpu.matmul %459, %444, %cst_264 {dimension_numbers = #tpu.dot_dimension_numbers<[1], [0], [0], [1], [0, 0, 1, 1], [], []>} : vector<8x8xf32>, vector<8x8xf32>, vector<8x8xf32> -> vector<8x8xf32>
    %461 = vector.extract_strided_slice %369 {offsets = [0, 0], sizes = [8, 8], strides = [1, 1]} : vector<16x8xf32> to vector<8x8xf32>
    %462 = vector.extract_strided_slice %397 {offsets = [0, 0], sizes = [8, 8], strides = [1, 1]} : vector<16x8xf32> to vector<8x8xf32>
    %463 = vector.extract_strided_slice %425 {offsets = [0, 0], sizes = [8, 8], strides = [1, 1]} : vector<16x8xf32> to vector<8x8xf32>
    %cst_265 = arith.constant dense<0.000000e+00> : vector<8x8xf32>
    %464 = tpu.matmul %461, %462, %cst_265 {dimension_numbers = #tpu.dot_dimension_numbers<[1], [1], [0], [0], [0, 0, 1, 0], [], []>} : vector<8x8xf32>, vector<8x8xf32>, vector<8x8xf32> -> vector<8x8xf32>
    %cst_266 = arith.constant 0.353553385 : f32
    %465 = vector.broadcast %cst_266 : f32 to vector<8x8xf32>
    %466 = arith.mulf %464, %465 : vector<8x8xf32>
    %467 = vector.broadcast %441 : vector<1x8xf32> to vector<8x8xf32>
    %468 = arith.addf %466, %467 : vector<8x8xf32>
    %cst_267 = arith.constant dense<0xFF800000> : vector<8xf32>
    %469 = vector.multi_reduction <maximumf>, %468, %cst_267 [1] : vector<8x8xf32> to vector<8xf32>
    %470 = vector.shape_cast %469 : vector<8xf32> to vector<8x1xf32>
    %471 = vector.broadcast %470 : vector<8x1xf32> to vector<8x8xf32>
    %472 = arith.subf %468, %471 : vector<8x8xf32>
    %473 = math.exp %472 : vector<8x8xf32>
    %cst_268 = arith.constant dense<0.000000e+00> : vector<8xf32>
    %474 = vector.multi_reduction <add>, %473, %cst_268 [1] : vector<8x8xf32> to vector<8xf32>
    %475 = vector.shape_cast %474 : vector<8xf32> to vector<8x1xf32>
    %476 = tpu.reciprocal %475 {approx = true} : vector<8x1xf32> -> vector<8x1xf32>
    %477 = vector.broadcast %476 : vector<8x1xf32> to vector<8x8xf32>
    %478 = arith.mulf %473, %477 : vector<8x8xf32>
    %cst_269 = arith.constant dense<0.000000e+00> : vector<8x8xf32>
    %479 = tpu.matmul %478, %463, %cst_269 {dimension_numbers = #tpu.dot_dimension_numbers<[1], [0], [0], [1], [0, 0, 1, 1], [], []>} : vector<8x8xf32>, vector<8x8xf32>, vector<8x8xf32> -> vector<8x8xf32>
    %480 = vector.extract_strided_slice %376 {offsets = [0, 0], sizes = [8, 8], strides = [1, 1]} : vector<16x8xf32> to vector<8x8xf32>
    %481 = vector.extract_strided_slice %404 {offsets = [0, 0], sizes = [8, 8], strides = [1, 1]} : vector<16x8xf32> to vector<8x8xf32>
    %482 = vector.extract_strided_slice %432 {offsets = [0, 0], sizes = [8, 8], strides = [1, 1]} : vector<16x8xf32> to vector<8x8xf32>
    %cst_270 = arith.constant dense<0.000000e+00> : vector<8x8xf32>
    %483 = tpu.matmul %480, %481, %cst_270 {dimension_numbers = #tpu.dot_dimension_numbers<[1], [1], [0], [0], [0, 0, 1, 0], [], []>} : vector<8x8xf32>, vector<8x8xf32>, vector<8x8xf32> -> vector<8x8xf32>
    %cst_271 = arith.constant 0.353553385 : f32
    %484 = vector.broadcast %cst_271 : f32 to vector<8x8xf32>
    %485 = arith.mulf %483, %484 : vector<8x8xf32>
    %486 = vector.broadcast %441 : vector<1x8xf32> to vector<8x8xf32>
    %487 = arith.addf %485, %486 : vector<8x8xf32>
    %cst_272 = arith.constant dense<0xFF800000> : vector<8xf32>
    %488 = vector.multi_reduction <maximumf>, %487, %cst_272 [1] : vector<8x8xf32> to vector<8xf32>
    %489 = vector.shape_cast %488 : vector<8xf32> to vector<8x1xf32>
    %490 = vector.broadcast %489 : vector<8x1xf32> to vector<8x8xf32>
    %491 = arith.subf %487, %490 : vector<8x8xf32>
    %492 = math.exp %491 : vector<8x8xf32>
    %cst_273 = arith.constant dense<0.000000e+00> : vector<8xf32>
    %493 = vector.multi_reduction <add>, %492, %cst_273 [1] : vector<8x8xf32> to vector<8xf32>
    %494 = vector.shape_cast %493 : vector<8xf32> to vector<8x1xf32>
    %495 = tpu.reciprocal %494 {approx = true} : vector<8x1xf32> -> vector<8x1xf32>
    %496 = vector.broadcast %495 : vector<8x1xf32> to vector<8x8xf32>
    %497 = arith.mulf %492, %496 : vector<8x8xf32>
    %cst_274 = arith.constant dense<0.000000e+00> : vector<8x8xf32>
    %498 = tpu.matmul %497, %482, %cst_274 {dimension_numbers = #tpu.dot_dimension_numbers<[1], [0], [0], [1], [0, 0, 1, 1], [], []>} : vector<8x8xf32>, vector<8x8xf32>, vector<8x8xf32> -> vector<8x8xf32>
    %499 = vector.extract_strided_slice %383 {offsets = [0, 0], sizes = [8, 8], strides = [1, 1]} : vector<16x8xf32> to vector<8x8xf32>
    %500 = vector.extract_strided_slice %411 {offsets = [0, 0], sizes = [8, 8], strides = [1, 1]} : vector<16x8xf32> to vector<8x8xf32>
    %501 = vector.extract_strided_slice %439 {offsets = [0, 0], sizes = [8, 8], strides = [1, 1]} : vector<16x8xf32> to vector<8x8xf32>
    %cst_275 = arith.constant dense<0.000000e+00> : vector<8x8xf32>
    %502 = tpu.matmul %499, %500, %cst_275 {dimension_numbers = #tpu.dot_dimension_numbers<[1], [1], [0], [0], [0, 0, 1, 0], [], []>} : vector<8x8xf32>, vector<8x8xf32>, vector<8x8xf32> -> vector<8x8xf32>
    %cst_276 = arith.constant 0.353553385 : f32
    %503 = vector.broadcast %cst_276 : f32 to vector<8x8xf32>
    %504 = arith.mulf %502, %503 : vector<8x8xf32>
    %505 = vector.broadcast %441 : vector<1x8xf32> to vector<8x8xf32>
    %506 = arith.addf %504, %505 : vector<8x8xf32>
    %cst_277 = arith.constant dense<0xFF800000> : vector<8xf32>
    %507 = vector.multi_reduction <maximumf>, %506, %cst_277 [1] : vector<8x8xf32> to vector<8xf32>
    %508 = vector.shape_cast %507 : vector<8xf32> to vector<8x1xf32>
    %509 = vector.broadcast %508 : vector<8x1xf32> to vector<8x8xf32>
    %510 = arith.subf %506, %509 : vector<8x8xf32>
    %511 = math.exp %510 : vector<8x8xf32>
    %cst_278 = arith.constant dense<0.000000e+00> : vector<8xf32>
    %512 = vector.multi_reduction <add>, %511, %cst_278 [1] : vector<8x8xf32> to vector<8xf32>
    %513 = vector.shape_cast %512 : vector<8xf32> to vector<8x1xf32>
    %514 = tpu.reciprocal %513 {approx = true} : vector<8x1xf32> -> vector<8x1xf32>
    %515 = vector.broadcast %514 : vector<8x1xf32> to vector<8x8xf32>
    %516 = arith.mulf %511, %515 : vector<8x8xf32>
    %cst_279 = arith.constant dense<0.000000e+00> : vector<8x8xf32>
    %517 = tpu.matmul %516, %501, %cst_279 {dimension_numbers = #tpu.dot_dimension_numbers<[1], [0], [0], [1], [0, 0, 1, 1], [], []>} : vector<8x8xf32>, vector<8x8xf32>, vector<8x8xf32> -> vector<8x8xf32>
    %518 = tpu.concatenate %460, %479, %498, %517 in 1 : vector<8x8xf32>, vector<8x8xf32>, vector<8x8xf32>, vector<8x8xf32> -> vector<8x32xf32>
    %cst_280 = arith.constant dense<0.000000e+00> : vector<8x32xf32>
    %519 = tpu.matmul %518, %440, %cst_280 {dimension_numbers = #tpu.dot_dimension_numbers<[1], [0], [0], [1], [0, 0, 1, 1], [], []>} : vector<8x32xf32>, vector<32x32xf32>, vector<8x32xf32> -> vector<8x32xf32>
    %520 = vector.extract_strided_slice %35 {offsets = [1, 0], sizes = [1, 8], strides = [1, 1]} : vector<2x8xf32> to vector<1x8xf32>
    %521 = vector.extract_strided_slice %362 {offsets = [8, 0], sizes = [8, 8], strides = [1, 1]} : vector<16x8xf32> to vector<8x8xf32>
    %522 = vector.extract_strided_slice %390 {offsets = [8, 0], sizes = [8, 8], strides = [1, 1]} : vector<16x8xf32> to vector<8x8xf32>
    %523 = vector.extract_strided_slice %418 {offsets = [8, 0], sizes = [8, 8], strides = [1, 1]} : vector<16x8xf32> to vector<8x8xf32>
    %cst_281 = arith.constant dense<0.000000e+00> : vector<8x8xf32>
    %524 = tpu.matmul %521, %522, %cst_281 {dimension_numbers = #tpu.dot_dimension_numbers<[1], [1], [0], [0], [0, 0, 1, 0], [], []>} : vector<8x8xf32>, vector<8x8xf32>, vector<8x8xf32> -> vector<8x8xf32>
    %cst_282 = arith.constant 0.353553385 : f32
    %525 = vector.broadcast %cst_282 : f32 to vector<8x8xf32>
    %526 = arith.mulf %524, %525 : vector<8x8xf32>
    %527 = vector.broadcast %520 : vector<1x8xf32> to vector<8x8xf32>
    %528 = arith.addf %526, %527 : vector<8x8xf32>
    %cst_283 = arith.constant dense<0xFF800000> : vector<8xf32>
    %529 = vector.multi_reduction <maximumf>, %528, %cst_283 [1] : vector<8x8xf32> to vector<8xf32>
    %530 = vector.shape_cast %529 : vector<8xf32> to vector<8x1xf32>
    %531 = vector.broadcast %530 : vector<8x1xf32> to vector<8x8xf32>
    %532 = arith.subf %528, %531 : vector<8x8xf32>
    %533 = math.exp %532 : vector<8x8xf32>
    %cst_284 = arith.constant dense<0.000000e+00> : vector<8xf32>
    %534 = vector.multi_reduction <add>, %533, %cst_284 [1] : vector<8x8xf32> to vector<8xf32>
    %535 = vector.shape_cast %534 : vector<8xf32> to vector<8x1xf32>
    %536 = tpu.reciprocal %535 {approx = true} : vector<8x1xf32> -> vector<8x1xf32>
    %537 = vector.broadcast %536 : vector<8x1xf32> to vector<8x8xf32>
    %538 = arith.mulf %533, %537 : vector<8x8xf32>
    %cst_285 = arith.constant dense<0.000000e+00> : vector<8x8xf32>
    %539 = tpu.matmul %538, %523, %cst_285 {dimension_numbers = #tpu.dot_dimension_numbers<[1], [0], [0], [1], [0, 0, 1, 1], [], []>} : vector<8x8xf32>, vector<8x8xf32>, vector<8x8xf32> -> vector<8x8xf32>
    %540 = vector.extract_strided_slice %369 {offsets = [8, 0], sizes = [8, 8], strides = [1, 1]} : vector<16x8xf32> to vector<8x8xf32>
    %541 = vector.extract_strided_slice %397 {offsets = [8, 0], sizes = [8, 8], strides = [1, 1]} : vector<16x8xf32> to vector<8x8xf32>
    %542 = vector.extract_strided_slice %425 {offsets = [8, 0], sizes = [8, 8], strides = [1, 1]} : vector<16x8xf32> to vector<8x8xf32>
    %cst_286 = arith.constant dense<0.000000e+00> : vector<8x8xf32>
    %543 = tpu.matmul %540, %541, %cst_286 {dimension_numbers = #tpu.dot_dimension_numbers<[1], [1], [0], [0], [0, 0, 1, 0], [], []>} : vector<8x8xf32>, vector<8x8xf32>, vector<8x8xf32> -> vector<8x8xf32>
    %cst_287 = arith.constant 0.353553385 : f32
    %544 = vector.broadcast %cst_287 : f32 to vector<8x8xf32>
    %545 = arith.mulf %543, %544 : vector<8x8xf32>
    %546 = vector.broadcast %520 : vector<1x8xf32> to vector<8x8xf32>
    %547 = arith.addf %545, %546 : vector<8x8xf32>
    %cst_288 = arith.constant dense<0xFF800000> : vector<8xf32>
    %548 = vector.multi_reduction <maximumf>, %547, %cst_288 [1] : vector<8x8xf32> to vector<8xf32>
    %549 = vector.shape_cast %548 : vector<8xf32> to vector<8x1xf32>
    %550 = vector.broadcast %549 : vector<8x1xf32> to vector<8x8xf32>
    %551 = arith.subf %547, %550 : vector<8x8xf32>
    %552 = math.exp %551 : vector<8x8xf32>
    %cst_289 = arith.constant dense<0.000000e+00> : vector<8xf32>
    %553 = vector.multi_reduction <add>, %552, %cst_289 [1] : vector<8x8xf32> to vector<8xf32>
    %554 = vector.shape_cast %553 : vector<8xf32> to vector<8x1xf32>
    %555 = tpu.reciprocal %554 {approx = true} : vector<8x1xf32> -> vector<8x1xf32>
    %556 = vector.broadcast %555 : vector<8x1xf32> to vector<8x8xf32>
    %557 = arith.mulf %552, %556 : vector<8x8xf32>
    %cst_290 = arith.constant dense<0.000000e+00> : vector<8x8xf32>
    %558 = tpu.matmul %557, %542, %cst_290 {dimension_numbers = #tpu.dot_dimension_numbers<[1], [0], [0], [1], [0, 0, 1, 1], [], []>} : vector<8x8xf32>, vector<8x8xf32>, vector<8x8xf32> -> vector<8x8xf32>
    %559 = vector.extract_strided_slice %376 {offsets = [8, 0], sizes = [8, 8], strides = [1, 1]} : vector<16x8xf32> to vector<8x8xf32>
    %560 = vector.extract_strided_slice %404 {offsets = [8, 0], sizes = [8, 8], strides = [1, 1]} : vector<16x8xf32> to vector<8x8xf32>
    %561 = vector.extract_strided_slice %432 {offsets = [8, 0], sizes = [8, 8], strides = [1, 1]} : vector<16x8xf32> to vector<8x8xf32>
    %cst_291 = arith.constant dense<0.000000e+00> : vector<8x8xf32>
    %562 = tpu.matmul %559, %560, %cst_291 {dimension_numbers = #tpu.dot_dimension_numbers<[1], [1], [0], [0], [0, 0, 1, 0], [], []>} : vector<8x8xf32>, vector<8x8xf32>, vector<8x8xf32> -> vector<8x8xf32>
    %cst_292 = arith.constant 0.353553385 : f32
    %563 = vector.broadcast %cst_292 : f32 to vector<8x8xf32>
    %564 = arith.mulf %562, %563 : vector<8x8xf32>
    %565 = vector.broadcast %520 : vector<1x8xf32> to vector<8x8xf32>
    %566 = arith.addf %564, %565 : vector<8x8xf32>
    %cst_293 = arith.constant dense<0xFF800000> : vector<8xf32>
    %567 = vector.multi_reduction <maximumf>, %566, %cst_293 [1] : vector<8x8xf32> to vector<8xf32>
    %568 = vector.shape_cast %567 : vector<8xf32> to vector<8x1xf32>
    %569 = vector.broadcast %568 : vector<8x1xf32> to vector<8x8xf32>
    %570 = arith.subf %566, %569 : vector<8x8xf32>
    %571 = math.exp %570 : vector<8x8xf32>
    %cst_294 = arith.constant dense<0.000000e+00> : vector<8xf32>
    %572 = vector.multi_reduction <add>, %571, %cst_294 [1] : vector<8x8xf32> to vector<8xf32>
    %573 = vector.shape_cast %572 : vector<8xf32> to vector<8x1xf32>
    %574 = tpu.reciprocal %573 {approx = true} : vector<8x1xf32> -> vector<8x1xf32>
    %575 = vector.broadcast %574 : vector<8x1xf32> to vector<8x8xf32>
    %576 = arith.mulf %571, %575 : vector<8x8xf32>
    %cst_295 = arith.constant dense<0.000000e+00> : vector<8x8xf32>
    %577 = tpu.matmul %576, %561, %cst_295 {dimension_numbers = #tpu.dot_dimension_numbers<[1], [0], [0], [1], [0, 0, 1, 1], [], []>} : vector<8x8xf32>, vector<8x8xf32>, vector<8x8xf32> -> vector<8x8xf32>
    %578 = vector.extract_strided_slice %383 {offsets = [8, 0], sizes = [8, 8], strides = [1, 1]} : vector<16x8xf32> to vector<8x8xf32>
    %579 = vector.extract_strided_slice %411 {offsets = [8, 0], sizes = [8, 8], strides = [1, 1]} : vector<16x8xf32> to vector<8x8xf32>
    %580 = vector.extract_strided_slice %439 {offsets = [8, 0], sizes = [8, 8], strides = [1, 1]} : vector<16x8xf32> to vector<8x8xf32>
    %cst_296 = arith.constant dense<0.000000e+00> : vector<8x8xf32>
    %581 = tpu.matmul %578, %579, %cst_296 {dimension_numbers = #tpu.dot_dimension_numbers<[1], [1], [0], [0], [0, 0, 1, 0], [], []>} : vector<8x8xf32>, vector<8x8xf32>, vector<8x8xf32> -> vector<8x8xf32>
    %cst_297 = arith.constant 0.353553385 : f32
    %582 = vector.broadcast %cst_297 : f32 to vector<8x8xf32>
    %583 = arith.mulf %581, %582 : vector<8x8xf32>
    %584 = vector.broadcast %520 : vector<1x8xf32> to vector<8x8xf32>
    %585 = arith.addf %583, %584 : vector<8x8xf32>
    %cst_298 = arith.constant dense<0xFF800000> : vector<8xf32>
    %586 = vector.multi_reduction <maximumf>, %585, %cst_298 [1] : vector<8x8xf32> to vector<8xf32>
    %587 = vector.shape_cast %586 : vector<8xf32> to vector<8x1xf32>
    %588 = vector.broadcast %587 : vector<8x1xf32> to vector<8x8xf32>
    %589 = arith.subf %585, %588 : vector<8x8xf32>
    %590 = math.exp %589 : vector<8x8xf32>
    %cst_299 = arith.constant dense<0.000000e+00> : vector<8xf32>
    %591 = vector.multi_reduction <add>, %590, %cst_299 [1] : vector<8x8xf32> to vector<8xf32>
    %592 = vector.shape_cast %591 : vector<8xf32> to vector<8x1xf32>
    %593 = tpu.reciprocal %592 {approx = true} : vector<8x1xf32> -> vector<8x1xf32>
    %594 = vector.broadcast %593 : vector<8x1xf32> to vector<8x8xf32>
    %595 = arith.mulf %590, %594 : vector<8x8xf32>
    %cst_300 = arith.constant dense<0.000000e+00> : vector<8x8xf32>
    %596 = tpu.matmul %595, %580, %cst_300 {dimension_numbers = #tpu.dot_dimension_numbers<[1], [0], [0], [1], [0, 0, 1, 1], [], []>} : vector<8x8xf32>, vector<8x8xf32>, vector<8x8xf32> -> vector<8x8xf32>
    %597 = tpu.concatenate %539, %558, %577, %596 in 1 : vector<8x8xf32>, vector<8x8xf32>, vector<8x8xf32>, vector<8x8xf32> -> vector<8x32xf32>
    %cst_301 = arith.constant dense<0.000000e+00> : vector<8x32xf32>
    %598 = tpu.matmul %597, %440, %cst_301 {dimension_numbers = #tpu.dot_dimension_numbers<[1], [0], [0], [1], [0, 0, 1, 1], [], []>} : vector<8x32xf32>, vector<32x32xf32>, vector<8x32xf32> -> vector<8x32xf32>
    %599 = tpu.concatenate %519, %598 in 0 : vector<8x32xf32>, vector<8x32xf32> -> vector<16x32xf32>
    %c0_302 = arith.constant 0 : index
    %c0_303 = arith.constant 0 : index
    %600 = vector.load %arg29[%c0_302, %c0_303] : memref<1x32xf32, #tpu.memory_space<vmem>>, vector<1x32xf32>
    %601 = vector.broadcast %600 : vector<1x32xf32> to vector<16x32xf32>
    %602 = arith.addf %599, %601 : vector<16x32xf32>
    %603 = arith.addf %602, %355 : vector<16x32xf32>
    %c0_304 = arith.constant 0 : index
    %c0_305 = arith.constant 0 : index
    %604 = vector.load %arg30[%c0_304, %c0_305] : memref<1x32xf32, #tpu.memory_space<vmem>>, vector<1x32xf32>
    %c0_306 = arith.constant 0 : index
    %c0_307 = arith.constant 0 : index
    %605 = vector.load %arg31[%c0_306, %c0_307] : memref<1x32xf32, #tpu.memory_space<vmem>>, vector<1x32xf32>
    %cst_308 = arith.constant dense<0.000000e+00> : vector<16xf32>
    %606 = vector.multi_reduction <add>, %603, %cst_308 [1] : vector<16x32xf32> to vector<16xf32>
    %607 = vector.shape_cast %606 : vector<16xf32> to vector<16x1xf32>
    %cst_309 = arith.constant 3.200000e+01 : f32
    %608 = vector.broadcast %cst_309 : f32 to vector<16x1xf32>
    %609 = arith.divf %607, %608 : vector<16x1xf32>
    %610 = vector.broadcast %609 : vector<16x1xf32> to vector<16x32xf32>
    %611 = arith.subf %603, %610 : vector<16x32xf32>
    %612 = arith.mulf %611, %611 : vector<16x32xf32>
    %cst_310 = arith.constant dense<0.000000e+00> : vector<16xf32>
    %613 = vector.multi_reduction <add>, %612, %cst_310 [1] : vector<16x32xf32> to vector<16xf32>
    %614 = vector.shape_cast %613 : vector<16xf32> to vector<16x1xf32>
    %cst_311 = arith.constant 3.200000e+01 : f32
    %615 = vector.broadcast %cst_311 : f32 to vector<16x1xf32>
    %616 = arith.divf %614, %615 : vector<16x1xf32>
    %617 = vector.broadcast %609 : vector<16x1xf32> to vector<16x32xf32>
    %618 = arith.subf %603, %617 : vector<16x32xf32>
    %cst_312 = arith.constant 9.99999996E-13 : f32
    %619 = vector.broadcast %cst_312 : f32 to vector<16x1xf32>
    %620 = arith.addf %616, %619 : vector<16x1xf32>
    %621 = math.rsqrt %620 : vector<16x1xf32>
    %622 = vector.broadcast %621 : vector<16x1xf32> to vector<16x32xf32>
    %623 = arith.mulf %618, %622 : vector<16x32xf32>
    %624 = vector.broadcast %604 : vector<1x32xf32> to vector<16x32xf32>
    %625 = arith.mulf %623, %624 : vector<16x32xf32>
    %626 = vector.broadcast %605 : vector<1x32xf32> to vector<16x32xf32>
    %627 = arith.addf %625, %626 : vector<16x32xf32>
    %c0_313 = arith.constant 0 : index
    %c0_314 = arith.constant 0 : index
    %628 = vector.load %arg32[%c0_313, %c0_314] : memref<32x64xf32, #tpu.memory_space<vmem>>, vector<32x64xf32>
    %cst_315 = arith.constant dense<0.000000e+00> : vector<16x64xf32>
    %629 = tpu.matmul %627, %628, %cst_315 {dimension_numbers = #tpu.dot_dimension_numbers<[1], [0], [0], [1], [0, 0, 1, 1], [], []>} : vector<16x32xf32>, vector<32x64xf32>, vector<16x64xf32> -> vector<16x64xf32>
    %c0_316 = arith.constant 0 : index
    %c0_317 = arith.constant 0 : index
    %630 = vector.load %arg33[%c0_316, %c0_317] : memref<1x64xf32, #tpu.memory_space<vmem>>, vector<1x64xf32>
    %631 = vector.broadcast %630 : vector<1x64xf32> to vector<16x64xf32>
    %632 = arith.addf %629, %631 : vector<16x64xf32>
    %633 = arith.mulf %632, %632 : vector<16x64xf32>
    %634 = arith.mulf %632, %633 : vector<16x64xf32>
    %cst_318 = arith.constant 4.471500e-02 : f32
    %635 = vector.broadcast %cst_318 : f32 to vector<16x64xf32>
    %636 = arith.mulf %635, %634 : vector<16x64xf32>
    %637 = arith.addf %632, %636 : vector<16x64xf32>
    %cst_319 = arith.constant 0.797884583 : f32
    %638 = vector.broadcast %cst_319 : f32 to vector<16x64xf32>
    %639 = arith.mulf %638, %637 : vector<16x64xf32>
    %640 = math.tanh %639 : vector<16x64xf32>
    %cst_320 = arith.constant 1.000000e+00 : f32
    %641 = vector.broadcast %cst_320 : f32 to vector<16x64xf32>
    %642 = arith.addf %641, %640 : vector<16x64xf32>
    %cst_321 = arith.constant 5.000000e-01 : f32
    %643 = vector.broadcast %cst_321 : f32 to vector<16x64xf32>
    %644 = arith.mulf %643, %642 : vector<16x64xf32>
    %645 = arith.mulf %632, %644 : vector<16x64xf32>
    %c0_322 = arith.constant 0 : index
    %c0_323 = arith.constant 0 : index
    %646 = vector.load %arg34[%c0_322, %c0_323] : memref<64x32xf32, #tpu.memory_space<vmem>>, vector<64x32xf32>
    %cst_324 = arith.constant dense<0.000000e+00> : vector<16x32xf32>
    %647 = tpu.matmul %645, %646, %cst_324 {dimension_numbers = #tpu.dot_dimension_numbers<[1], [0], [0], [1], [0, 0, 1, 1], [], []>} : vector<16x64xf32>, vector<64x32xf32>, vector<16x32xf32> -> vector<16x32xf32>
    %c0_325 = arith.constant 0 : index
    %c0_326 = arith.constant 0 : index
    %648 = vector.load %arg35[%c0_325, %c0_326] : memref<1x32xf32, #tpu.memory_space<vmem>>, vector<1x32xf32>
    %649 = vector.broadcast %648 : vector<1x32xf32> to vector<16x32xf32>
    %650 = arith.addf %647, %649 : vector<16x32xf32>
    %651 = arith.addf %650, %627 : vector<16x32xf32>
    %c0_327 = arith.constant 0 : index
    %c0_328 = arith.constant 0 : index
    %652 = vector.load %arg36[%c0_327, %c0_328] : memref<1x32xf32, #tpu.memory_space<vmem>>, vector<1x32xf32>
    %c0_329 = arith.constant 0 : index
    %c0_330 = arith.constant 0 : index
    %653 = vector.load %arg37[%c0_329, %c0_330] : memref<1x32xf32, #tpu.memory_space<vmem>>, vector<1x32xf32>
    %cst_331 = arith.constant dense<0.000000e+00> : vector<16xf32>
    %654 = vector.multi_reduction <add>, %651, %cst_331 [1] : vector<16x32xf32> to vector<16xf32>
    %655 = vector.shape_cast %654 : vector<16xf32> to vector<16x1xf32>
    %cst_332 = arith.constant 3.200000e+01 : f32
    %656 = vector.broadcast %cst_332 : f32 to vector<16x1xf32>
    %657 = arith.divf %655, %656 : vector<16x1xf32>
    %658 = vector.broadcast %657 : vector<16x1xf32> to vector<16x32xf32>
    %659 = arith.subf %651, %658 : vector<16x32xf32>
    %660 = arith.mulf %659, %659 : vector<16x32xf32>
    %cst_333 = arith.constant dense<0.000000e+00> : vector<16xf32>
    %661 = vector.multi_reduction <add>, %660, %cst_333 [1] : vector<16x32xf32> to vector<16xf32>
    %662 = vector.shape_cast %661 : vector<16xf32> to vector<16x1xf32>
    %cst_334 = arith.constant 3.200000e+01 : f32
    %663 = vector.broadcast %cst_334 : f32 to vector<16x1xf32>
    %664 = arith.divf %662, %663 : vector<16x1xf32>
    %665 = vector.broadcast %657 : vector<16x1xf32> to vector<16x32xf32>
    %666 = arith.subf %651, %665 : vector<16x32xf32>
    %cst_335 = arith.constant 9.99999996E-13 : f32
    %667 = vector.broadcast %cst_335 : f32 to vector<16x1xf32>
    %668 = arith.addf %664, %667 : vector<16x1xf32>
    %669 = math.rsqrt %668 : vector<16x1xf32>
    %670 = vector.broadcast %669 : vector<16x1xf32> to vector<16x32xf32>
    %671 = arith.mulf %666, %670 : vector<16x32xf32>
    %672 = vector.broadcast %652 : vector<1x32xf32> to vector<16x32xf32>
    %673 = arith.mulf %671, %672 : vector<16x32xf32>
    %674 = vector.broadcast %653 : vector<1x32xf32> to vector<16x32xf32>
    %675 = arith.addf %673, %674 : vector<16x32xf32>
    %676 = vector.extract_strided_slice %675 {offsets = [0, 0], sizes = [1, 32], strides = [1, 1]} : vector<16x32xf32> to vector<1x32xf32>
    %677 = vector.extract_strided_slice %675 {offsets = [8, 0], sizes = [1, 32], strides = [1, 1]} : vector<16x32xf32> to vector<1x32xf32>
    %678 = tpu.concatenate %676, %677 in 0 : vector<1x32xf32>, vector<1x32xf32> -> vector<2x32xf32>
    %c0_336 = arith.constant 0 : index
    %c0_337 = arith.constant 0 : index
    %679 = vector.load %arg38[%c0_336, %c0_337] : memref<32x128xf32, #tpu.memory_space<vmem>>, vector<32x128xf32>
    %cst_338 = arith.constant dense<0.000000e+00> : vector<2x128xf32>
    %680 = tpu.matmul %678, %679, %cst_338 {dimension_numbers = #tpu.dot_dimension_numbers<[1], [0], [0], [1], [0, 0, 1, 1], [], []>} : vector<2x32xf32>, vector<32x128xf32>, vector<2x128xf32> -> vector<2x128xf32>
    %c0_339 = arith.constant 0 : index
    %c0_340 = arith.constant 0 : index
    %681 = vector.load %arg39[%c0_339, %c0_340] : memref<1x128xf32, #tpu.memory_space<vmem>>, vector<1x128xf32>
    %682 = vector.broadcast %681 : vector<1x128xf32> to vector<2x128xf32>
    %683 = arith.addf %680, %682 : vector<2x128xf32>
    %c0_341 = arith.constant 0 : index
    %c0_342 = arith.constant 0 : index
    %684 = vector.load %arg40[%c0_341, %c0_342] : memref<2x128xf32, #tpu.memory_space<vmem>>, vector<2x128xf32>
    tpu.vector_store %arg40[%c0_341, %c0_342], %683 {strides = array<i32>} : memref<2x128xf32, #tpu.memory_space<vmem>>, vector<2x128xf32>,
    return
  }
}

</mosaic_0001>

<bundles_post_ra>
// kernel: bert_classifier_forward.1
= control target key start
LH: loop header
LB: loop body
LE: loop exit
PB: predicated region body
PF: predicated region fallthrough
CT: control target
= control target key end

     0   :  { %s7267_s6 = smov 1   ;;  %s7268_s10 = smov 2   ;;  %s8223_s0 = inlined_call_operand.smem [shape: u32[41], index: -1, kind: input, shape index: {}] }
   0x1   :  { %s7321_s5 = sld [smem:[%s8223_s0]]   ;;  %s7269_s14 = smov 3  }
   0x2   :  { %s7326_s9 = sld [smem:[%s8223_s0 + %s7267_s6]]   ;;  %s7270_s18 = smov 4  }
   0x3   :  { %s7331_s13 = sld [smem:[%s8223_s0 + %s7268_s10]]   ;;  %s7271_s22 = smov 5  }
   0x4   :  { %s7336_s17 = sld [smem:[%s8223_s0 + %s7269_s14]]   ;;  %s7272_s26 = smov 6  }
   0x5   :  { %s7341_s21 = sld [smem:[%s8223_s0 + %s7270_s18]]   ;;  %s7273_s30 = smov 7  }
   0x6   :  { %s7346_s25 = sld [smem:[%s8223_s0 + %s7271_s22]]   ;;  %s7274_s4 = smov 8  }
   0x7   :  { %s7351_s29 = sld [smem:[%s8223_s0 + %s7272_s26]]   ;;  %s7275_s10 = smov 9  }
   0x8   :  { %s7356_s3 = sld [smem:[%s8223_s0 + %s7273_s30]]   ;;  %s7276_s15 = smov 10  }
   0x9   :  { %s7361_s8 = sld [smem:[%s8223_s0 + %s7274_s4]]   ;;  %s7277_s20 = smov 11  }
   0xa   :  { %s7366_s14 = sld [smem:[%s8223_s0 + %s7275_s10]]   ;;  %s7278_s26 = smov 12  }
   0xb   :  { %s7371_s19 = sld [smem:[%s8223_s0 + %s7276_s15]]   ;;  %s7279_s1 = smov 13  }
   0xc   :  { %s7376_s24 = sld [smem:[%s8223_s0 + %s7277_s20]]   ;;  %s7280_s7 = smov 14  }
   0xd   :  { %s7381_s30 = sld [smem:[%s8223_s0 + %s7278_s26]]   ;;  %s7281_s15 = smov 15  }
   0xe   :  { %s7386_s6 = sld [smem:[%s8223_s0 + %s7279_s1]]   ;;  %s7282_s22 = smov 16  }
   0xf   :  { %s7391_s12 = sld [smem:[%s8223_s0 + %s7280_s7]]   ;;  %s7283_s28 = smov 17  }
  0x10   :  { %s7396_s20 = sld [smem:[%s8223_s0 + %s7281_s15]]   ;;  %s7284_s7 = smov 18  }
  0x11   :  { %s7401_s27 = sld [smem:[%s8223_s0 + %s7282_s22]]   ;;  %s7285_s15 = smov 19  }
  0x12   :  { %s7406_s4 = sld [smem:[%s8223_s0 + %s7283_s28]]   ;;  %s7286_s22 = smov 20  }
  0x13   :  { %s7287_s28 = smov 21  }
  0x15   :  { %8235 = sst [smem:[#allocation5_spill]] %s7391_s12 }
  0x16   :  { %8236 = sst [smem:[#allocation6_spill]] %s7396_s20 }
  0x17   :  { %8237 = sst [smem:[#allocation7_spill]] %s7401_s27 }
  0x18   :  { %8238 = sst [smem:[#allocation8_spill]] %s7406_s4 }
  0x19   :  { %s7411_s12 = sld [smem:[%s8223_s0 + %s7284_s7]]   ;;  %s7288_s7 = smov 22  }
  0x1a   :  { %s7416_s20 = sld [smem:[%s8223_s0 + %s7285_s15]]   ;;  %s7289_s15 = smov 23  }
  0x1b   :  { %s7421_s27 = sld [smem:[%s8223_s0 + %s7286_s22]]   ;;  %s7290_s22 = smov 24  }
  0x1c   :  { %s7426_s4 = sld [smem:[%s8223_s0 + %s7287_s28]]   ;;  %s7291_s28 = smov 25  }
  0x1f   :  { %8239 = sst [smem:[#allocation9_spill]] %s7411_s12 }
  0x20   :  { %8240 = sst [smem:[#allocation10_spill]] %s7416_s20 }
  0x21   :  { %8241 = sst [smem:[#allocation11_spill]] %s7421_s27 }
  0x22   :  { %8242 = sst [smem:[#allocation12_spill]] %s7426_s4 }
  0x23   :  { %s7431_s12 = sld [smem:[%s8223_s0 + %s7288_s7]]   ;;  %s7292_s7 = smov 26  }
  0x24   :  { %s7436_s20 = sld [smem:[%s8223_s0 + %s7289_s15]]   ;;  %s7293_s15 = smov 27  }
  0x25   :  { %s7441_s27 = sld [smem:[%s8223_s0 + %s7290_s22]]   ;;  %s7294_s22 = smov 28  }
  0x26   :  { %s7446_s4 = sld [smem:[%s8223_s0 + %s7291_s28]]   ;;  %s7295_s28 = smov 29  }
  0x29   :  { %8243 = sst [smem:[#allocation13_spill]] %s7431_s12 }
  0x2a   :  { %8244 = sst [smem:[#allocation14_spill]] %s7436_s20 }
  0x2b   :  { %8245 = sst [smem:[#allocation15_spill]] %s7441_s27 }
  0x2c   :  { %8246 = sst [smem:[#allocation16_spill]] %s7446_s4 }
  0x2d   :  { %s7451_s12 = sld [smem:[%s8223_s0 + %s7292_s7]]   ;;  %s7296_s7 = smov 30  }
  0x2e   :  { %s7456_s20 = sld [smem:[%s8223_s0 + %s7293_s15]]   ;;  %s7297_s15 = smov 31  }
  0x2f   :  { %s7461_s27 = sld [smem:[%s8223_s0 + %s7294_s22]]   ;;  %s7298_s22 = smov 32  }
  0x30   :  { %s7466_s4 = sld [smem:[%s8223_s0 + %s7295_s28]]   ;;  %s7299_s28 = smov 33  }
  0x33   :  { %8247 = sst [smem:[#allocation17_spill]] %s7451_s12 }
  0x34   :  { %8248 = sst [smem:[#allocation18_spill]] %s7456_s20 }
  0x35   :  { %8249 = sst [smem:[#allocation19_spill]] %s7461_s27 }
  0x36   :  { %8250 = sst [smem:[#allocation20_spill]] %s7466_s4 }
  0x37   :  { %s7471_s12 = sld [smem:[%s8223_s0 + %s7296_s7]]   ;;  %s7300_s7 = smov 34  }
  0x38   :  { %s7476_s20 = sld [smem:[%s8223_s0 + %s7297_s15]]   ;;  %s7301_s15 = smov 35  }
  0x39   :  { %s7481_s27 = sld [smem:[%s8223_s0 + %s7298_s22]]   ;;  %s7302_s22 = smov 36  }
  0x3a   :  { %s7486_s4 = sld [smem:[%s8223_s0 + %s7299_s28]]   ;;  %s7303_s28 = smov 37  }
  0x3d   :  { %8251 = sst [smem:[#allocation21_spill]] %s7471_s12 }
  0x3e   :  { %8252 = sst [smem:[#allocation22_spill]] %s7476_s20 }
  0x3f   :  { %8253 = sst [smem:[#allocation23_spill]] %s7481_s27 }
  0x40   :  { %8254 = sst [smem:[#allocation24_spill]] %s7486_s4 }
  0x41   :  { %s7491_s12 = sld [smem:[%s8223_s0 + %s7300_s7]]   ;;  %s7304_s7 = smov 38  }
  0x42   :  { %s7496_s20 = sld [smem:[%s8223_s0 + %s7301_s15]]   ;;  %s7305_s15 = smov 39  }
  0x43   :  { %s7501_s27 = sld [smem:[%s8223_s0 + %s7302_s22]]   ;;  %s7306_s22 = smov 40  }
  0x44   :  { %s7506_s4 = sld [smem:[%s8223_s0 + %s7303_s28]]  }
  0x47   :  { %8255 = sst [smem:[#allocation25_spill]] %s7491_s12 }
  0x48   :  { %8256 = sst [smem:[#allocation26_spill]] %s7496_s20 }
  0x49   :  { %8257 = sst [smem:[#allocation27_spill]] %s7501_s27 }
  0x4a   :  { %s7511_s12 = sld [smem:[%s8223_s0 + %s7304_s7]]  }
  0x4b   :  { %s7516_s20 = sld [smem:[%s8223_s0 + %s7305_s15]]  }
  0x4c   :  { %s7521_s27 = sld [smem:[%s8223_s0 + %s7306_s22]]  }
  0x4d   :  { %v167_v0 = vld [vmem:[%s7321_s5] sm:$0xff]  ;;  %v168_v4 = vld [vmem:[%s7321_s5 + $0x8] sm:$0xff] }
  0x4e   :  { %v169_v1 = vld [vmem:[%s7326_s9] sm:$0xff] }
  0x4f   :  { %v6062_v2 = vld [vmem:[%s7331_s13] ss:$0 sm:$0xff]  ;;  %v171_v3 = vadd.f32 %v169_v1, %v167_v0 }
  0x50   :  { %86 = vsyncpa [#allocation3], 0  ;;  %vm183_vm0 = vcmask 261120   ;;  %v172_v5 = vadd.f32 %v169_v1, %v168_v4  ;;  %v231_v20 = vld [vmem:[%s7351_s29 + $0x18] sm:$0xff]  ;;  %v230_v22 = vld [vmem:[%s7351_s29 + $0x10] sm:$0xff]  ;;  %vm7308_vm1 = vmmov 0  }
  0x51   :  { %v179_v6 = vadd.f32 %v6062_v2, %v171_v3  ;;  %v6071_v21 = vld [vmem:[%s7351_s29 + $0x38] sm:$0xff]  ;;  %6568 = vmatprep.subr.mxu0 %v231_v20  ;;  %v6070_v23 = vld [vmem:[%s7351_s29 + $0x30] sm:$0xff]  ;;  %v229_v24 = vld [vmem:[%s7351_s29 + $0x8] sm:$0xff]  ;;  %vm1288_vm2 = vcmask 64512   ;;  %s7309_s0 = smov 8   ;;  %s7310_s5 = smov 16  }
  0x52   :  { %v180_v7 = vadd.f32 %v6062_v2, %v172_v5  ;;  %6579 = vmatprep.subr.mxu1 %v6071_v21  ;;  %6569 = vmatpush3.msra.mxu0 %v231_v20  ;;  %v6069_v25 = vld [vmem:[%s7351_s29 + $0x28] sm:$0xff]  ;;  %v228_v26 = vld [vmem:[%s7351_s29] sm:$0xff]  ;;  %v6079_v28 = vld [vmem:[%s7351_s29 + $0x58] sm:$0xff]  ;;  %v7307_v20 = vmov 0.0   ;;  %s7311_s9 = smov 24   ;;  %vm1954_vm3 = vcmask 130048  }
  0x53   :  { %v184_v8 = vsel %vm183_vm0, %v179_v6, 0.0  ;;  %6580 = vmatpush3.msra.mxu1 %v6071_v21  ;;  %6570 = vmatprep.subr.mxu0 %v230_v22  ;;  %v6068_v27 = vld [vmem:[%s7351_s29 + $0x20] sm:$0xff]  ;;  %v6087_v29 = vld [vmem:[%s7351_s29 + $0x78] sm:$0xff]  ;;  %v6078_v46 = vld [vmem:[%s7351_s29 + $0x50] sm:$0xff]  ;;  %vm1956_vm4 = vcmask 195584   ;;  %s8258_s13 = sld [smem:[#allocation5_spill]] }
  0x54   :  { %185 = vadd.xlane.f32.xlu0 %v184_v8  ;;  %v187_v9 = vsel %vm183_vm0, %v180_v7, 0.0  ;;  %6581 = vmatprep.subr.mxu1 %v6070_v23  ;;  %v6063_v37 = vld [vmem:[%s7336_s17] ss:$0 sm:$0xff]  ;;  %v6086_v47 = vld [vmem:[%s7351_s29 + $0x70] sm:$0xff]  ;;  %v6077_v48 = vld [vmem:[%s7351_s29 + $0x48] sm:$0xff]  ;;  %s8259_s17 = sld [smem:[#allocation6_spill]] }
  0x55   :  { %6571 = vmatpush3.msra.mxu0 %v230_v22  ;;  %6582 = vmatpush3.msra.mxu1 %v6070_v23  ;;  %v6064_v39 = vld [vmem:[%s7341_s21] ss:$0 sm:$0xff]  ;;  %v6085_v49 = vld [vmem:[%s7351_s29 + $0x68] sm:$0xff]  ;;  %v587_v52 = vld [vmem:[%s7356_s3 + $0x18] sm:$0xff]  ;;  %s8260_s21 = sld [smem:[#allocation7_spill]]  ;;  %vm2951_vm5 = vcmask 523264  }
  0x56   :  { %6572 = vmatprep.subr.mxu0 %v229_v24  ;;  %6583 = vmatprep.subr.mxu1 %v6069_v25  ;;  %v6076_v50 = vld [vmem:[%s7351_s29 + $0x40] sm:$0xff]  ;;  %v6098_v53 = vld [vmem:[%s7356_s3 + $0x38] sm:$0xff]  ;;  %v586_v54 = vld [vmem:[%s7356_s3 + $0x10] sm:$0xff]  ;;  %s8270_s28 = sld [smem:[#allocation17_spill]]  ;;  %vm5921_vm6 = vcmask 1040384  }
  0x57   :  { %6573 = vmatpush3.msra.mxu0 %v229_v24  ;;  %6584 = vmatpush3.msra.mxu1 %v6069_v25  ;;  %v6084_v51 = vld [vmem:[%s7351_s29 + $0x60] sm:$0xff]  ;;  %v6097_v55 = vld [vmem:[%s7356_s3 + $0x30] sm:$0xff]  ;;  %v585_v56 = vld [vmem:[%s7356_s3 + $0x8] sm:$0xff]  ;;  %s8262_s29 = sld [smem:[#allocation8_spill]] }
  0x58   :  { %188 = vadd.xlane.f32.xlu0 %v187_v9  ;;  %6574 = vmatprep.subr.mxu0 %v228_v26  ;;  %v6096_v57 = vld [vmem:[%s7356_s3 + $0x28] sm:$0xff]  ;;  %v584_v58 = vld [vmem:[%s7356_s3] sm:$0xff]  ;;  %v6106_v60 = vld [vmem:[%s7356_s3 + $0x58] sm:$0xff]  ;;  %s8271_s1 = sld [smem:[#allocation18_spill]] }
  0x59   :  { %6585 = vmatprep.subr.mxu1 %v6068_v27  ;;  %6575 = vmatpush3.msra.mxu0 %v228_v26  ;;  %v6095_v59 = vld [vmem:[%s7356_s3 + $0x20] sm:$0xff]  ;;  %v6114_v61 = vld [vmem:[%s7356_s3 + $0x78] sm:$0xff]  ;;  %v6105_v62 = vld [vmem:[%s7356_s3 + $0x50] sm:$0xff]  ;;  %s8272_s2 = sld [smem:[#allocation19_spill]] }
  0x5a   :  { %6586 = vmatpush3.msra.mxu1 %v6068_v27  ;;  %6590 = vmatprep.subr.mxu0 %v6079_v28  ;;  %v6113_v63 = vld [vmem:[%s7356_s3 + $0x70] sm:$0xff]  ;;  %v6104_v0 = vld [vmem:[%s7356_s3 + $0x48] sm:$0xff]  ;;  %v6103_v2 = vld [vmem:[%s7356_s3 + $0x40] sm:$0xff]  ;;  %s8273_s7 = sld [smem:[#allocation20_spill]] }
  0x5b   :  { %6601 = vmatprep.subr.mxu1 %v6087_v29  ;;  %v6112_v1 = vld [vmem:[%s7356_s3 + $0x68] sm:$0xff]  ;;  %v6111_v3 = vld [vmem:[%s7356_s3 + $0x60] sm:$0xff]  ;;  %v937_v4 = vld [vmem:[%s7361_s8 + $0x18] sm:$0xff]  ;;  %s8263_s3 = sld [smem:[#allocation10_spill]] }
  0x5c   :  { %v6125_v5 = vld [vmem:[%s7361_s8 + $0x38] sm:$0xff]  ;;  %v935_v8 = vld [vmem:[%s7361_s8 + $0x8] sm:$0xff]  ;;  %v6065_v21 = vld [vmem:[%s7366_s14] ss:$0 sm:$0xff]  ;;  %s8274_s10 = sld [smem:[#allocation21_spill]] }
  0x5d   :  { %v6123_v9 = vld [vmem:[%s7361_s8 + $0x28] sm:$0xff]  ;;  %v6073_v22 = vld [vmem:[%s7366_s14 + $0x1] ss:$0 sm:$0xff]  ;;  %s8275_s11 = sld [smem:[#allocation22_spill]] }
  0x5e   :  { %s8276_s15 = sld [smem:[#allocation23_spill]] }
  0x5f   :  { %s8277_s16 = sld [smem:[#allocation25_spill]] }
  0x60   :  { %s8278_s18 = sld [smem:[#allocation24_spill]] }
  0x61   :  { %s8279_s22 = sld [smem:[#allocation26_spill]] }
  0x62   :  { %s8280_s23 = sld [smem:[#allocation27_spill]] }
  0xdd   :  { %v186_v10 = vpop.xlane.xlu0 %185 }
  0xde   :  { %v191_v11 = vmul.f32 0.03125, %v186_v10  ;;  %v934_v10 = vld [vmem:[%s7361_s8] sm:$0xff] }
  0xe0   :  { %v193_v12 = vsub.f32 %v179_v6, %v191_v11  ;;  %v936_v6 = vld [vmem:[%s7361_s8 + $0x10] sm:$0xff]  ;;  %v6122_v11 = vld [vmem:[%s7361_s8 + $0x20] sm:$0xff] }
  0xe1   :  { %v189_v13 = vpop.xlane.xlu0 %188 }
  0xe2   :  { %v192_v14 = vmul.f32 0.03125, %v189_v13  ;;  %v195_v15 = vmul.f32 %v193_v12, %v193_v12  ;;  %v6141_v13 = vld [vmem:[%s7361_s8 + $0x78] sm:$0xff] }
  0xe4   :  { %v194_v16 = vsub.f32 %v180_v7, %v192_v14  ;;  %v197_v17 = vsel %vm183_vm0, %v195_v15, 0.0  ;;  %v6124_v7 = vld [vmem:[%s7361_s8 + $0x30] sm:$0xff] }
  0xe5   :  { %198 = vadd.xlane.f32.xlu1 %v197_v17  ;;  %v6132_v14 = vld [vmem:[%s7361_s8 + $0x50] sm:$0xff]  ;;  %v6139_v17 = vld [vmem:[%s7361_s8 + $0x68] sm:$0xff] }
  0xe6   :  { %v196_v18 = vmul.f32 %v194_v16, %v194_v16  ;;  %v6140_v15 = vld [vmem:[%s7361_s8 + $0x70] sm:$0xff] }
  0xe8   :  { %v200_v19 = vsel %vm183_vm0, %v196_v18, 0.0  ;;  %v6130_v18 = vld [vmem:[%s7361_s8 + $0x40] sm:$0xff] }
  0xe9   :  { %201 = vadd.xlane.f32.xlu1 %v200_v19  ;;  %v6138_v19 = vld [vmem:[%s7361_s8 + $0x60] sm:$0xff] }
 0x16e   :  { %v199_v30 = vpop.xlane.xlu1 %198 }
 0x16f   :  { %v203_v31 = vmul.f32 0.03125, %v199_v30  ;;  %v6089_v30 = vld [vmem:[%s7366_s14 + $0x3] ss:$0 sm:$0xff] }
 0x171   :  { %v205_v32 = vadd.f32 1e-12, %v203_v31 }
 0x172   :  { %v202_v33 = vpop.xlane.xlu1 %201 }
 0x173   :  { %7153 = vrsqrt.f32 %v205_v32  ;;  %v204_v34 = vmul.f32 0.03125, %v202_v33 }
 0x175   :  { %v206_v35 = vadd.f32 1e-12, %v204_v34 }
 0x177   :  { %7155 = vrsqrt.f32 %v206_v35 }
 0x180   :  { %v7154_v36 = vpop.eup %7153 }
 0x181   :  { %v209_v38 = vmul.f32 %v7154_v36, %v193_v12  ;;  %v6133_v12 = vld [vmem:[%s7361_s8 + $0x58] sm:$0xff] }
 0x183   :  { %v217_v40 = vmul.f32 %v6063_v37, %v209_v38  ;;  %v6100_v38 = vld [vmem:[%s7371_s19 + $0x1] ss:$0 sm:$0xff] }
 0x184   :  { %v7156_v41 = vpop.eup %7155 }
 0x185   :  { %v7543_v42 = vadd.f32 %v6064_v39, %v217_v40  ;;  %v210_v43 = vmul.f32 %v7156_v41, %v194_v16  ;;  %v6131_v16 = vld [vmem:[%s7361_s8 + $0x48] sm:$0xff]  ;;  %s8264_s8 = sld [smem:[#allocation13_spill]] }
 0x187   :  { %v218_v44 = vmul.f32 %v6063_v37, %v210_v43  ;;  %6576 = vmatprep.mubr.msk.f32.mxu0 %vm183_vm0, %v7543_v42  ;;  %6587 = vmatprep.mubr.msk.f32.mxu1 %vm183_vm0, %v7543_v42  ;;  %v6092_v37 = vld [vmem:[%s7371_s19] ss:$0 sm:$0xff] }
 0x189   :  { %v7549_v45 = vadd.f32 %v6064_v39, %v218_v44 }
 0x18b   :  { %6577 = vmatmul.mubr.msk.f32.vlgmr.msra.gmra.mxu0 %vm183_vm0, %v7549_v45  ;;  %6588 = vmatmul.mubr.msk.f32.vlgmr.msra.gmra.mxu1 %vm183_vm0, %v7549_v45 }
 0x18c   :  { %6591 = vmatpush3.msra.mxu0 %v6079_v28  ;;  %6602 = vmatpush3.msra.mxu1 %v6087_v29  ;;  %v6081_v29 = vld [vmem:[%s7366_s14 + $0x2] ss:$0 sm:$0xff]  ;;  %s8265_s14 = sld [smem:[#allocation14_spill]] }
 0x18d   :  { %6592 = vmatprep.subr.mxu0 %v6078_v46  ;;  %6598 = vmatprep.mubr.msk.f32.mxu0 %vm183_vm0, %v7543_v42 }
 0x18e   :  { %6603 = vmatprep.subr.mxu1 %v6086_v47  ;;  %6609 = vmatprep.mubr.msk.f32.mxu1 %vm183_vm0, %v7543_v42 }
 0x18f   :  { %6593 = vmatpush3.msra.mxu0 %v6078_v46  ;;  %6604 = vmatpush3.msra.mxu1 %v6086_v47 }
 0x190   :  { %6594 = vmatprep.subr.mxu0 %v6077_v48  ;;  %6605 = vmatprep.subr.mxu1 %v6085_v49 }
 0x191   :  { %6595 = vmatpush3.msra.mxu0 %v6077_v48  ;;  %6606 = vmatpush3.msra.mxu1 %v6085_v49 }
 0x192   :  { %6596 = vmatprep.subr.mxu0 %v6076_v50  ;;  %6607 = vmatprep.subr.mxu1 %v6084_v51 }
 0x193   :  { %6597 = vmatpush3.msra.mxu0 %v6076_v50  ;;  %6608 = vmatpush3.msra.mxu1 %v6084_v51  ;;  %v6108_v51 = vld [vmem:[%s7371_s19 + $0x2] ss:$0 sm:$0xff] }
 0x194   :  { %6599 = vmatmul.mubr.msk.f32.vlgmr.msra.gmra.mxu0 %vm183_vm0, %v7549_v45  ;;  %6610 = vmatmul.mubr.msk.f32.vlgmr.msra.gmra.mxu1 %vm183_vm0, %v7549_v45 }
 0x195   :  { %6612 = vmatprep.subr.mxu0 %v587_v52  ;;  %6623 = vmatprep.subr.mxu1 %v6098_v53 }
 0x196   :  { %6613 = vmatpush3.msra.mxu0 %v587_v52  ;;  %6620 = vmatprep.mubr.msk.f32.mxu0 %vm183_vm0, %v7543_v42  ;;  %v6116_v52 = vld [vmem:[%s7371_s19 + $0x3] ss:$0 sm:$0xff]  ;;  %s8266_s19 = sld [smem:[#allocation11_spill]] }
 0x197   :  { %6624 = vmatpush3.msra.mxu1 %v6098_v53  ;;  %6631 = vmatprep.mubr.msk.f32.mxu1 %vm183_vm0, %v7543_v42 }
 0x198   :  { %6614 = vmatprep.subr.mxu0 %v586_v54  ;;  %6625 = vmatprep.subr.mxu1 %v6097_v55 }
 0x199   :  { %6615 = vmatpush3.msra.mxu0 %v586_v54  ;;  %6626 = vmatpush3.msra.mxu1 %v6097_v55 }
 0x19a   :  { %6616 = vmatprep.subr.mxu0 %v585_v56  ;;  %6627 = vmatprep.subr.mxu1 %v6096_v57 }
 0x19b   :  { %6617 = vmatpush3.msra.mxu0 %v585_v56  ;;  %6628 = vmatpush3.msra.mxu1 %v6096_v57 }
 0x19c   :  { %6618 = vmatprep.subr.mxu0 %v584_v58  ;;  %6629 = vmatprep.subr.mxu1 %v6095_v59 }
 0x19d   :  { %6619 = vmatpush3.msra.mxu0 %v584_v58  ;;  %6630 = vmatpush3.msra.mxu1 %v6095_v59 }
 0x19e   :  { %6621 = vmatmul.mubr.msk.f32.vlgmr.msra.gmra.mxu0 %vm183_vm0, %v7549_v45  ;;  %6632 = vmatmul.mubr.msk.f32.vlgmr.msra.gmra.mxu1 %vm183_vm0, %v7549_v45 }
 0x19f   :  { %6634 = vmatprep.subr.mxu0 %v6106_v60  ;;  %6645 = vmatprep.subr.mxu1 %v6114_v61 }
 0x1a0   :  { %6635 = vmatpush3.msra.mxu0 %v6106_v60  ;;  %6642 = vmatprep.mubr.msk.f32.mxu0 %vm183_vm0, %v7543_v42 }
 0x1a1   :  { %6646 = vmatpush3.msra.mxu1 %v6114_v61  ;;  %6653 = vmatprep.mubr.msk.f32.mxu1 %vm183_vm0, %v7543_v42 }
 0x1a2   :  { %6636 = vmatprep.subr.mxu0 %v6105_v62  ;;  %6647 = vmatprep.subr.mxu1 %v6113_v63 }
 0x1a3   :  { %6637 = vmatpush3.msra.mxu0 %v6105_v62  ;;  %6648 = vmatpush3.msra.mxu1 %v6113_v63  ;;  %v6119_v62 = vld [vmem:[%s7376_s24] ss:$0 sm:$0xff]  ;;  %v7677_v63 = vld [vmem:[%s7376_s24 + $0x1] ss:$0 sm:$0xff] }
 0x1a4   :  { %6638 = vmatprep.subr.mxu0 %v6104_v0  ;;  %6649 = vmatprep.subr.mxu1 %v6112_v1 }
 0x1a5   :  { %6639 = vmatpush3.msra.mxu0 %v6104_v0  ;;  %6650 = vmatpush3.msra.mxu1 %v6112_v1 }
 0x1a6   :  { %6640 = vmatprep.subr.mxu0 %v6103_v2  ;;  %6651 = vmatprep.subr.mxu1 %v6111_v3 }
 0x1a7   :  { %6641 = vmatpush3.msra.mxu0 %v6103_v2  ;;  %6652 = vmatpush3.msra.mxu1 %v6111_v3 }
 0x1a8   :  { %6643 = vmatmul.mubr.msk.f32.vlgmr.msra.gmra.mxu0 %vm183_vm0, %v7549_v45  ;;  %6654 = vmatmul.mubr.msk.f32.vlgmr.msra.gmra.mxu1 %vm183_vm0, %v7549_v45 }
 0x1a9   :  { %6656 = vmatprep.subr.mxu0 %v937_v4  ;;  %6667 = vmatprep.subr.mxu1 %v6125_v5 }
 0x1aa   :  { %6657 = vmatpush3.msra.mxu0 %v937_v4  ;;  %6664 = vmatprep.mubr.msk.f32.mxu0 %vm183_vm0, %v7543_v42 }
 0x1ab   :  { %6668 = vmatpush3.msra.mxu1 %v6125_v5  ;;  %6675 = vmatprep.mubr.msk.f32.mxu1 %vm183_vm0, %v7543_v42 }
 0x1ac   :  { %6658 = vmatprep.subr.mxu0 %v936_v6  ;;  %6669 = vmatprep.subr.mxu1 %v6124_v7 }
 0x1ad   :  { %6659 = vmatpush3.msra.mxu0 %v936_v6  ;;  %6670 = vmatpush3.msra.mxu1 %v6124_v7 }
 0x1ae   :  { %6660 = vmatprep.subr.mxu0 %v935_v8  ;;  %6671 = vmatprep.subr.mxu1 %v6123_v9 }
 0x1af   :  { %6661 = vmatpush3.msra.mxu0 %v935_v8  ;;  %6672 = vmatpush3.msra.mxu1 %v6123_v9  ;;  %v7696_v8 = vld [vmem:[%s7376_s24 + $0x2] ss:$0 sm:$0xff]  ;;  %v7699_v9 = vld [vmem:[%s7376_s24 + $0x3] ss:$0 sm:$0xff]  ;;  %s8267_s24 = sld [smem:[#allocation12_spill]] }
 0x1b0   :  { %6662 = vmatprep.subr.mxu0 %v934_v10  ;;  %6673 = vmatprep.subr.mxu1 %v6122_v11 }
 0x1b1   :  { %6663 = vmatpush3.msra.mxu0 %v934_v10  ;;  %6674 = vmatpush3.msra.mxu1 %v6122_v11 }
 0x1b2   :  { %6665 = vmatmul.mubr.msk.f32.vlgmr.msra.gmra.mxu0 %vm183_vm0, %v7549_v45  ;;  %6676 = vmatmul.mubr.msk.f32.vlgmr.msra.gmra.mxu1 %vm183_vm0, %v7549_v45 }
 0x1b3   :  { %6678 = vmatprep.subr.mxu0 %v6133_v12  ;;  %6689 = vmatprep.subr.mxu1 %v6141_v13 }
 0x1b4   :  { %6679 = vmatpush3.msra.mxu0 %v6133_v12  ;;  %6686 = vmatprep.mubr.msk.f32.mxu0 %vm183_vm0, %v7543_v42 }
 0x1b5   :  { %6690 = vmatpush3.msra.mxu1 %v6141_v13  ;;  %6697 = vmatprep.mubr.msk.f32.mxu1 %vm183_vm0, %v7543_v42 }
 0x1b6   :  { %6680 = vmatprep.subr.mxu0 %v6132_v14  ;;  %6691 = vmatprep.subr.mxu1 %v6140_v15 }
 0x1b7   :  { %6681 = vmatpush3.msra.mxu0 %v6132_v14  ;;  %6692 = vmatpush3.msra.mxu1 %v6140_v15  ;;  %v1366_v14 = vlaneseq }
 0x1b8   :  { %6682 = vmatprep.subr.mxu0 %v6131_v16  ;;  %6693 = vmatprep.subr.mxu1 %v6139_v17 }
 0x1b9   :  { %6683 = vmatpush3.msra.mxu0 %v6131_v16  ;;  %6694 = vmatpush3.msra.mxu1 %v6139_v17  ;;  %v7707_v15 = vshrl.u32 %v1366_v14, 7  ;;  %v7711_v17 = vld [vmem:[%s7346_s25] sm:$0x3]  ;;  %s8261_s25 = sld [smem:[#allocation9_spill]] }
 0x1ba   :  { %6684 = vmatprep.subr.mxu0 %v6130_v18  ;;  %6695 = vmatprep.subr.mxu1 %v6138_v19 }
 0x1bb   :  { %6685 = vmatpush3.msra.mxu0 %v6130_v18  ;;  %6696 = vmatpush3.msra.mxu1 %v6138_v19  ;;  %v1368_v16 = vsub.s32 0, %v7707_v15 }
 0x1bc   :  { %6687 = vmatmul.mubr.msk.f32.vlgmr.msra.gmra.mxu0 %vm183_vm0, %v7549_v45  ;;  %6698 = vmatmul.mubr.msk.f32.vlgmr.msra.gmra.mxu1 %vm183_vm0, %v7549_v45 }
 0x1bd   :  { %6700 = vmatprep.subr.mxu1 %v7307_v20  ;;  %6710 = vmatprep.subr.mxu0 %v7307_v20 }
 0x1be   :  { %6702 = vmatprep.mubr.msk.f32.mxu1 %vm7308_vm1, %v7307_v20  ;;  %6712 = vmatprep.mubr.msk.f32.mxu0 %vm7308_vm1, %v7307_v20 }
 0x24b   :  { %v6578_v23 = vpop.f32.mrf.mxu0  ;;  %v6589_v24 = vpop.f32.mrf.mxu1 }
 0x24c   :  { %v7641_v25 = vadd.f32 %v6578_v23, %v6065_v21  ;;  %v7643_v26 = vadd.f32 %v6589_v24, %v6073_v22 }
 0x24d   :  { %v311_v27 = vpop.f32.mrf.mxu0  ;;  %v399_v28 = vpop.f32.mrf.mxu1 }
 0x24e   :  { %v312_v49 = vadd.f32 %v6065_v21, %v311_v27  ;;  %v400_v50 = vadd.f32 %v6073_v22, %v399_v28  ;;  %v7718_v21 = vrot.slane %v7711_v17, %v1368_v16 }
 0x254   :  { %v6600_v31 = vpop.f32.mrf.mxu0  ;;  %v6611_v32 = vpop.f32.mrf.mxu1 }
 0x255   :  { %v7647_v33 = vadd.f32 %v6600_v31, %v6081_v29  ;;  %v7649_v34 = vadd.f32 %v6611_v32, %v6089_v30 }
 0x256   :  { %v487_v35 = vpop.f32.mrf.mxu0  ;;  %v575_v36 = vpop.f32.mrf.mxu1 }
 0x257   :  { %v488_v60 = vadd.f32 %v6081_v29, %v487_v35  ;;  %v576_v0 = vadd.f32 %v6089_v30, %v575_v36 }
 0x25e   :  { %v6622_v39 = vpop.f32.mrf.mxu0  ;;  %v6633_v40 = vpop.f32.mrf.mxu1 }
 0x25f   :  { %v7653_v41 = vadd.f32 %v6622_v39, %v6092_v37  ;;  %v7655_v43 = vadd.f32 %v6633_v40, %v6100_v38 }
 0x260   :  { %v661_v44 = vpop.f32.mrf.mxu0  ;;  %v749_v46 = vpop.f32.mrf.mxu1 }
 0x261   :  { %v662_v47 = vadd.f32 %v6092_v37, %v661_v44  ;;  %v750_v48 = vadd.f32 %v6100_v38, %v749_v46 }
 0x263   :  { %6701 = vmatpush3.xpose.msk.msra.mxu1 %vm1288_vm2, %v662_v47  ;;  %6711 = vmatpush3.xpose.msk.msra.mxu0 %vm1288_vm2, %v750_v48 }
 0x264   :  { %6720 = vmatprep.subr.mxu0 %v7307_v20  ;;  %6705 = vmatprep.subr.mxu1 %v7307_v20 }
 0x266   :  { %6703 = vmatmul.mubr.msk.f32.vlgmr.msra.gmra.mxu1 %vm1288_vm2, %v312_v49  ;;  %6713 = vmatmul.mubr.msk.f32.vlgmr.msra.gmra.mxu0 %vm1288_vm2, %v400_v50 }
 0x267   :  { %6722 = vmatprep.mubr.msk.f32.mxu0 %vm7308_vm1, %v7307_v20  ;;  %6707 = vmatprep.mubr.msk.f32.mxu1 %vm7308_vm1, %v7307_v20 }
 0x268   :  { %v6644_v53 = vpop.f32.mrf.mxu0  ;;  %v6655_v54 = vpop.f32.mrf.mxu1 }
 0x269   :  { %v7669_v55 = vadd.f32 %v6644_v53, %v6108_v51  ;;  %v7671_v56 = vadd.f32 %v6655_v54, %v6116_v52 }
 0x26a   :  { %v837_v57 = vpop.f32.mrf.mxu0  ;;  %v925_v59 = vpop.f32.mrf.mxu1 }
 0x26b   :  { %v838_v58 = vadd.f32 %v6108_v51, %v837_v57  ;;  %v926_v61 = vadd.f32 %v6116_v52, %v925_v59 }
 0x26d   :  { %6721 = vmatpush3.xpose.msk.msra.mxu0 %vm1288_vm2, %v838_v58 }
 0x26e   :  { %6730 = vmatprep.subr.mxu0 %v7307_v20 }
 0x270   :  { %6723 = vmatmul.mubr.msk.f32.vlgmr.msra.gmra.mxu0 %vm1288_vm2, %v488_v60 }
 0x271   :  { %6731 = vmatpush3.xpose.msk.msra.mxu0 %vm1288_vm2, %v926_v61  ;;  %6732 = vmatprep.mubr.msk.f32.mxu0 %vm7308_vm1, %v7307_v20 }
 0x272   :  { %v6666_v1 = vpop.f32.mrf.mxu0  ;;  %v6677_v2 = vpop.f32.mrf.mxu1  ;;  %6740 = vmatprep.subr.mxu0 %v7307_v20 }
 0x273   :  { %v7684_v3 = vadd.f32 %v6666_v1, %v6119_v62  ;;  %v7687_v4 = vadd.f32 %v6677_v2, %v7677_v63 }
 0x274   :  { %v1011_v5 = vpop.f32.mrf.mxu0  ;;  %6733 = vmatmul.mubr.msk.f32.vlgmr.msra.gmra.mxu0 %vm1288_vm2, %v576_v0  ;;  %v7693_v7 = vpop.f32.mrf.mxu1 }
 0x275   :  { %v1012_v6 = vadd.f32 %v6119_v62, %v1011_v5  ;;  %6748 = vmatprep.mubr.msk.f32.mxu0 %vm7308_vm1, %v7307_v20 }
 0x277   :  { %6706 = vmatpush3.msra.mxu1 %v1012_v6 }
 0x278   :  { %6715 = vmatprep.subr.mxu1 %v7307_v20 }
 0x27c   :  { %v6688_v10 = vpop.f32.mrf.mxu0  ;;  %v6699_v11 = vpop.f32.mrf.mxu1 }
 0x27d   :  { %v7702_v12 = vadd.f32 %v6688_v10, %v7696_v8  ;;  %v7705_v13 = vadd.f32 %v6699_v11, %v7699_v9 }
 0x27e   :  { %v7713_v18 = vpop.f32.mrf.mxu0  ;;  %v7715_v19 = vpop.f32.mrf.mxu1 }
 0x326   :  { %v1361_v22 = vpop.f32.mrf.mxu1  ;;  %v1527_v23 = vpop.f32.mrf.mxu0 }
 0x327   :  { %v1365_v24 = vmul.f32 0.35355338, %v1361_v22  ;;  %v1531_v27 = vmul.f32 0.35355338, %v1527_v23 }
 0x328   :  { %v6704_v28 = vpop.f32.mrf.mxu1  ;;  %v6714_v29 = vpop.f32.mrf.mxu0 }
 0x329   :  { %v1532_v30 = vadd.f32 %v1531_v27, %v7718_v21  ;;  %v1370_v31 = vadd.f32 %v7718_v21, %v1365_v24 }
 0x32b   :  { %v1533_v32 = vsel %vm1288_vm2, %v1532_v30, -inf  ;;  %v1371_v35 = vsel %vm1288_vm2, %v1370_v31, -inf }
 0x32c   :  { %1534 = vmax.xlane.f32.xlu1 %v1533_v32  ;;  %1372 = vmax.xlane.f32.xlu0 %v1371_v35  ;;  %v1188_v35 = vadd.f32 %v7696_v8, %v7713_v18  ;;  %v1286_v18 = vld [vmem:[%s7381_s30 + $0x10] sm:$0xff] }
 0x330   :  { %v1689_v36 = vpop.f32.mrf.mxu0 }
 0x331   :  { %v1693_v37 = vmul.f32 0.35355338, %v1689_v36 }
 0x332   :  { %v6724_v38 = vpop.f32.mrf.mxu0 }
 0x333   :  { %v1694_v39 = vadd.f32 %v1693_v37, %v7718_v21 }
 0x334   :  { %v1851_v40 = vpop.f32.mrf.mxu0 }
 0x335   :  { %v1855_v44 = vmul.f32 0.35355338, %v1851_v40  ;;  %v1695_v46 = vsel %vm1288_vm2, %v1694_v39, -inf }
 0x336   :  { %v6734_v47 = vpop.f32.mrf.mxu0  ;;  %1696 = vmax.xlane.f32.xlu0 %v1695_v46 }
 0x337   :  { %v1856_v48 = vadd.f32 %v1855_v44, %v7718_v21 }
 0x339   :  { %v1857_v49 = vsel %vm1288_vm2, %v1856_v48, -inf }
 0x33a   :  { %1858 = vmax.xlane.f32.xlu1 %v1857_v49 }
 0x3b5   :  { %v1535_v50 = vpop.xlane.xlu1 %1534  ;;  %v1373_v51 = vpop.xlane.xlu0 %1372 }
 0x3b6   :  { %v1536_v52 = vsub.f32 %v1532_v30, %v1535_v50  ;;  %v1374_v53 = vsub.f32 %v1370_v31, %v1373_v51  ;;  %v1100_v31 = vadd.f32 %v7677_v63, %v7693_v7  ;;  %v1276_v7 = vadd.f32 %v7699_v9, %v7715_v19  ;;  %v1287_v9 = vld [vmem:[%s7381_s30 + $0x18] sm:$0xff]  ;;  %v1284_v19 = vld [vmem:[%s7381_s30] sm:$0xff] }
 0x3b7   :  { %6741 = vmatpush3.msra.mxu0 %v1287_v9  ;;  %v2110_v50 = vsub.s32 1, %v7707_v15 }
 0x3b8   :  { %v1537_v54 = vmul.f32 1.442695, %v1536_v52  ;;  %v1375_v57 = vmul.f32 1.442695, %v1374_v53  ;;  %6742 = vmatprep.subr.mxu0 %v7307_v20 }
 0x3b9   :  { %6743 = vmatpush3.msra.mxu0 %v1286_v18  ;;  %v7775_v52 = vrot.slane %v7711_v17, %v2110_v50 }
 0x3ba   :  { %7157 = vpow2.f32 %v1537_v54  ;;  %6744 = vmatprep.subr.mxu0 %v7307_v20 }
 0x3bb   :  { %7159 = vpow2.f32 %v1375_v57 }
 0x3bf   :  { %v1697_v58 = vpop.xlane.xlu0 %1696 }
 0x3c0   :  { %v1698_v59 = vsub.f32 %v1694_v39, %v1697_v58 }
 0x3c2   :  { %v1699_v60 = vmul.f32 1.442695, %v1698_v59 }
 0x3c3   :  { %v1859_v61 = vpop.xlane.xlu1 %1858 }
 0x3c4   :  { %7161 = vpow2.f32 %v1699_v60  ;;  %v1860_v62 = vsub.f32 %v1856_v48, %v1859_v61 }
 0x3c6   :  { %v1861_v0 = vmul.f32 1.442695, %v1860_v62 }
 0x3c7   :  { %v7158_v1 = vpop.eup %7157 }
 0x3c8   :  { %v7160_v2 = vpop.eup %7159  ;;  %7163 = vpow2.f32 %v1861_v0  ;;  %v1539_v5 = vsel %vm1288_vm2, %v7158_v1, 0.0 }
 0x3c9   :  { %1540 = vadd.xlane.f32.xlu1 %v1539_v5  ;;  %v1377_v6 = vsel %vm1288_vm2, %v7160_v2, 0.0 }
 0x3ca   :  { %1378 = vadd.xlane.f32.xlu0 %v1377_v6 }
 0x3d1   :  { %v7162_v10 = vpop.eup %7161 }
 0x3d2   :  { %v1701_v11 = vsel %vm1288_vm2, %v7162_v10, 0.0 }
 0x3d3   :  { %1702 = vadd.xlane.f32.xlu0 %v1701_v11 }
 0x3d5   :  { %v7164_v14 = vpop.eup %7163 }
 0x3d6   :  { %v1863_v16 = vsel %vm1288_vm2, %v7164_v14, 0.0 }
 0x3d7   :  { %1864 = vadd.xlane.f32.xlu1 %v1863_v16 }
 0x452   :  { %v1541_v22 = vpop.xlane.xlu1 %1540 }
 0x453   :  { %v1379_v23 = vpop.xlane.xlu0 %1378 }
 0x454   :  { %7165 = vrcp.f32 %v1379_v23 }
 0x455   :  { %7167 = vrcp.f32 %v1541_v22 }
 0x45c   :  { %v1703_v24 = vpop.xlane.xlu0 %1702 }
 0x45d   :  { %7169 = vrcp.f32 %v1703_v24 }
 0x460   :  { %v1865_v27 = vpop.xlane.xlu1 %1864 }
 0x461   :  { %v7166_v28 = vpop.eup %7165  ;;  %7171 = vrcp.f32 %v1865_v27 }
 0x462   :  { %v1381_v29 = vmul.f32 %v7166_v28, %v7160_v2  ;;  %v7168_v30 = vpop.eup %7167 }
 0x463   :  { %v1543_v32 = vmul.f32 %v7168_v30, %v7158_v1 }
 0x464   :  { %6708 = vmatmul.mubr.msk.f32.vlgmr.msra.gmra.mxu1 %vm1288_vm2, %v1381_v29 }
 0x465   :  { %6716 = vmatpush3.msra.mxu1 %v1100_v31  ;;  %6717 = vmatprep.mubr.msk.f32.mxu1 %vm7308_vm1, %v7307_v20 }
 0x466   :  { %6725 = vmatprep.subr.mxu1 %v7307_v20 }
 0x468   :  { %6718 = vmatmul.mubr.msk.f32.vlgmr.msra.gmra.mxu1 %vm1288_vm2, %v1543_v32 }
 0x469   :  { %6726 = vmatpush3.msra.mxu1 %v1188_v35  ;;  %6727 = vmatprep.mubr.msk.f32.mxu1 %vm7308_vm1, %v7307_v20 }
 0x46a   :  { %v7170_v36 = vpop.eup %7169  ;;  %6735 = vmatprep.subr.mxu1 %v7307_v20 }
 0x46b   :  { %v1705_v63 = vmul.f32 %v7170_v36, %v7162_v10 }
 0x46d   :  { %6728 = vmatmul.mubr.msk.f32.vlgmr.msra.gmra.mxu1 %vm1288_vm2, %v1705_v63 }
 0x46e   :  { %v7172_v37 = vpop.eup %7171  ;;  %6736 = vmatpush3.msra.mxu1 %v1276_v7  ;;  %6737 = vmatprep.mubr.msk.f32.mxu1 %vm7308_vm1, %v7307_v20 }
 0x46f   :  { %6751 = vmatprep.subr.mxu1 %v7307_v20  ;;  %v1867_v8 = vmul.f32 %v7172_v37, %v7164_v14 }
 0x471   :  { %6738 = vmatmul.mubr.msk.f32.vlgmr.msra.gmra.mxu1 %vm1288_vm2, %v1867_v8 }
 0x472   :  { %6752 = vmatpush3.xpose.msk.msra.mxu1 %vm1288_vm2, %v7653_v41  ;;  %6753 = vmatprep.mubr.msk.f32.mxu1 %vm7308_vm1, %v7307_v20  ;;  %v1285_v41 = vld [vmem:[%s7381_s30 + $0x8] sm:$0xff]  ;;  %s8268_s30 = sld [smem:[#allocation15_spill]] }
 0x473   :  { %6756 = vmatprep.subr.mxu1 %v7307_v20  ;;  %6745 = vmatpush3.msra.mxu0 %v1285_v41 }
 0x474   :  { %6746 = vmatprep.subr.mxu0 %v7307_v20 }
 0x475   :  { %6754 = vmatmul.mubr.msk.f32.vlgmr.msra.gmra.mxu1 %vm1288_vm2, %v7641_v25  ;;  %6747 = vmatpush3.msra.mxu0 %v1284_v19 }
 0x476   :  { %6757 = vmatpush3.msra.mxu1 %v7684_v3  ;;  %6758 = vmatprep.mubr.msk.f32.mxu1 %vm7308_vm1, %v7307_v20 }
 0x477   :  { %6766 = vmatprep.subr.mxu1 %v7307_v20  ;;  %6761 = vmatprep.subr.mxu0 %v7307_v20 }
 0x524   :  { %v1451_v25 = vpop.f32.mrf.mxu1 }
 0x526   :  { %v6709_v3 = vpop.f32.mrf.mxu1 }
 0x528   :  { %v1613_v38 = vpop.f32.mrf.mxu1 }
 0x529   :  { %1942 = vrot.lane.b32.xlu0 %v1613_v38, %s7309_s0 }
 0x52a   :  { %v6719_v39 = vpop.f32.mrf.mxu1 }
 0x52d   :  { %v1775_v40 = vpop.f32.mrf.mxu1 }
 0x52e   :  { %1946 = vrot.lane.b32.xlu1 %v1775_v40, %s7310_s5 }
 0x52f   :  { %v6729_v44 = vpop.f32.mrf.mxu1 }
 0x531   :  { %v1937_v46 = vpop.f32.mrf.mxu1 }
 0x532   :  { %1950 = vrot.lane.b32.xlu1 %v1937_v46, %s7311_s9 }
 0x533   :  { %v6739_v47 = vpop.f32.mrf.mxu1 }
 0x535   :  { %v2103_v48 = vpop.f32.mrf.mxu1 }
 0x536   :  { %v2107_v51 = vmul.f32 0.35355338, %v2103_v48 }
 0x537   :  { %v6755_v49 = vpop.f32.mrf.mxu1 }
 0x538   :  { %v2112_v53 = vadd.f32 %v7775_v52, %v2107_v51 }
 0x53a   :  { %v2113_v54 = vsel %vm1288_vm2, %v2112_v53, -inf }
 0x556   :  { %2114 = vmax.xlane.f32.xlu1 %v2113_v54 }
 0x59b   :  { %v1943_v57 = vpop.permute.xlu0 %1942 }
 0x59c   :  { %v1953_v59 = vsel %vm1288_vm2, %v1451_v25, %v1943_v57 }
 0x5a0   :  { %v1947_v58 = vpop.permute.xlu1 %1946 }
 0x5a1   :  { %v1955_v60 = vsel %vm1954_vm3, %v1953_v59, %v1947_v58 }
 0x5a4   :  { %v1951_v61 = vpop.permute.xlu1 %1950 }
 0x5a5   :  { %v1957_v15 = vsel %vm1956_vm4, %v1955_v60, %v1951_v61 }
 0x5a6   :  { %6749 = vmatmul.mubr.msk.f32.vlgmr.msra.gmra.mxu0 %vm183_vm0, %v1957_v15  ;;  %v6172_v15 = vld [vmem:[%s7386_s6] ss:$0 sm:$0xff]  ;;  %s8269_s6 = sld [smem:[#allocation16_spill]] }
 0x5a7   :  { %6762 = vmatpush3.xpose.msk.msra.mxu0 %vm1288_vm2, %v7655_v43  ;;  %6763 = vmatprep.mubr.msk.f32.mxu0 %vm7308_vm1, %v7307_v20 }
 0x5a8   :  { %6771 = vmatprep.subr.mxu0 %v7307_v20 }
 0x5aa   :  { %6764 = vmatmul.mubr.msk.f32.vlgmr.msra.gmra.mxu0 %vm1288_vm2, %v7643_v26 }
 0x5ab   :  { %6772 = vmatpush3.xpose.msk.msra.mxu0 %vm1288_vm2, %v7669_v55  ;;  %6773 = vmatprep.mubr.msk.f32.mxu0 %vm7308_vm1, %v7307_v20 }
 0x5ac   :  { %6781 = vmatprep.subr.mxu0 %v7307_v20 }
 0x5ae   :  { %6774 = vmatmul.mubr.msk.f32.vlgmr.msra.gmra.mxu0 %vm1288_vm2, %v7647_v33 }
 0x5af   :  { %6782 = vmatpush3.xpose.msk.msra.mxu0 %vm1288_vm2, %v7671_v56  ;;  %6783 = vmatprep.mubr.msk.f32.mxu0 %vm7308_vm1, %v7307_v20 }
 0x5b0   :  { %6791 = vmatprep.subr.mxu0 %v7307_v20 }
 0x5b2   :  { %6784 = vmatmul.mubr.msk.f32.vlgmr.msra.gmra.mxu0 %vm1288_vm2, %v7649_v34 }
 0x5b3   :  { %6792 = vmatpush3.msra.mxu0 %v1287_v9  ;;  %6799 = vmatprep.mubr.msk.f32.mxu0 %vm7308_vm1, %v7307_v20 }
 0x5b4   :  { %6793 = vmatprep.subr.mxu0 %v7307_v20 }
 0x5b5   :  { %6794 = vmatpush3.msra.mxu0 %v1286_v18 }
 0x5b6   :  { %6795 = vmatprep.subr.mxu0 %v7307_v20 }
 0x5b7   :  { %6796 = vmatpush3.msra.mxu0 %v1285_v41 }
 0x5b8   :  { %6797 = vmatprep.subr.mxu0 %v7307_v20 }
 0x5b9   :  { %6798 = vmatpush3.msra.mxu0 %v1284_v19 }
 0x5df   :  { %v2115_v26 = vpop.xlane.xlu1 %2114 }
 0x5e0   :  { %v2116_v33 = vsub.f32 %v2112_v53, %v2115_v26 }
 0x5e2   :  { %v2117_v43 = vmul.f32 1.442695, %v2116_v33 }
 0x5e4   :  { %7173 = vpow2.f32 %v2117_v43 }
 0x5f1   :  { %v7174_v55 = vpop.eup %7173 }
 0x5f2   :  { %v2119_v34 = vsel %vm1288_vm2, %v7174_v55, 0.0 }
 0x5f3   :  { %2120 = vadd.xlane.f32.xlu1 %v2119_v34 }
 0x666   :  { %v7810_v56 = vpop.f32.mrf.mxu0 }
 0x668   :  { %v6750_v17 = vpop.f32.mrf.mxu0 }
 0x66a   :  { %v2269_v62 = vpop.f32.mrf.mxu0 }
 0x66b   :  { %v2273_v0 = vmul.f32 0.35355338, %v2269_v62 }
 0x66c   :  { %v6765_v1 = vpop.f32.mrf.mxu0 }
 0x66d   :  { %v2274_v2 = vadd.f32 %v2273_v0, %v7775_v52 }
 0x66e   :  { %v2431_v5 = vpop.f32.mrf.mxu0 }
 0x66f   :  { %v2435_v6 = vmul.f32 0.35355338, %v2431_v5  ;;  %v2275_v10 = vsel %vm1288_vm2, %v2274_v2, -inf }
 0x670   :  { %2276 = vmax.xlane.f32.xlu0 %v2275_v10  ;;  %v6775_v11 = vpop.f32.mrf.mxu0 }
 0x671   :  { %v2436_v14 = vadd.f32 %v2435_v6, %v7775_v52 }
 0x672   :  { %v2593_v16 = vpop.f32.mrf.mxu0 }
 0x673   :  { %v2597_v22 = vmul.f32 0.35355338, %v2593_v16  ;;  %v2437_v23 = vsel %vm1288_vm2, %v2436_v14, -inf }
 0x674   :  { %2438 = vmax.xlane.f32.xlu0 %v2437_v23  ;;  %v6785_v24 = vpop.f32.mrf.mxu0 }
 0x675   :  { %v2598_v27 = vadd.f32 %v2597_v22, %v7775_v52 }
 0x677   :  { %v2599_v28 = vsel %vm1288_vm2, %v2598_v27, -inf }
 0x678   :  { %2600 = vmax.xlane.f32.xlu0 %v2599_v28 }
 0x67c   :  { %v2121_v29 = vpop.xlane.xlu1 %2120 }
 0x67d   :  { %7175 = vrcp.f32 %v2121_v29 }
 0x68a   :  { %v7176_v30 = vpop.eup %7175 }
 0x68b   :  { %v2123_v31 = vmul.f32 %v7176_v30, %v7174_v55 }
 0x68d   :  { %6759 = vmatmul.mubr.msk.f32.vlgmr.msra.gmra.mxu1 %vm1288_vm2, %v2123_v31 }
 0x68e   :  { %6767 = vmatpush3.msra.mxu1 %v7687_v4  ;;  %6768 = vmatprep.mubr.msk.f32.mxu1 %vm7308_vm1, %v7307_v20 }
 0x68f   :  { %6776 = vmatprep.subr.mxu1 %v7307_v20 }
 0x6f9   :  { %v2277_v32 = vpop.xlane.xlu0 %2276 }
 0x6fa   :  { %v2278_v35 = vsub.f32 %v2274_v2, %v2277_v32  ;;  %v6173_v32 = vld [vmem:[%s8258_s13] ss:$0 sm:$0xff] }
 0x6fc   :  { %v2279_v36 = vmul.f32 1.442695, %v2278_v35 }
 0x6fd   :  { %v2439_v63 = vpop.xlane.xlu0 %2438 }
 0x6fe   :  { %7177 = vpow2.f32 %v2279_v36  ;;  %v2440_v7 = vsub.f32 %v2436_v14, %v2439_v63  ;;  %v6174_v36 = vld [vmem:[%s8259_s17] ss:$0 sm:$0xff] }
 0x700   :  { %v2441_v37 = vmul.f32 1.442695, %v2440_v7 }
 0x701   :  { %v2601_v8 = vpop.xlane.xlu0 %2600 }
 0x702   :  { %7179 = vpow2.f32 %v2441_v37  ;;  %v2602_v9 = vsub.f32 %v2598_v27, %v2601_v8  ;;  %v2829_v37 = vld [vmem:[%s8260_s21 + $0x18] sm:$0xff]  ;;  %v2828_v8 = vld [vmem:[%s8260_s21 + $0x10] sm:$0xff] }
 0x704   :  { %v2603_v18 = vmul.f32 1.442695, %v2602_v9  ;;  %v2827_v9 = vld [vmem:[%s8260_s21 + $0x8] sm:$0xff] }
 0x706   :  { %7181 = vpow2.f32 %v2603_v18  ;;  %v2826_v18 = vld [vmem:[%s8260_s21] sm:$0xff] }
 0x70b   :  { %v7178_v41 = vpop.eup %7177 }
 0x70c   :  { %v2281_v4 = vsel %vm1288_vm2, %v7178_v41, 0.0 }
 0x70d   :  { %2282 = vadd.xlane.f32.xlu0 %v2281_v4 }
 0x70f   :  { %v7180_v19 = vpop.eup %7179 }
 0x710   :  { %v2443_v25 = vsel %vm1288_vm2, %v7180_v19, 0.0 }
 0x711   :  { %2444 = vadd.xlane.f32.xlu1 %v2443_v25 }
 0x713   :  { %v7182_v3 = vpop.eup %7181 }
 0x714   :  { %v2605_v38 = vsel %vm1288_vm2, %v7182_v3, 0.0 }
 0x715   :  { %2606 = vadd.xlane.f32.xlu0 %v2605_v38 }
 0x74d   :  { %v2193_v39 = vpop.f32.mrf.mxu1 }
 0x74f   :  { %v6760_v40 = vpop.f32.mrf.mxu1 }
 0x750   :  { %v2943_v40 = vld [vmem:[%s8261_s25 + $0x38] sm:$0xff] }
 0x751   :  { %6813 = vmatprep.subr.mxu0 %v2943_v40 }
 0x796   :  { %v2283_v44 = vpop.xlane.xlu0 %2282 }
 0x797   :  { %7183 = vrcp.f32 %v2283_v44  ;;  %v2942_v44 = vld [vmem:[%s8261_s25 + $0x30] sm:$0xff] }
 0x79a   :  { %v2445_v46 = vpop.xlane.xlu1 %2444 }
 0x79b   :  { %7185 = vrcp.f32 %v2445_v46  ;;  %v2941_v46 = vld [vmem:[%s8261_s25 + $0x28] sm:$0xff] }
 0x79e   :  { %v2607_v47 = vpop.xlane.xlu0 %2606 }
 0x79f   :  { %7187 = vrcp.f32 %v2607_v47  ;;  %v2940_v47 = vld [vmem:[%s8261_s25 + $0x20] sm:$0xff] }
 0x7a4   :  { %v7184_v48 = vpop.eup %7183 }
 0x7a5   :  { %v2285_v49 = vmul.f32 %v7184_v48, %v7178_v41  ;;  %v2939_v48 = vld [vmem:[%s8261_s25 + $0x18] sm:$0xff] }
 0x7a7   :  { %6769 = vmatmul.mubr.msk.f32.vlgmr.msra.gmra.mxu1 %vm1288_vm2, %v2285_v49  ;;  %v2938_v49 = vld [vmem:[%s8261_s25 + $0x10] sm:$0xff] }
 0x7a8   :  { %v7186_v50 = vpop.eup %7185  ;;  %6777 = vmatpush3.msra.mxu1 %v7702_v12  ;;  %6778 = vmatprep.mubr.msk.f32.mxu1 %vm7308_vm1, %v7307_v20 }
 0x7a9   :  { %6786 = vmatprep.subr.mxu1 %v7307_v20  ;;  %v2447_v51 = vmul.f32 %v7186_v50, %v7180_v19  ;;  %v2937_v50 = vld [vmem:[%s8261_s25 + $0x8] sm:$0xff] }
 0x7ab   :  { %6779 = vmatmul.mubr.msk.f32.vlgmr.msra.gmra.mxu1 %vm1288_vm2, %v2447_v51  ;;  %v2936_v51 = vld [vmem:[%s8261_s25] sm:$0xff] }
 0x7ac   :  { %v7188_v53 = vpop.eup %7187  ;;  %6787 = vmatpush3.msra.mxu1 %v7705_v13  ;;  %6788 = vmatprep.mubr.msk.f32.mxu1 %vm7308_vm1, %v7307_v20  ;;  %v2778_v13 = vadd.f32 %v6172_v15, %v7810_v56 }
 0x7ad   :  { %v2609_v54 = vmul.f32 %v7188_v53, %v7182_v3  ;;  %6802 = vmatprep.subr.mxu1 %v2829_v37  ;;  %v6175_v53 = vld [vmem:[%s8262_s29] ss:$0 sm:$0xff] }
 0x7ae   :  { %v2780_v26 = vadd.f32 %v2778_v13, %v7543_v42 }
 0x7af   :  { %6789 = vmatmul.mubr.msk.f32.vlgmr.msra.gmra.mxu1 %vm1288_vm2, %v2609_v54 }
 0x7b0   :  { %v2784_v33 = vsel %vm183_vm0, %v2780_v26, 0.0  ;;  %6803 = vmatpush3.msra.mxu1 %v2829_v37  ;;  %v3082_v37 = vld [vmem:[%s8264_s8 + $0x18] sm:$0xff] }
 0x7b1   :  { %6804 = vmatprep.subr.mxu1 %v2828_v8 }
 0x7b2   :  { %6805 = vmatpush3.msra.mxu1 %v2828_v8  ;;  %v6197_v8 = vld [vmem:[%s8264_s8 + $0x58] sm:$0xff] }
 0x7b3   :  { %6806 = vmatprep.subr.mxu1 %v2827_v9 }
 0x7b4   :  { %6807 = vmatpush3.msra.mxu1 %v2827_v9  ;;  %v3081_v9 = vld [vmem:[%s8264_s8 + $0x10] sm:$0xff] }
 0x7b5   :  { %6808 = vmatprep.subr.mxu1 %v2826_v18 }
 0x7b6   :  { %6809 = vmatpush3.msra.mxu1 %v2826_v18  ;;  %v6196_v18 = vld [vmem:[%s8264_s8 + $0x50] sm:$0xff] }
 0x7b7   :  { %6832 = vmatprep.subr.mxu1 %v3082_v37 }
 0x867   :  { %v2355_v57 = vpop.f32.mrf.mxu1 }
 0x868   :  { %2684 = vrot.lane.b32.xlu1 %v2355_v57, %s7309_s0 }
 0x869   :  { %v6770_v12 = vpop.f32.mrf.mxu1 }
 0x86b   :  { %v2517_v58 = vpop.f32.mrf.mxu1 }
 0x86c   :  { %2688 = vrot.lane.b32.xlu0 %v2517_v58, %s7310_s5 }
 0x86d   :  { %v6780_v59 = vpop.f32.mrf.mxu1 }
 0x86f   :  { %v2679_v60 = vpop.f32.mrf.mxu1 }
 0x870   :  { %2692 = vrot.lane.b32.xlu1 %v2679_v60, %s7311_s9 }
 0x871   :  { %v6790_v61 = vpop.f32.mrf.mxu1 }
 0x894   :  { %2785 = vadd.xlane.f32.xlu1 %v2784_v33 }
 0x8da   :  { %v2685_v43 = vpop.permute.xlu1 %2684 }
 0x8db   :  { %v2695_v34 = vsel %vm1288_vm2, %v2193_v39, %v2685_v43 }
 0x8de   :  { %v2689_v55 = vpop.permute.xlu0 %2688 }
 0x8df   :  { %v2696_v17 = vsel %vm1954_vm3, %v2695_v34, %v2689_v55 }
 0x8e2   :  { %v2693_v62 = vpop.permute.xlu1 %2692 }
 0x8e3   :  { %v2697_v0 = vsel %vm1956_vm4, %v2696_v17, %v2693_v62 }
 0x8e4   :  { %6800 = vmatmul.mubr.msk.f32.vlgmr.msra.gmra.mxu0 %vm183_vm0, %v2697_v0 }
 0x8e5   :  { %6814 = vmatpush3.msra.mxu0 %v2943_v40 }
 0x8e6   :  { %6815 = vmatprep.subr.mxu0 %v2942_v44 }
 0x8e7   :  { %6816 = vmatpush3.msra.mxu0 %v2942_v44 }
 0x8e8   :  { %6817 = vmatprep.subr.mxu0 %v2941_v46 }
 0x8e9   :  { %6818 = vmatpush3.msra.mxu0 %v2941_v46 }
 0x8ea   :  { %6819 = vmatprep.subr.mxu0 %v2940_v47 }
 0x8eb   :  { %6820 = vmatpush3.msra.mxu0 %v2940_v47 }
 0x8ec   :  { %6821 = vmatprep.subr.mxu0 %v2939_v48 }
 0x8ed   :  { %6822 = vmatpush3.msra.mxu0 %v2939_v48 }
 0x8ee   :  { %6823 = vmatprep.subr.mxu0 %v2938_v49 }
 0x8ef   :  { %6824 = vmatpush3.msra.mxu0 %v2938_v49 }
 0x8f0   :  { %6825 = vmatprep.subr.mxu0 %v2937_v50 }
 0x8f1   :  { %6826 = vmatpush3.msra.mxu0 %v2937_v50  ;;  %v6181_v50 = vld [vmem:[%s8266_s19] ss:$0 sm:$0xff] }
 0x8f2   :  { %6827 = vmatprep.subr.mxu0 %v2936_v51 }
 0x8f3   :  { %6828 = vmatpush3.msra.mxu0 %v2936_v51 }
 0x8f4   :  { %6854 = vmatprep.subr.mxu0 %v6197_v8 }
 0x91d   :  { %v2786_v1 = vpop.xlane.xlu1 %2785 }
 0x91e   :  { %v2790_v2 = vmul.f32 0.03125, %v2786_v1 }
 0x920   :  { %v2792_v56 = vsub.f32 %v2780_v26, %v2790_v2 }
 0x922   :  { %v2794_v14 = vmul.f32 %v2792_v56, %v2792_v56 }
 0x924   :  { %v2796_v16 = vsel %vm183_vm0, %v2794_v14, 0.0 }
 0x9a4   :  { %v2767_v5 = vpop.f32.mrf.mxu0 }
 0x9a5   :  { %v2779_v6 = vadd.f32 %v6172_v15, %v2767_v5 }
 0x9a6   :  { %v6801_v42 = vpop.f32.mrf.mxu0 }
 0x9a7   :  { %v2781_v10 = vadd.f32 %v2779_v6, %v7549_v45  ;;  %v6178_v42 = vld [vmem:[%s8263_s3] ss:$0 sm:$0xff] }
 0x9a9   :  { %v2787_v11 = vsel %vm183_vm0, %v2781_v10, 0.0 }
 0x9aa   :  { %2788 = vadd.xlane.f32.xlu0 %v2787_v11 }
 0x9ae   :  { %2797 = vadd.xlane.f32.xlu0 %v2796_v16 }
 0xa33   :  { %v2789_v22 = vpop.xlane.xlu0 %2788 }
 0xa34   :  { %v2791_v23 = vmul.f32 0.03125, %v2789_v22 }
 0xa36   :  { %v2793_v24 = vsub.f32 %v2781_v10, %v2791_v23 }
 0xa37   :  { %v2798_v27 = vpop.xlane.xlu0 %2797 }
 0xa38   :  { %v2802_v28 = vmul.f32 0.03125, %v2798_v27  ;;  %v2795_v29 = vmul.f32 %v2793_v24, %v2793_v24 }
 0xa3a   :  { %v2804_v30 = vadd.f32 1e-12, %v2802_v28  ;;  %v2799_v45 = vsel %vm183_vm0, %v2795_v29, 0.0 }
 0xa3b   :  { %2800 = vadd.xlane.f32.xlu1 %v2799_v45 }
 0xa3c   :  { %7189 = vrsqrt.f32 %v2804_v30 }
 0xa49   :  { %v7190_v31 = vpop.eup %7189 }
 0xa4a   :  { %v2808_v35 = vmul.f32 %v7190_v31, %v2792_v56 }
 0xa4c   :  { %v2816_v63 = vmul.f32 %v6173_v32, %v2808_v35 }
 0xa4e   :  { %v7853_v7 = vadd.f32 %v6174_v36, %v2816_v63 }
 0xa50   :  { %6810 = vmatprep.mubr.msk.f32.mxu1 %vm183_vm0, %v7853_v7 }
 0xac4   :  { %v2801_v41 = vpop.xlane.xlu1 %2800 }
 0xac5   :  { %v2803_v4 = vmul.f32 0.03125, %v2801_v41  ;;  %v3080_v41 = vld [vmem:[%s8264_s8 + $0x8] sm:$0xff] }
 0xac7   :  { %v2805_v19 = vadd.f32 1e-12, %v2803_v4  ;;  %v6195_v4 = vld [vmem:[%s8264_s8 + $0x48] sm:$0xff] }
 0xac9   :  { %7191 = vrsqrt.f32 %v2805_v19  ;;  %v3079_v19 = vld [vmem:[%s8264_s8] sm:$0xff] }
 0xad6   :  { %v7192_v25 = vpop.eup %7191 }
 0xad7   :  { %v2809_v3 = vmul.f32 %v7192_v25, %v2793_v24  ;;  %v6194_v25 = vld [vmem:[%s8264_s8 + $0x40] sm:$0xff] }
 0xad9   :  { %v2817_v38 = vmul.f32 %v6173_v32, %v2809_v3  ;;  %v6189_v3 = vld [vmem:[%s8264_s8 + $0x38] sm:$0xff] }
 0xadb   :  { %v2825_v39 = vadd.f32 %v6174_v36, %v2817_v38  ;;  %v3438_v38 = vld [vmem:[%s8265_s14 + $0x18] sm:$0xff] }
 0xadd   :  { %6811 = vmatmul.mubr.msk.f32.vlgmr.msra.gmra.mxu1 %vm183_vm0, %v2825_v39 }
 0xade   :  { %6833 = vmatpush3.msra.mxu1 %v3082_v37  ;;  %v6258_v37 = vld [vmem:[%s8268_s30 + $0x70] sm:$0xff] }
 0xadf   :  { %6834 = vmatprep.subr.mxu1 %v3081_v9 }
 0xae0   :  { %6835 = vmatpush3.msra.mxu1 %v3081_v9  ;;  %v6256_v9 = vld [vmem:[%s8268_s30 + $0x60] sm:$0xff] }
 0xae1   :  { %6836 = vmatprep.subr.mxu1 %v3080_v41 }
 0xae2   :  { %6837 = vmatpush3.msra.mxu1 %v3080_v41  ;;  %v6199_v41 = vld [vmem:[%s8269_s6 + $0x2] ss:$0 sm:$0xff] }
 0xae3   :  { %6838 = vmatprep.subr.mxu1 %v3079_v19 }
 0xae4   :  { %6839 = vmatpush3.msra.mxu1 %v3079_v19 }
 0xae5   :  { %6843 = vmatprep.subr.mxu1 %v6189_v3 }
 0xb9d   :  { %v6812_v54 = vpop.f32.mrf.mxu1 }
 0xb9e   :  { %v2915_v57 = vadd.f32 %v6812_v54, %v6175_v53 }
 0xb9f   :  { %v2909_v12 = vpop.f32.mrf.mxu1 }
 0xba0   :  { %v2919_v58 = vmul.f32 %v2915_v57, %v2915_v57  ;;  %v2910_v59 = vadd.f32 %v6175_v53, %v2909_v12  ;;  %v6182_v12 = vld [vmem:[%s8267_s24] ss:$0 sm:$0xff] }
 0xba2   :  { %v2921_v60 = vmul.f32 %v2919_v58, %v2915_v57  ;;  %v2918_v61 = vmul.f32 %v2910_v59, %v2910_v59 }
 0xba4   :  { %v2923_v15 = vmul.f32 0.044715, %v2921_v60  ;;  %v2920_v13 = vmul.f32 %v2918_v61, %v2910_v59  ;;  %v6188_v61 = vld [vmem:[%s8264_s8 + $0x30] sm:$0xff] }
 0xba6   :  { %v2925_v26 = vadd.f32 %v2923_v15, %v2915_v57  ;;  %v2922_v33 = vmul.f32 0.044715, %v2920_v13  ;;  %v3437_v15 = vld [vmem:[%s8265_s14 + $0x10] sm:$0xff]  ;;  %v6187_v13 = vld [vmem:[%s8264_s8 + $0x28] sm:$0xff] }
 0xba8   :  { %v2927_v43 = vmul.f32 0.7978846, %v2925_v26  ;;  %v2924_v55 = vadd.f32 %v2922_v33, %v2910_v59  ;;  %v3436_v26 = vld [vmem:[%s8265_s14 + $0x8] sm:$0xff]  ;;  %v6186_v33 = vld [vmem:[%s8264_s8 + $0x20] sm:$0xff] }
 0xbaa   :  { %7193 = vtanh.f32 %v2927_v43  ;;  %v2926_v34 = vmul.f32 0.7978846, %v2924_v55  ;;  %v3435_v43 = vld [vmem:[%s8265_s14] sm:$0xff]  ;;  %v6205_v55 = vld [vmem:[%s8264_s8 + $0x78] sm:$0xff] }
 0xbac   :  { %7195 = vtanh.f32 %v2926_v34  ;;  %v6224_v34 = vld [vmem:[%s8265_s14 + $0x58] sm:$0xff] }
 0xbb7   :  { %v7194_v17 = vpop.eup %7193 }
 0xbb8   :  { %v2931_v62 = vadd.f32 1.0, %v7194_v17  ;;  %v6204_v17 = vld [vmem:[%s8264_s8 + $0x70] sm:$0xff] }
 0xbb9   :  { %v7196_v0 = vpop.eup %7195 }
 0xbba   :  { %v2930_v1 = vadd.f32 1.0, %v7196_v0  ;;  %v2933_v2 = vmul.f32 0.5, %v2931_v62  ;;  %v6223_v62 = vld [vmem:[%s8265_s14 + $0x50] sm:$0xff]  ;;  %v6203_v0 = vld [vmem:[%s8264_s8 + $0x68] sm:$0xff] }
 0xbbc   :  { %v2932_v5 = vmul.f32 0.5, %v2930_v1  ;;  %v2935_v6 = vmul.f32 %v2933_v2, %v2915_v57  ;;  %v6222_v1 = vld [vmem:[%s8265_s14 + $0x48] sm:$0xff]  ;;  %v6202_v2 = vld [vmem:[%s8264_s8 + $0x60] sm:$0xff] }
 0xbbe   :  { %v2934_v56 = vmul.f32 %v2932_v5, %v2910_v59  ;;  %v6221_v5 = vld [vmem:[%s8265_s14 + $0x40] sm:$0xff] }
 0xbc0   :  { %6829 = vmatprep.mubr.msk.f32.mxu0 %vm2951_vm5, %v2934_v56  ;;  %v6216_v56 = vld [vmem:[%s8265_s14 + $0x38] sm:$0xff] }
 0xbc1   :  { %6830 = vmatmul.mubr.msk.f32.vlgmr.msra.gmra.mxu0 %vm2951_vm5, %v2935_v6  ;;  %v3788_v6 = vld [vmem:[%s8268_s30 + $0x18] sm:$0xff] }
 0xbc2   :  { %6855 = vmatpush3.msra.mxu0 %v6197_v8  ;;  %v6257_v8 = vld [vmem:[%s8268_s30 + $0x68] sm:$0xff] }
 0xbc3   :  { %6856 = vmatprep.subr.mxu0 %v6196_v18 }
 0xbc4   :  { %6857 = vmatpush3.msra.mxu0 %v6196_v18  ;;  %v6183_v18 = vld [vmem:[%s8269_s6] ss:$0 sm:$0xff] }
 0xbc5   :  { %6858 = vmatprep.subr.mxu0 %v6195_v4 }
 0xbc6   :  { %6859 = vmatpush3.msra.mxu0 %v6195_v4 }
 0xbc7   :  { %6860 = vmatprep.subr.mxu0 %v6194_v25 }
 0xbc8   :  { %6861 = vmatpush3.msra.mxu0 %v6194_v25 }
 0xbc9   :  { %6876 = vmatprep.subr.mxu0 %v3438_v38 }
 0xc81   :  { %v6831_v10 = vpop.f32.mrf.mxu0 }
 0xc82   :  { %v3030_v11 = vadd.f32 %v6831_v10, %v6178_v42  ;;  %v3787_v10 = vld [vmem:[%s8268_s30 + $0x10] sm:$0xff] }
 0xc83   :  { %v3024_v14 = vpop.f32.mrf.mxu0 }
 0xc84   :  { %v3025_v16 = vadd.f32 %v6178_v42, %v3024_v14  ;;  %v3034_v22 = vadd.f32 %v3030_v11, %v2825_v39  ;;  %v6215_v42 = vld [vmem:[%s8265_s14 + $0x30] sm:$0xff]  ;;  %v6214_v11 = vld [vmem:[%s8265_s14 + $0x28] sm:$0xff] }
 0xc85   :  { %v3786_v14 = vld [vmem:[%s8268_s30 + $0x8] sm:$0xff] }
 0xc86   :  { %v3040_v23 = vsel %vm183_vm0, %v3034_v22, 0.0  ;;  %v3033_v24 = vadd.f32 %v3025_v16, %v7853_v7  ;;  %v6213_v16 = vld [vmem:[%s8265_s14 + $0x20] sm:$0xff] }
 0xc87   :  { %3041 = vadd.xlane.f32.xlu1 %v3040_v23  ;;  %v6232_v23 = vld [vmem:[%s8265_s14 + $0x78] sm:$0xff] }
 0xc88   :  { %v3037_v27 = vsel %vm183_vm0, %v3033_v24, 0.0 }
 0xc89   :  { %3038 = vadd.xlane.f32.xlu0 %v3037_v27  ;;  %v6231_v27 = vld [vmem:[%s8265_s14 + $0x70] sm:$0xff] }
 0xd10   :  { %v3042_v28 = vpop.xlane.xlu1 %3041 }
 0xd11   :  { %v3044_v29 = vmul.f32 0.03125, %v3042_v28  ;;  %v6250_v28 = vld [vmem:[%s8268_s30 + $0x50] sm:$0xff] }
 0xd12   :  { %v3039_v30 = vpop.xlane.xlu0 %3038 }
 0xd13   :  { %v3046_v45 = vsub.f32 %v3034_v22, %v3044_v29  ;;  %v3043_v31 = vmul.f32 0.03125, %v3039_v30  ;;  %v3785_v22 = vld [vmem:[%s8268_s30] sm:$0xff]  ;;  %v6230_v29 = vld [vmem:[%s8265_s14 + $0x68] sm:$0xff] }
 0xd14   :  { %v6249_v30 = vld [vmem:[%s8268_s30 + $0x48] sm:$0xff] }
 0xd15   :  { %v3045_v32 = vsub.f32 %v3033_v24, %v3043_v31  ;;  %v3048_v35 = vmul.f32 %v3046_v45, %v3046_v45  ;;  %v6251_v24 = vld [vmem:[%s8268_s30 + $0x58] sm:$0xff]  ;;  %v6248_v31 = vld [vmem:[%s8268_s30 + $0x40] sm:$0xff] }
 0xd17   :  { %v3052_v36 = vsel %vm183_vm0, %v3048_v35, 0.0  ;;  %v3047_v63 = vmul.f32 %v3045_v32, %v3045_v32  ;;  %v6242_v35 = vld [vmem:[%s8268_s30 + $0x30] sm:$0xff] }
 0xd18   :  { %3053 = vadd.xlane.f32.xlu1 %v3052_v36  ;;  %v6241_v36 = vld [vmem:[%s8268_s30 + $0x28] sm:$0xff] }
 0xd19   :  { %v3049_v7 = vsel %vm183_vm0, %v3047_v63, 0.0  ;;  %v6240_v63 = vld [vmem:[%s8268_s30 + $0x20] sm:$0xff] }
 0xd1a   :  { %3050 = vadd.xlane.f32.xlu0 %v3049_v7  ;;  %v6259_v7 = vld [vmem:[%s8268_s30 + $0x78] sm:$0xff] }
 0xda1   :  { %v3054_v39 = vpop.xlane.xlu1 %3053 }
 0xda2   :  { %v3056_v40 = vmul.f32 0.03125, %v3054_v39  ;;  %v6191_v39 = vld [vmem:[%s8269_s6 + $0x1] ss:$0 sm:$0xff] }
 0xda3   :  { %v3051_v44 = vpop.xlane.xlu0 %3050 }
 0xda4   :  { %v3058_v46 = vadd.f32 1e-12, %v3056_v40  ;;  %v3055_v47 = vmul.f32 0.03125, %v3051_v44  ;;  %v6210_v44 = vld [vmem:[%s8270_s28] ss:$0 sm:$0xff] }
 0xda6   :  { %7197 = vrsqrt.f32 %v3058_v46  ;;  %v3057_v48 = vadd.f32 1e-12, %v3055_v47 }
 0xda8   :  { %7199 = vrsqrt.f32 %v3057_v48 }
 0xdb3   :  { %v7198_v49 = vpop.eup %7197 }
 0xdb4   :  { %v3062_v51 = vmul.f32 %v7198_v49, %v3046_v45  ;;  %v6229_v45 = vld [vmem:[%s8265_s14 + $0x60] sm:$0xff] }
 0xdb5   :  { %v7200_v53 = vpop.eup %7199 }
 0xdb6   :  { %v3061_v54 = vmul.f32 %v7200_v53, %v3045_v32  ;;  %v3070_v57 = vmul.f32 %v6181_v50, %v3062_v51  ;;  %v6243_v32 = vld [vmem:[%s8268_s30 + $0x38] sm:$0xff] }
 0xdb8   :  { %v3069_v58 = vmul.f32 %v6181_v50, %v3061_v54  ;;  %v7893_v60 = vadd.f32 %v6182_v12, %v3070_v57  ;;  %v6207_v57 = vld [vmem:[%s8269_s6 + $0x3] ss:$0 sm:$0xff] }
 0xdba   :  { %v7891_v59 = vadd.f32 %v6182_v12, %v3069_v58  ;;  %v6226_v12 = vld [vmem:[%s8270_s28 + $0x2] ss:$0 sm:$0xff] }
 0xdbc   :  { %6840 = vmatprep.mubr.msk.f32.mxu1 %vm183_vm0, %v7891_v59  ;;  %6862 = vmatprep.mubr.msk.f32.mxu0 %vm183_vm0, %v7891_v59 }
 0xdbd   :  { %6841 = vmatmul.mubr.msk.f32.vlgmr.msra.gmra.mxu1 %vm183_vm0, %v7893_v60  ;;  %6863 = vmatmul.mubr.msk.f32.vlgmr.msra.gmra.mxu0 %vm183_vm0, %v7893_v60 }
 0xdbe   :  { %6844 = vmatpush3.msra.mxu1 %v6189_v3  ;;  %6877 = vmatpush3.msra.mxu0 %v3438_v38 }
 0xdbf   :  { %6845 = vmatprep.subr.mxu1 %v6188_v61  ;;  %6851 = vmatprep.mubr.msk.f32.mxu1 %vm183_vm0, %v7891_v59 }
 0xdc0   :  { %6878 = vmatprep.subr.mxu0 %v3437_v15  ;;  %6884 = vmatprep.mubr.msk.f32.mxu0 %vm183_vm0, %v7891_v59 }
 0xdc1   :  { %6846 = vmatpush3.msra.mxu1 %v6188_v61  ;;  %6879 = vmatpush3.msra.mxu0 %v3437_v15 }
 0xdc2   :  { %6847 = vmatprep.subr.mxu1 %v6187_v13  ;;  %6880 = vmatprep.subr.mxu0 %v3436_v26 }
 0xdc3   :  { %6848 = vmatpush3.msra.mxu1 %v6187_v13  ;;  %6881 = vmatpush3.msra.mxu0 %v3436_v26 }
 0xdc4   :  { %6849 = vmatprep.subr.mxu1 %v6186_v33  ;;  %6882 = vmatprep.subr.mxu0 %v3435_v43 }
 0xdc5   :  { %6850 = vmatpush3.msra.mxu1 %v6186_v33  ;;  %6883 = vmatpush3.msra.mxu0 %v3435_v43  ;;  %v6218_v33 = vld [vmem:[%s8270_s28 + $0x1] ss:$0 sm:$0xff] }
 0xdc6   :  { %6852 = vmatmul.mubr.msk.f32.vlgmr.msra.gmra.mxu1 %vm183_vm0, %v7893_v60  ;;  %6865 = vmatprep.subr.mxu1 %v6205_v55 }
 0xdc7   :  { %6885 = vmatmul.mubr.msk.f32.vlgmr.msra.gmra.mxu0 %vm183_vm0, %v7893_v60  ;;  %6898 = vmatprep.subr.mxu0 %v6224_v34 }
 0xdc8   :  { %6866 = vmatpush3.msra.mxu1 %v6205_v55  ;;  %6873 = vmatprep.mubr.msk.f32.mxu1 %vm183_vm0, %v7891_v59  ;;  %v6237_v55 = vld [vmem:[%s8271_s1] ss:$0 sm:$0xff] }
 0xdc9   :  { %6899 = vmatpush3.msra.mxu0 %v6224_v34  ;;  %6906 = vmatprep.mubr.msk.f32.mxu0 %vm183_vm0, %v7891_v59 }
 0xdca   :  { %6867 = vmatprep.subr.mxu1 %v6204_v17  ;;  %6900 = vmatprep.subr.mxu0 %v6223_v62 }
 0xdcb   :  { %6868 = vmatpush3.msra.mxu1 %v6204_v17  ;;  %6901 = vmatpush3.msra.mxu0 %v6223_v62 }
 0xdcc   :  { %6869 = vmatprep.subr.mxu1 %v6203_v0  ;;  %6902 = vmatprep.subr.mxu0 %v6222_v1 }
 0xdcd   :  { %6870 = vmatpush3.msra.mxu1 %v6203_v0  ;;  %6903 = vmatpush3.msra.mxu0 %v6222_v1 }
 0xdce   :  { %6871 = vmatprep.subr.mxu1 %v6202_v2  ;;  %6904 = vmatprep.subr.mxu0 %v6221_v5 }
 0xdcf   :  { %6872 = vmatpush3.msra.mxu1 %v6202_v2  ;;  %6905 = vmatpush3.msra.mxu0 %v6221_v5 }
 0xdd0   :  { %6874 = vmatmul.mubr.msk.f32.vlgmr.msra.gmra.mxu1 %vm183_vm0, %v7893_v60  ;;  %6887 = vmatprep.subr.mxu1 %v6216_v56 }
 0xdd1   :  { %6907 = vmatmul.mubr.msk.f32.vlgmr.msra.gmra.mxu0 %vm183_vm0, %v7893_v60  ;;  %6920 = vmatprep.subr.mxu0 %v3788_v6 }
 0xdd2   :  { %6888 = vmatpush3.msra.mxu1 %v6216_v56  ;;  %6895 = vmatprep.mubr.msk.f32.mxu1 %vm183_vm0, %v7891_v59 }
 0xdd3   :  { %6921 = vmatpush3.msra.mxu0 %v3788_v6  ;;  %6928 = vmatprep.mubr.msk.f32.mxu0 %vm183_vm0, %v7891_v59 }
 0xdd4   :  { %6889 = vmatprep.subr.mxu1 %v6215_v42  ;;  %6922 = vmatprep.subr.mxu0 %v3787_v10 }
 0xdd5   :  { %6890 = vmatpush3.msra.mxu1 %v6215_v42  ;;  %6923 = vmatpush3.msra.mxu0 %v3787_v10  ;;  %v6234_v10 = vld [vmem:[%s8270_s28 + $0x3] ss:$0 sm:$0xff] }
 0xdd6   :  { %6891 = vmatprep.subr.mxu1 %v6214_v11  ;;  %6924 = vmatprep.subr.mxu0 %v3786_v14 }
 0xdd7   :  { %6892 = vmatpush3.msra.mxu1 %v6214_v11  ;;  %6925 = vmatpush3.msra.mxu0 %v3786_v14  ;;  %v8022_v11 = vld [vmem:[%s8271_s1 + $0x2] ss:$0 sm:$0xff] }
 0xdd8   :  { %6893 = vmatprep.subr.mxu1 %v6213_v16  ;;  %6926 = vmatprep.subr.mxu0 %v3785_v22 }
 0xdd9   :  { %6894 = vmatpush3.msra.mxu1 %v6213_v16  ;;  %6927 = vmatpush3.msra.mxu0 %v3785_v22 }
 0xdda   :  { %6896 = vmatmul.mubr.msk.f32.vlgmr.msra.gmra.mxu1 %vm183_vm0, %v7893_v60  ;;  %6909 = vmatprep.subr.mxu1 %v6232_v23 }
 0xddb   :  { %6929 = vmatmul.mubr.msk.f32.vlgmr.msra.gmra.mxu0 %vm183_vm0, %v7893_v60  ;;  %6942 = vmatprep.subr.mxu0 %v6251_v24 }
 0xddc   :  { %6910 = vmatpush3.msra.mxu1 %v6232_v23  ;;  %6917 = vmatprep.mubr.msk.f32.mxu1 %vm183_vm0, %v7891_v59 }
 0xddd   :  { %6943 = vmatpush3.msra.mxu0 %v6251_v24  ;;  %6950 = vmatprep.mubr.msk.f32.mxu0 %vm183_vm0, %v7891_v59 }
 0xdde   :  { %6911 = vmatprep.subr.mxu1 %v6231_v27  ;;  %6944 = vmatprep.subr.mxu0 %v6250_v28 }
 0xddf   :  { %6912 = vmatpush3.msra.mxu1 %v6231_v27  ;;  %6945 = vmatpush3.msra.mxu0 %v6250_v28 }
 0xde0   :  { %6913 = vmatprep.subr.mxu1 %v6230_v29  ;;  %6946 = vmatprep.subr.mxu0 %v6249_v30 }
 0xde1   :  { %6914 = vmatpush3.msra.mxu1 %v6230_v29  ;;  %6947 = vmatpush3.msra.mxu0 %v6249_v30  ;;  %v8038_v30 = vld [vmem:[%s8271_s1 + $0x1] ss:$0 sm:$0xff] }
 0xde2   :  { %6915 = vmatprep.subr.mxu1 %v6229_v45  ;;  %6948 = vmatprep.subr.mxu0 %v6248_v31 }
 0xde3   :  { %6916 = vmatpush3.msra.mxu1 %v6229_v45  ;;  %6949 = vmatpush3.msra.mxu0 %v6248_v31 }
 0xde4   :  { %6918 = vmatmul.mubr.msk.f32.vlgmr.msra.gmra.mxu1 %vm183_vm0, %v7893_v60  ;;  %6931 = vmatprep.subr.mxu1 %v6243_v32 }
 0xde5   :  { %6951 = vmatmul.mubr.msk.f32.vlgmr.msra.gmra.mxu0 %vm183_vm0, %v7893_v60  ;;  %6932 = vmatpush3.msra.mxu1 %v6243_v32 }
 0xde6   :  { %6939 = vmatprep.mubr.msk.f32.mxu1 %vm183_vm0, %v7891_v59  ;;  %6933 = vmatprep.subr.mxu1 %v6242_v35 }
 0xde7   :  { %6934 = vmatpush3.msra.mxu1 %v6242_v35  ;;  %6964 = vmatprep.subr.mxu0 %v7307_v20  ;;  %v8048_v35 = vld [vmem:[%s8271_s1 + $0x3] ss:$0 sm:$0xff] }
 0xde8   :  { %6935 = vmatprep.subr.mxu1 %v6241_v36  ;;  %6966 = vmatprep.mubr.msk.f32.mxu0 %vm7308_vm1, %v7307_v20 }
 0xde9   :  { %6936 = vmatpush3.msra.mxu1 %v6241_v36 }
 0xdea   :  { %6937 = vmatprep.subr.mxu1 %v6240_v63 }
 0xdeb   :  { %6938 = vmatpush3.msra.mxu1 %v6240_v63 }
 0xdec   :  { %6940 = vmatmul.mubr.msk.f32.vlgmr.msra.gmra.mxu1 %vm183_vm0, %v7893_v60  ;;  %6953 = vmatprep.subr.mxu1 %v6259_v7 }
 0xded   :  { %6954 = vmatpush3.msra.mxu1 %v6259_v7  ;;  %6961 = vmatprep.mubr.msk.f32.mxu1 %vm183_vm0, %v7891_v59 }
 0xdee   :  { %6955 = vmatprep.subr.mxu1 %v6258_v37 }
 0xdef   :  { %6956 = vmatpush3.msra.mxu1 %v6258_v37 }
 0xdf0   :  { %6957 = vmatprep.subr.mxu1 %v6257_v8 }
 0xdf1   :  { %6958 = vmatpush3.msra.mxu1 %v6257_v8 }
 0xdf2   :  { %6959 = vmatprep.subr.mxu1 %v6256_v9 }
 0xdf3   :  { %6960 = vmatpush3.msra.mxu1 %v6256_v9 }
 0xdf4   :  { %6962 = vmatmul.mubr.msk.f32.vlgmr.msra.gmra.mxu1 %vm183_vm0, %v7893_v60  ;;  %6969 = vmatprep.subr.mxu1 %v7307_v20 }
 0xdf5   :  { %6971 = vmatprep.mubr.msk.f32.mxu1 %vm7308_vm1, %v7307_v20 }
 0xe7d   :  { %v6842_v4 = vpop.f32.mrf.mxu1  ;;  %v6864_v19 = vpop.f32.mrf.mxu0 }
 0xe7e   :  { %v7989_v25 = vadd.f32 %v6842_v4, %v6183_v18  ;;  %v7991_v3 = vadd.f32 %v6864_v19, %v6199_v41 }
 0xe7f   :  { %v3162_v38 = vpop.f32.mrf.mxu1  ;;  %v3338_v40 = vpop.f32.mrf.mxu0 }
 0xe80   :  { %v3163_v53 = vadd.f32 %v6183_v18, %v3162_v38  ;;  %v3339_v14 = vadd.f32 %v6199_v41, %v3338_v40 }
 0xe86   :  { %v6853_v46 = vpop.f32.mrf.mxu1 }
 0xe87   :  { %v7995_v47 = vadd.f32 %v6853_v46, %v6191_v39  ;;  %v6886_v48 = vpop.f32.mrf.mxu0 }
 0xe88   :  { %v7997_v49 = vadd.f32 %v6886_v48, %v6210_v44  ;;  %v3250_v54 = vpop.f32.mrf.mxu1 }
 0xe89   :  { %v3512_v50 = vpop.f32.mrf.mxu0  ;;  %v3251_v6 = vadd.f32 %v6191_v39, %v3250_v54 }
 0xe8a   :  { %v3513_v51 = vadd.f32 %v6210_v44, %v3512_v50 }
 0xe8c   :  { %6965 = vmatpush3.xpose.msk.msra.mxu0 %vm1288_vm2, %v3513_v51 }
 0xe8d   :  { %6974 = vmatprep.subr.mxu0 %v7307_v20 }
 0xe8f   :  { %6967 = vmatmul.mubr.msk.f32.vlgmr.msra.gmra.mxu0 %vm1288_vm2, %v3163_v53 }
 0xe90   :  { %v6875_v58 = vpop.f32.mrf.mxu1  ;;  %6976 = vmatprep.mubr.msk.f32.mxu0 %vm7308_vm1, %v7307_v20 }
 0xe91   :  { %v8006_v61 = vadd.f32 %v6875_v58, %v6207_v57  ;;  %v6908_v15 = vpop.f32.mrf.mxu0 }
 0xe92   :  { %v8008_v13 = vadd.f32 %v6908_v15, %v6226_v12  ;;  %v3426_v26 = vpop.f32.mrf.mxu1 }
 0xe93   :  { %v3688_v43 = vpop.f32.mrf.mxu0  ;;  %v3427_v29 = vadd.f32 %v6207_v57, %v3426_v26 }
 0xe94   :  { %v3689_v42 = vadd.f32 %v6226_v12, %v3688_v43 }
 0xe9a   :  { %v6897_v34 = vpop.f32.mrf.mxu1 }
 0xe9b   :  { %v8012_v17 = vadd.f32 %v6897_v34, %v6218_v33  ;;  %v6930_v62 = vpop.f32.mrf.mxu0 }
 0xe9c   :  { %v8014_v0 = vadd.f32 %v6930_v62, %v6237_v55  ;;  %v3600_v1 = vpop.f32.mrf.mxu1 }
 0xe9d   :  { %v3601_v2 = vadd.f32 %v6218_v33, %v3600_v1  ;;  %v3862_v5 = vpop.f32.mrf.mxu0 }
 0xe9e   :  { %v3863_v56 = vadd.f32 %v6237_v55, %v3862_v5 }
 0xe9f   :  { %6975 = vmatpush3.xpose.msk.msra.mxu0 %vm1288_vm2, %v3601_v2 }
 0xea0   :  { %6970 = vmatpush3.msra.mxu1 %v3863_v56  ;;  %6984 = vmatprep.subr.mxu0 %v7307_v20 }
 0xea1   :  { %6979 = vmatprep.subr.mxu1 %v7307_v20 }
 0xea2   :  { %6977 = vmatmul.mubr.msk.f32.vlgmr.msra.gmra.mxu0 %vm1288_vm2, %v3251_v6 }
 0xea3   :  { %6985 = vmatpush3.xpose.msk.msra.mxu0 %vm1288_vm2, %v3689_v42  ;;  %6986 = vmatprep.mubr.msk.f32.mxu0 %vm7308_vm1, %v7307_v20 }
 0xea4   :  { %v6919_v16 = vpop.f32.mrf.mxu1  ;;  %6994 = vmatprep.subr.mxu0 %v7307_v20 }
 0xea5   :  { %v8028_v22 = vadd.f32 %v6919_v16, %v6234_v10  ;;  %v6952_v23 = vpop.f32.mrf.mxu0 }
 0xea6   :  { %v8031_v24 = vadd.f32 %v6952_v23, %v8022_v11  ;;  %v3776_v27 = vpop.f32.mrf.mxu1  ;;  %6987 = vmatmul.mubr.msk.f32.vlgmr.msra.gmra.mxu0 %vm1288_vm2, %v3339_v14 }
 0xea7   :  { %v3777_v28 = vadd.f32 %v6234_v10, %v3776_v27  ;;  %6996 = vmatprep.mubr.msk.f32.mxu0 %vm7308_vm1, %v7307_v20  ;;  %v8053_v7 = vpop.f32.mrf.mxu0 }
 0xea9   :  { %6995 = vmatpush3.xpose.msk.msra.mxu0 %vm1288_vm2, %v3777_v28 }
 0xeaa   :  { %7004 = vmatprep.subr.mxu0 %v7307_v20 }
 0xeac   :  { %v6941_v45 = vpop.f32.mrf.mxu1  ;;  %6997 = vmatmul.mubr.msk.f32.vlgmr.msra.gmra.mxu0 %vm1288_vm2, %v3427_v29 }
 0xead   :  { %v8043_v31 = vadd.f32 %v6941_v45, %v8038_v30  ;;  %7012 = vmatprep.mubr.msk.f32.mxu0 %vm7308_vm1, %v7307_v20 }
 0xeae   :  { %v3950_v32 = vpop.f32.mrf.mxu1 }
 0xeb4   :  { %v6963_v36 = vpop.f32.mrf.mxu1 }
 0xeb5   :  { %v8051_v63 = vadd.f32 %v6963_v36, %v8048_v35 }
 0xf4f   :  { %v4211_v37 = vpop.f32.mrf.mxu0 }
 0xf50   :  { %v4215_v8 = vmul.f32 0.35355338, %v4211_v37  ;;  %v3951_v37 = vadd.f32 %v8038_v30, %v3950_v32  ;;  %v4126_v30 = vpop.f32.mrf.mxu1 }
 0xf51   :  { %v6968_v9 = vpop.f32.mrf.mxu0 }
 0xf52   :  { %v4216_v18 = vadd.f32 %v4215_v8, %v7718_v21 }
 0xf54   :  { %v4217_v41 = vsel %vm1288_vm2, %v4216_v18, -inf }
 0xf55   :  { %4218 = vmax.xlane.f32.xlu0 %v4217_v41 }
 0xf62   :  { %v4373_v4 = vpop.f32.mrf.mxu0 }
 0xf63   :  { %v4377_v19 = vmul.f32 0.35355338, %v4373_v4 }
 0xf64   :  { %v6978_v38 = vpop.f32.mrf.mxu0 }
 0xf65   :  { %v4378_v39 = vadd.f32 %v4377_v19, %v7718_v21  ;;  %v4039_v19 = vadd.f32 %v8022_v11, %v8053_v7 }
 0xf66   :  { %v4535_v40 = vpop.f32.mrf.mxu0 }
 0xf67   :  { %v4539_v44 = vmul.f32 0.35355338, %v4535_v40  ;;  %v4379_v46 = vsel %vm1288_vm2, %v4378_v39, -inf }
 0xf68   :  { %4380 = vmax.xlane.f32.xlu1 %v4379_v46  ;;  %v6988_v48 = vpop.f32.mrf.mxu0  ;;  %v4136_v46 = vld [vmem:[%s8272_s2 + $0x8] sm:$0xff] }
 0xf69   :  { %v4540_v50 = vadd.f32 %v4539_v44, %v7718_v21  ;;  %v4138_v44 = vld [vmem:[%s8272_s2 + $0x18] sm:$0xff]  ;;  %v4135_v48 = vld [vmem:[%s8272_s2] sm:$0xff] }
 0xf6a   :  { %7005 = vmatpush3.msra.mxu0 %v4138_v44 }
 0xf6b   :  { %v4541_v51 = vsel %vm1288_vm2, %v4540_v50, -inf  ;;  %7006 = vmatprep.subr.mxu0 %v7307_v20 }
 0xf6c   :  { %v4697_v53 = vpop.f32.mrf.mxu0  ;;  %4542 = vmax.xlane.f32.xlu0 %v4541_v51 }
 0xf6d   :  { %v4701_v54 = vmul.f32 0.35355338, %v4697_v53 }
 0xf6e   :  { %v6998_v57 = vpop.f32.mrf.mxu0 }
 0xf6f   :  { %v4702_v12 = vadd.f32 %v4701_v54, %v7718_v21 }
 0xf71   :  { %v4703_v58 = vsel %vm1288_vm2, %v4702_v12, -inf }
 0xf72   :  { %4704 = vmax.xlane.f32.xlu1 %v4703_v58 }
 0xfde   :  { %v4219_v15 = vpop.xlane.xlu0 %4218 }
 0xfdf   :  { %v4220_v26 = vsub.f32 %v4216_v18, %v4219_v15 }
 0xfe1   :  { %v4221_v33 = vmul.f32 1.442695, %v4220_v26 }
 0xfe3   :  { %7201 = vpow2.f32 %v4221_v33 }
 0xff0   :  { %v7202_v43 = vpop.eup %7201 }
 0xff1   :  { %v4381_v55 = vpop.xlane.xlu1 %4380  ;;  %v4223_v34 = vsel %vm1288_vm2, %v7202_v43, 0.0 }
 0xff2   :  { %v4382_v62 = vsub.f32 %v4378_v39, %v4381_v55  ;;  %4224 = vadd.xlane.f32.xlu0 %v4223_v34  ;;  %v4127_v39 = vadd.f32 %v8048_v35, %v4126_v30 }
 0xff4   :  { %v4383_v1 = vmul.f32 1.442695, %v4382_v62 }
 0xff5   :  { %v4543_v2 = vpop.xlane.xlu0 %4542 }
 0xff6   :  { %7203 = vpow2.f32 %v4383_v1  ;;  %v4544_v5 = vsub.f32 %v4540_v50, %v4543_v2 }
 0xff8   :  { %v4545_v56 = vmul.f32 1.442695, %v4544_v5 }
 0xffa   :  { %7205 = vpow2.f32 %v4545_v56 }
 0xffb   :  { %v4705_v21 = vpop.xlane.xlu1 %4704 }
 0xffc   :  { %v4706_v6 = vsub.f32 %v4702_v12, %v4705_v21 }
 0xffe   :  { %v4707_v42 = vmul.f32 1.442695, %v4706_v6 }
0x1000   :  { %7207 = vpow2.f32 %v4707_v42 }
0x1003   :  { %v7204_v10 = vpop.eup %7203 }
0x1004   :  { %v4385_v14 = vsel %vm1288_vm2, %v7204_v10, 0.0 }
0x1005   :  { %4386 = vadd.xlane.f32.xlu1 %v4385_v14 }
0x1007   :  { %v7206_v16 = vpop.eup %7205 }
0x1008   :  { %v4547_v23 = vsel %vm1288_vm2, %v7206_v16, 0.0 }
0x1009   :  { %4548 = vadd.xlane.f32.xlu0 %v4547_v23 }
0x100d   :  { %v7208_v27 = vpop.eup %7207 }
0x100e   :  { %v4709_v28 = vsel %vm1288_vm2, %v7208_v27, 0.0 }
0x100f   :  { %4710 = vadd.xlane.f32.xlu1 %v4709_v28 }
0x107b   :  { %v4225_v29 = vpop.xlane.xlu0 %4224 }
0x107c   :  { %7209 = vrcp.f32 %v4225_v29 }
0x1089   :  { %v7210_v45 = vpop.eup %7209 }
0x108a   :  { %v4227_v36 = vmul.f32 %v7210_v45, %v7202_v43 }
0x108c   :  { %6972 = vmatmul.mubr.msk.f32.vlgmr.msra.gmra.mxu1 %vm1288_vm2, %v4227_v36 }
0x108d   :  { %6980 = vmatpush3.msra.mxu1 %v3951_v37  ;;  %6981 = vmatprep.mubr.msk.f32.mxu1 %vm7308_vm1, %v7307_v20 }
0x108e   :  { %v4387_v8 = vpop.xlane.xlu1 %4386  ;;  %6989 = vmatprep.subr.mxu1 %v7307_v20 }
0x108f   :  { %7211 = vrcp.f32 %v4387_v8 }
0x1092   :  { %v4549_v9 = vpop.xlane.xlu0 %4548 }
0x1093   :  { %7213 = vrcp.f32 %v4549_v9 }
0x1098   :  { %v4711_v18 = vpop.xlane.xlu1 %4710 }
0x1099   :  { %7215 = vrcp.f32 %v4711_v18 }
0x109c   :  { %v7212_v41 = vpop.eup %7211 }
0x109d   :  { %v4389_v4 = vmul.f32 %v7212_v41, %v7204_v10 }
0x109f   :  { %6982 = vmatmul.mubr.msk.f32.vlgmr.msra.gmra.mxu1 %vm1288_vm2, %v4389_v4 }
0x10a0   :  { %v7214_v32 = vpop.eup %7213  ;;  %6990 = vmatpush3.msra.mxu1 %v4039_v19  ;;  %6991 = vmatprep.mubr.msk.f32.mxu1 %vm7308_vm1, %v7307_v20 }
0x10a1   :  { %6999 = vmatprep.subr.mxu1 %v7307_v20  ;;  %v4551_v38 = vmul.f32 %v7214_v32, %v7206_v16 }
0x10a3   :  { %6992 = vmatmul.mubr.msk.f32.vlgmr.msra.gmra.mxu1 %vm1288_vm2, %v4551_v38 }
0x10a4   :  { %7000 = vmatpush3.msra.mxu1 %v4127_v39  ;;  %7001 = vmatprep.mubr.msk.f32.mxu1 %vm7308_vm1, %v7307_v20 }
0x10a5   :  { %7015 = vmatprep.subr.mxu1 %v7307_v20 }
0x10a6   :  { %v7216_v11 = vpop.eup %7215 }
0x10a7   :  { %v4713_v7 = vmul.f32 %v7216_v11, %v7208_v27 }
0x10a9   :  { %7002 = vmatmul.mubr.msk.f32.vlgmr.msra.gmra.mxu1 %vm1288_vm2, %v4713_v7 }
0x10aa   :  { %7016 = vmatpush3.xpose.msk.msra.mxu1 %vm1288_vm2, %v7997_v49  ;;  %7017 = vmatprep.mubr.msk.f32.mxu1 %vm7308_vm1, %v7307_v20  ;;  %v4137_v49 = vld [vmem:[%s8272_s2 + $0x10] sm:$0xff] }
0x10ab   :  { %7020 = vmatprep.subr.mxu1 %v7307_v20  ;;  %7007 = vmatpush3.msra.mxu0 %v4137_v49 }
0x10ac   :  { %7008 = vmatprep.subr.mxu0 %v7307_v20 }
0x10ad   :  { %7018 = vmatmul.mubr.msk.f32.vlgmr.msra.gmra.mxu1 %vm1288_vm2, %v7989_v25  ;;  %7009 = vmatpush3.msra.mxu0 %v4136_v46 }
0x10ae   :  { %7021 = vmatpush3.msra.mxu1 %v8014_v0  ;;  %7022 = vmatprep.mubr.msk.f32.mxu1 %vm7308_vm1, %v7307_v20 }
0x10af   :  { %7030 = vmatprep.subr.mxu1 %v7307_v20  ;;  %7010 = vmatprep.subr.mxu0 %v7307_v20 }
0x10b0   :  { %7011 = vmatpush3.msra.mxu0 %v4135_v48 }
0x10b1   :  { %7025 = vmatprep.subr.mxu0 %v7307_v20 }
0x114c   :  { %v4297_v35 = vpop.f32.mrf.mxu1 }
0x114e   :  { %v6973_v40 = vpop.f32.mrf.mxu1 }
0x115f   :  { %v4459_v25 = vpop.f32.mrf.mxu1 }
0x1160   :  { %4788 = vrot.lane.b32.xlu0 %v4459_v25, %s7309_s0 }
0x1161   :  { %v6983_v0 = vpop.f32.mrf.mxu1 }
0x1163   :  { %v4621_v50 = vpop.f32.mrf.mxu1 }
0x1164   :  { %4792 = vrot.lane.b32.xlu1 %v4621_v50, %s7310_s5 }
0x1165   :  { %v6993_v51 = vpop.f32.mrf.mxu1 }
0x1169   :  { %v4783_v53 = vpop.f32.mrf.mxu1 }
0x116a   :  { %4796 = vrot.lane.b32.xlu1 %v4783_v53, %s7311_s9 }
0x116b   :  { %v7003_v54 = vpop.f32.mrf.mxu1 }
0x116d   :  { %v4947_v57 = vpop.f32.mrf.mxu1 }
0x116e   :  { %v4951_v58 = vmul.f32 0.35355338, %v4947_v57 }
0x116f   :  { %v7019_v12 = vpop.f32.mrf.mxu1 }
0x1170   :  { %v4952_v15 = vadd.f32 %v4951_v58, %v7775_v52 }
0x1172   :  { %v4953_v26 = vsel %vm1288_vm2, %v4952_v15, -inf }
0x118e   :  { %4954 = vmax.xlane.f32.xlu1 %v4953_v26 }
0x11d2   :  { %v4789_v43 = vpop.permute.xlu0 %4788 }
0x11d3   :  { %v4799_v55 = vsel %vm1288_vm2, %v4297_v35, %v4789_v43 }
0x11d6   :  { %v4793_v33 = vpop.permute.xlu1 %4792 }
0x11d7   :  { %v4800_v34 = vsel %vm1954_vm3, %v4799_v55, %v4793_v33 }
0x11dc   :  { %v4797_v62 = vpop.permute.xlu1 %4796 }
0x11dd   :  { %v4801_v1 = vsel %vm1956_vm4, %v4800_v34, %v4797_v62  ;;  %v6290_v34 = vld [vmem:[%s8273_s7] ss:$0 sm:$0xff] }
0x11de   :  { %7013 = vmatmul.mubr.msk.f32.vlgmr.msra.gmra.mxu0 %vm183_vm0, %v4801_v1 }
0x11df   :  { %7026 = vmatpush3.xpose.msk.msra.mxu0 %vm1288_vm2, %v8012_v17  ;;  %7027 = vmatprep.mubr.msk.f32.mxu0 %vm7308_vm1, %v7307_v20 }
0x11e0   :  { %7035 = vmatprep.subr.mxu0 %v7307_v20 }
0x11e2   :  { %7028 = vmatmul.mubr.msk.f32.vlgmr.msra.gmra.mxu0 %vm1288_vm2, %v7995_v47 }
0x11e3   :  { %7036 = vmatpush3.xpose.msk.msra.mxu0 %vm1288_vm2, %v8008_v13  ;;  %7037 = vmatprep.mubr.msk.f32.mxu0 %vm7308_vm1, %v7307_v20 }
0x11e4   :  { %7045 = vmatprep.subr.mxu0 %v7307_v20 }
0x11e6   :  { %7038 = vmatmul.mubr.msk.f32.vlgmr.msra.gmra.mxu0 %vm1288_vm2, %v7991_v3 }
0x11e7   :  { %7046 = vmatpush3.xpose.msk.msra.mxu0 %vm1288_vm2, %v8028_v22  ;;  %7047 = vmatprep.mubr.msk.f32.mxu0 %vm7308_vm1, %v7307_v20 }
0x11e8   :  { %7055 = vmatprep.subr.mxu0 %v7307_v20 }
0x11ea   :  { %7048 = vmatmul.mubr.msk.f32.vlgmr.msra.gmra.mxu0 %vm1288_vm2, %v8006_v61 }
0x11eb   :  { %7056 = vmatpush3.msra.mxu0 %v4138_v44  ;;  %7063 = vmatprep.mubr.msk.f32.mxu0 %vm7308_vm1, %v7307_v20 }
0x11ec   :  { %7057 = vmatprep.subr.mxu0 %v7307_v20 }
0x11ed   :  { %7058 = vmatpush3.msra.mxu0 %v4137_v49 }
0x11ee   :  { %7059 = vmatprep.subr.mxu0 %v7307_v20 }
0x11ef   :  { %7060 = vmatpush3.msra.mxu0 %v4136_v46 }
0x11f0   :  { %7061 = vmatprep.subr.mxu0 %v7307_v20 }
0x11f1   :  { %7062 = vmatpush3.msra.mxu0 %v4135_v48 }
0x1217   :  { %v4955_v3 = vpop.xlane.xlu1 %4954 }
0x1218   :  { %v4956_v47 = vsub.f32 %v4952_v15, %v4955_v3 }
0x121a   :  { %v4957_v13 = vmul.f32 1.442695, %v4956_v47 }
0x121c   :  { %7217 = vpow2.f32 %v4957_v13 }
0x1229   :  { %v7218_v17 = vpop.eup %7217 }
0x122a   :  { %v4959_v61 = vsel %vm1288_vm2, %v7218_v17, 0.0 }
0x122b   :  { %4960 = vadd.xlane.f32.xlu1 %v4959_v61 }
0x129e   :  { %v8139_v22 = vpop.f32.mrf.mxu0 }
0x12a0   :  { %v7014_v2 = vpop.f32.mrf.mxu0 }
0x12a2   :  { %v5109_v5 = vpop.f32.mrf.mxu0 }
0x12a3   :  { %v5113_v56 = vmul.f32 0.35355338, %v5109_v5 }
0x12a4   :  { %v7029_v21 = vpop.f32.mrf.mxu0 }
0x12a5   :  { %v5114_v6 = vadd.f32 %v5113_v56, %v7775_v52 }
0x12a6   :  { %v5271_v42 = vpop.f32.mrf.mxu0 }
0x12a7   :  { %v5275_v10 = vmul.f32 0.35355338, %v5271_v42  ;;  %v5115_v14 = vsel %vm1288_vm2, %v5114_v6, -inf }
0x12a8   :  { %5116 = vmax.xlane.f32.xlu0 %v5115_v14  ;;  %v7039_v16 = vpop.f32.mrf.mxu0 }
0x12a9   :  { %v5276_v23 = vadd.f32 %v5275_v10, %v7775_v52 }
0x12aa   :  { %v5433_v27 = vpop.f32.mrf.mxu0 }
0x12ab   :  { %v5437_v28 = vmul.f32 0.35355338, %v5433_v27  ;;  %v5277_v29 = vsel %vm1288_vm2, %v5276_v23, -inf }
0x12ac   :  { %5278 = vmax.xlane.f32.xlu0 %v5277_v29  ;;  %v7049_v45 = vpop.f32.mrf.mxu0 }
0x12ad   :  { %v5438_v36 = vadd.f32 %v5437_v28, %v7775_v52 }
0x12af   :  { %v5439_v37 = vsel %vm1288_vm2, %v5438_v36, -inf }
0x12b0   :  { %5440 = vmax.xlane.f32.xlu0 %v5439_v37 }
0x12b4   :  { %v4961_v8 = vpop.xlane.xlu1 %4960 }
0x12b5   :  { %7219 = vrcp.f32 %v4961_v8 }
0x12c2   :  { %v7220_v9 = vpop.eup %7219 }
0x12c3   :  { %v4963_v18 = vmul.f32 %v7220_v9, %v7218_v17  ;;  %v6291_v9 = vld [vmem:[%s8274_s10] ss:$0 sm:$0xff] }
0x12c5   :  { %7023 = vmatmul.mubr.msk.f32.vlgmr.msra.gmra.mxu1 %vm1288_vm2, %v4963_v18 }
0x12c6   :  { %7031 = vmatpush3.msra.mxu1 %v8043_v31  ;;  %7032 = vmatprep.mubr.msk.f32.mxu1 %vm7308_vm1, %v7307_v20 }
0x12c7   :  { %7040 = vmatprep.subr.mxu1 %v7307_v20 }
0x1331   :  { %v5117_v41 = vpop.xlane.xlu0 %5116 }
0x1332   :  { %v5118_v4 = vsub.f32 %v5114_v6, %v5117_v41  ;;  %v6292_v41 = vld [vmem:[%s8275_s11] ss:$0 sm:$0xff] }
0x1334   :  { %v5119_v19 = vmul.f32 1.442695, %v5118_v4 }
0x1335   :  { %v5279_v52 = vpop.xlane.xlu0 %5278 }
0x1336   :  { %7221 = vpow2.f32 %v5119_v19  ;;  %v5280_v30 = vsub.f32 %v5276_v23, %v5279_v52  ;;  %v5669_v52 = vld [vmem:[%s8276_s15 + $0x18] sm:$0xff] }
0x1338   :  { %v5281_v32 = vmul.f32 1.442695, %v5280_v30  ;;  %v5668_v30 = vld [vmem:[%s8276_s15 + $0x10] sm:$0xff] }
0x1339   :  { %v5441_v38 = vpop.xlane.xlu0 %5440 }
0x133a   :  { %7223 = vpow2.f32 %v5281_v32  ;;  %v5442_v39 = vsub.f32 %v5438_v36, %v5441_v38  ;;  %v5667_v32 = vld [vmem:[%s8276_s15 + $0x8] sm:$0xff]  ;;  %v5666_v38 = vld [vmem:[%s8276_s15] sm:$0xff] }
0x133c   :  { %v5443_v11 = vmul.f32 1.442695, %v5442_v39 }
0x133e   :  { %7225 = vpow2.f32 %v5443_v11 }
0x1343   :  { %v7222_v7 = vpop.eup %7221 }
0x1344   :  { %v5121_v31 = vsel %vm1288_vm2, %v7222_v7, 0.0 }
0x1345   :  { %5122 = vadd.xlane.f32.xlu0 %v5121_v31 }
0x1347   :  { %v7224_v35 = vpop.eup %7223 }
0x1348   :  { %v5283_v40 = vsel %vm1288_vm2, %v7224_v35, 0.0 }
0x1349   :  { %5284 = vadd.xlane.f32.xlu1 %v5283_v40 }
0x134b   :  { %v7226_v44 = vpop.eup %7225 }
0x134c   :  { %v5445_v49 = vsel %vm1288_vm2, %v7226_v44, 0.0 }
0x134d   :  { %5446 = vadd.xlane.f32.xlu0 %v5445_v49  ;;  %v5783_v49 = vld [vmem:[%s8277_s16 + $0x38] sm:$0xff] }
0x134e   :  { %7077 = vmatprep.subr.mxu0 %v5783_v49 }
0x1385   :  { %v5033_v46 = vpop.f32.mrf.mxu1 }
0x1387   :  { %v7024_v48 = vpop.f32.mrf.mxu1 }
0x1388   :  { %v5781_v48 = vld [vmem:[%s8277_s16 + $0x28] sm:$0xff] }
0x13ce   :  { %v5123_v25 = vpop.xlane.xlu0 %5122 }
0x13cf   :  { %7227 = vrcp.f32 %v5123_v25  ;;  %v5780_v25 = vld [vmem:[%s8277_s16 + $0x20] sm:$0xff] }
0x13d2   :  { %v5285_v0 = vpop.xlane.xlu1 %5284 }
0x13d3   :  { %7229 = vrcp.f32 %v5285_v0  ;;  %v5779_v0 = vld [vmem:[%s8277_s16 + $0x18] sm:$0xff] }
0x13d6   :  { %v5447_v50 = vpop.xlane.xlu0 %5446 }
0x13d7   :  { %7231 = vrcp.f32 %v5447_v50  ;;  %v5778_v50 = vld [vmem:[%s8277_s16 + $0x10] sm:$0xff] }
0x13dc   :  { %v7228_v51 = vpop.eup %7227 }
0x13dd   :  { %v5125_v53 = vmul.f32 %v7228_v51, %v7222_v7  ;;  %v5777_v51 = vld [vmem:[%s8277_s16 + $0x8] sm:$0xff] }
0x13df   :  { %7033 = vmatmul.mubr.msk.f32.vlgmr.msra.gmra.mxu1 %vm1288_vm2, %v5125_v53  ;;  %v5776_v53 = vld [vmem:[%s8277_s16] sm:$0xff] }
0x13e0   :  { %v7230_v54 = vpop.eup %7229  ;;  %7041 = vmatpush3.msra.mxu1 %v8031_v24  ;;  %7042 = vmatprep.mubr.msk.f32.mxu1 %vm7308_vm1, %v7307_v20 }
0x13e1   :  { %7050 = vmatprep.subr.mxu1 %v7307_v20  ;;  %v5287_v57 = vmul.f32 %v7230_v54, %v7224_v35  ;;  %v6293_v54 = vld [vmem:[%s8278_s18] ss:$0 sm:$0xff] }
0x13e3   :  { %7043 = vmatmul.mubr.msk.f32.vlgmr.msra.gmra.mxu1 %vm1288_vm2, %v5287_v57 }
0x13e4   :  { %v7232_v12 = vpop.eup %7231  ;;  %7051 = vmatpush3.msra.mxu1 %v8051_v63  ;;  %7052 = vmatprep.mubr.msk.f32.mxu1 %vm7308_vm1, %v7307_v20  ;;  %v5618_v63 = vadd.f32 %v6290_v34, %v8139_v22 }
0x13e5   :  { %v5449_v58 = vmul.f32 %v7232_v12, %v7226_v44  ;;  %7066 = vmatprep.subr.mxu1 %v5669_v52 }
0x13e6   :  { %v5620_v62 = vadd.f32 %v5618_v63, %v7891_v59 }
0x13e7   :  { %7053 = vmatmul.mubr.msk.f32.vlgmr.msra.gmra.mxu1 %vm1288_vm2, %v5449_v58 }
0x13e8   :  { %v5624_v1 = vsel %vm183_vm0, %v5620_v62, 0.0  ;;  %7067 = vmatpush3.msra.mxu1 %v5669_v52  ;;  %v5924_v52 = vld [vmem:[%s7511_s12 + $0x8] sm:$0xff] }
0x13e9   :  { %7068 = vmatprep.subr.mxu1 %v5668_v30 }
0x13ea   :  { %7069 = vmatpush3.msra.mxu1 %v5668_v30  ;;  %v5923_v30 = vld [vmem:[%s7511_s12] sm:$0xff] }
0x13eb   :  { %7070 = vmatprep.subr.mxu1 %v5667_v32 }
0x13ec   :  { %7071 = vmatpush3.msra.mxu1 %v5667_v32 }
0x13ed   :  { %7072 = vmatprep.subr.mxu1 %v5666_v38 }
0x13ee   :  { %7073 = vmatpush3.msra.mxu1 %v5666_v38 }
0x13ef   :  { %7096 = vmatprep.subr.mxu1 %v7307_v20 }
0x149f   :  { %v5195_v15 = vpop.f32.mrf.mxu1 }
0x14a0   :  { %5524 = vrot.lane.b32.xlu1 %v5195_v15, %s7309_s0 }
0x14a1   :  { %v7034_v24 = vpop.f32.mrf.mxu1 }
0x14a3   :  { %v5357_v26 = vpop.f32.mrf.mxu1 }
0x14a4   :  { %5528 = vrot.lane.b32.xlu0 %v5357_v26, %s7310_s5 }
0x14a5   :  { %v7044_v33 = vpop.f32.mrf.mxu1 }
0x14a7   :  { %v5519_v43 = vpop.f32.mrf.mxu1 }
0x14a8   :  { %5532 = vrot.lane.b32.xlu1 %v5519_v43, %s7311_s9 }
0x14a9   :  { %v7054_v55 = vpop.f32.mrf.mxu1 }
0x14cc   :  { %5625 = vadd.xlane.f32.xlu1 %v5624_v1 }
0x1512   :  { %v5525_v3 = vpop.permute.xlu1 %5524 }
0x1513   :  { %v5535_v13 = vsel %vm1288_vm2, %v5033_v46, %v5525_v3  ;;  %v5782_v46 = vld [vmem:[%s8277_s16 + $0x30] sm:$0xff] }
0x1516   :  { %v5529_v47 = vpop.permute.xlu0 %5528 }
0x1517   :  { %v5536_v17 = vsel %vm1954_vm3, %v5535_v13, %v5529_v47 }
0x151a   :  { %v5533_v61 = vpop.permute.xlu1 %5532 }
0x151b   :  { %v5537_v2 = vsel %vm1956_vm4, %v5536_v17, %v5533_v61 }
0x151c   :  { %7064 = vmatmul.mubr.msk.f32.vlgmr.msra.gmra.mxu0 %vm183_vm0, %v5537_v2 }
0x151d   :  { %7078 = vmatpush3.msra.mxu0 %v5783_v49 }
0x151e   :  { %7079 = vmatprep.subr.mxu0 %v5782_v46 }
0x151f   :  { %7080 = vmatpush3.msra.mxu0 %v5782_v46  ;;  %v6300_v46 = vld [vmem:[%s7506_s4] ss:$0 sm:$0xff] }
0x1520   :  { %7081 = vmatprep.subr.mxu0 %v5781_v48 }
0x1521   :  { %7082 = vmatpush3.msra.mxu0 %v5781_v48 }
0x1522   :  { %7083 = vmatprep.subr.mxu0 %v5780_v25 }
0x1523   :  { %7084 = vmatpush3.msra.mxu0 %v5780_v25 }
0x1524   :  { %7085 = vmatprep.subr.mxu0 %v5779_v0 }
0x1525   :  { %7086 = vmatpush3.msra.mxu0 %v5779_v0 }
0x1526   :  { %7087 = vmatprep.subr.mxu0 %v5778_v50 }
0x1527   :  { %7088 = vmatpush3.msra.mxu0 %v5778_v50 }
0x1528   :  { %7089 = vmatprep.subr.mxu0 %v5777_v51 }
0x1529   :  { %7090 = vmatpush3.msra.mxu0 %v5777_v51 }
0x152a   :  { %7091 = vmatprep.subr.mxu0 %v5776_v53 }
0x152b   :  { %7092 = vmatpush3.msra.mxu0 %v5776_v53 }
0x1555   :  { %v5626_v5 = vpop.xlane.xlu1 %5625 }
0x1556   :  { %v5630_v56 = vmul.f32 0.03125, %v5626_v5 }
0x1558   :  { %v5632_v22 = vsub.f32 %v5620_v62, %v5630_v56 }
0x155a   :  { %v5634_v14 = vmul.f32 %v5632_v22, %v5632_v22 }
0x155c   :  { %v5636_v16 = vsel %vm183_vm0, %v5634_v14, 0.0 }
0x15dc   :  { %v5607_v21 = vpop.f32.mrf.mxu0 }
0x15dd   :  { %v5619_v6 = vadd.f32 %v6290_v34, %v5607_v21 }
0x15de   :  { %v7065_v59 = vpop.f32.mrf.mxu0 }
0x15df   :  { %v5621_v42 = vadd.f32 %v5619_v6, %v7893_v60 }
0x15e1   :  { %v5627_v10 = vsel %vm183_vm0, %v5621_v42, 0.0 }
0x15e2   :  { %5628 = vadd.xlane.f32.xlu0 %v5627_v10 }
0x15e6   :  { %5637 = vadd.xlane.f32.xlu0 %v5636_v16 }
0x166b   :  { %v5629_v23 = vpop.xlane.xlu0 %5628 }
0x166c   :  { %v5631_v27 = vmul.f32 0.03125, %v5629_v23 }
0x166e   :  { %v5633_v28 = vsub.f32 %v5621_v42, %v5631_v27 }
0x166f   :  { %v5638_v29 = vpop.xlane.xlu0 %5637 }
0x1670   :  { %v5642_v45 = vmul.f32 0.03125, %v5638_v29  ;;  %v5635_v36 = vmul.f32 %v5633_v28, %v5633_v28 }
0x1672   :  { %v5644_v37 = vadd.f32 1e-12, %v5642_v45  ;;  %v5639_v60 = vsel %vm183_vm0, %v5635_v36, 0.0 }
0x1673   :  { %5640 = vadd.xlane.f32.xlu1 %v5639_v60 }
0x1674   :  { %7233 = vrsqrt.f32 %v5644_v37 }
0x1681   :  { %v7234_v8 = vpop.eup %7233 }
0x1682   :  { %v5648_v18 = vmul.f32 %v7234_v8, %v5632_v22  ;;  %v6296_v22 = vld [vmem:[%s8279_s22] ss:$0 sm:$0xff] }
0x1684   :  { %v5656_v4 = vmul.f32 %v6291_v9, %v5648_v18 }
0x1686   :  { %v8182_v19 = vadd.f32 %v6292_v41, %v5656_v4  ;;  %v5926_v4 = vld [vmem:[%s7511_s12 + $0x18] sm:$0xff] }
0x1688   :  { %7074 = vmatprep.mubr.msk.f32.mxu1 %vm183_vm0, %v8182_v19 }
0x16fc   :  { %v5641_v39 = vpop.xlane.xlu1 %5640 }
0x16fd   :  { %v5643_v11 = vmul.f32 0.03125, %v5641_v39 }
0x16ff   :  { %v5645_v7 = vadd.f32 1e-12, %v5643_v11 }
0x1701   :  { %7235 = vrsqrt.f32 %v5645_v7 }
0x170e   :  { %v7236_v31 = vpop.eup %7235 }
0x170f   :  { %v5649_v35 = vmul.f32 %v7236_v31, %v5633_v28 }
0x1711   :  { %v5657_v40 = vmul.f32 %v6291_v9, %v5649_v35 }
0x1713   :  { %v5665_v44 = vadd.f32 %v6292_v41, %v5657_v40  ;;  %v6299_v40 = vld [vmem:[%s8280_s23] ss:$0 sm:$0xff] }
0x1715   :  { %7075 = vmatmul.mubr.msk.f32.vlgmr.msra.gmra.mxu1 %vm183_vm0, %v5665_v44 }
0x1716   :  { %7104 = vmatprep.mubr.msk.f32.mxu1 %vm7308_vm1, %v7307_v20  ;;  %7097 = vmatpush3.msra.mxu1 %v5926_v4 }
0x1717   :  { %7098 = vmatprep.subr.mxu1 %v7307_v20 }
0x17d5   :  { %v7076_v57 = vpop.f32.mrf.mxu1 }
0x17d6   :  { %v5755_v12 = vadd.f32 %v7076_v57, %v6293_v54 }
0x17d7   :  { %v5749_v58 = vpop.f32.mrf.mxu1 }
0x17d8   :  { %v5759_v15 = vmul.f32 %v5755_v12, %v5755_v12  ;;  %v5750_v24 = vadd.f32 %v6293_v54, %v5749_v58  ;;  %v6301_v54 = vld [vmem:[%s7516_s20] ss:$0 sm:$0xff] }
0x17da   :  { %v5761_v26 = vmul.f32 %v5759_v15, %v5755_v12  ;;  %v5758_v33 = vmul.f32 %v5750_v24, %v5750_v24 }
0x17dc   :  { %v5763_v43 = vmul.f32 0.044715, %v5761_v26  ;;  %v5760_v55 = vmul.f32 %v5758_v33, %v5750_v24 }
0x17de   :  { %v5765_v34 = vadd.f32 %v5763_v43, %v5755_v12  ;;  %v5762_v63 = vmul.f32 0.044715, %v5760_v55 }
0x17e0   :  { %v5767_v62 = vmul.f32 0.7978846, %v5765_v34  ;;  %v5764_v1 = vadd.f32 %v5762_v63, %v5750_v24 }
0x17e2   :  { %7237 = vtanh.f32 %v5767_v62  ;;  %v5766_v3 = vmul.f32 0.7978846, %v5764_v1 }
0x17e4   :  { %7239 = vtanh.f32 %v5766_v3 }
0x17ef   :  { %v7238_v47 = vpop.eup %7237 }
0x17f0   :  { %v5771_v13 = vadd.f32 1.0, %v7238_v47 }
0x17f1   :  { %v7240_v17 = vpop.eup %7239 }
0x17f2   :  { %v5770_v61 = vadd.f32 1.0, %v7240_v17  ;;  %v5773_v2 = vmul.f32 0.5, %v5771_v13 }
0x17f4   :  { %v5772_v5 = vmul.f32 0.5, %v5770_v61  ;;  %v5775_v21 = vmul.f32 %v5773_v2, %v5755_v12 }
0x17f6   :  { %v5774_v56 = vmul.f32 %v5772_v5, %v5750_v24 }
0x17f8   :  { %7093 = vmatprep.mubr.msk.f32.mxu0 %vm2951_vm5, %v5774_v56 }
0x17f9   :  { %7094 = vmatmul.mubr.msk.f32.vlgmr.msra.gmra.mxu0 %vm2951_vm5, %v5775_v21 }
0x18b9   :  { %v7095_v6 = vpop.f32.mrf.mxu0 }
0x18ba   :  { %v5869_v59 = vadd.f32 %v7095_v6, %v6296_v22 }
0x18bb   :  { %v5863_v42 = vpop.f32.mrf.mxu0 }
0x18bc   :  { %v5864_v10 = vadd.f32 %v6296_v22, %v5863_v42  ;;  %v5873_v14 = vadd.f32 %v5869_v59, %v5665_v44 }
0x18be   :  { %v5879_v16 = vsel %vm183_vm0, %v5873_v14, 0.0  ;;  %v5872_v23 = vadd.f32 %v5864_v10, %v8182_v19  ;;  %v5925_v19 = vld [vmem:[%s7511_s12 + $0x10] sm:$0xff]  ;;  %s7312_s12 = smov [#allocation2]  }
0x18bf   :  { %5880 = vadd.xlane.f32.xlu0 %v5879_v16  ;;  %7099 = vmatpush3.msra.mxu1 %v5925_v19  ;;  %s6014_s26 = sshll.u32 %s7312_s12, 4  ;;  %s6015_s26 = int_to_ptr.vmem [resolvable:$true] %s6014_s26 }
0x18c0   :  { %v5876_v27 = vsel %vm183_vm0, %v5872_v23, 0.0  ;;  %7100 = vmatprep.subr.mxu1 %v7307_v20  ;;  %s7245_s0 = scalar_lea.vmem %s6015_s26, 32  ;;  %p7250_p1 = scmp.lt.s32.totalorder %s6015_s26, %s6015_s26 }
0x18c1   :  { %5877 = vadd.xlane.f32.xlu1 %v5876_v27  ;;  %7101 = vmatpush3.msra.mxu1 %v5924_v52  ;;  %p7246_p0 = scmp.ne.s32.totalorder %s6015_s26, %s7245_s0  ;;  %p7251_p2 = scmp.lt.s32.totalorder %s7245_s0, %s7245_s0 }
0x18c2   :  { %7102 = vmatprep.subr.mxu1 %v7307_v20 }
0x18c3   :  { %7103 = vmatpush3.msra.mxu1 %v5923_v30  ;;  %p7252_p3 = por %p7251_p2, %p7250_p1 }
0x18c5   :  { %p7253_p4 = pnand %p7252_p3, %p7246_p0 }
0x1948   :  { %v5881_v28 = vpop.xlane.xlu0 %5880 }
0x1949   :  { %v5883_v29 = vmul.f32 0.03125, %v5881_v28 }
0x194a   :  { %v5878_v45 = vpop.xlane.xlu1 %5877 }
0x194b   :  { %v5885_v36 = vsub.f32 %v5873_v14, %v5883_v29  ;;  %v5882_v37 = vmul.f32 0.03125, %v5878_v45 }
0x194d   :  { %v5884_v60 = vsub.f32 %v5872_v23, %v5882_v37  ;;  %v5887_v8 = vmul.f32 %v5885_v36, %v5885_v36 }
0x194f   :  { %v5891_v9 = vsel %vm183_vm0, %v5887_v8, 0.0  ;;  %v5886_v18 = vmul.f32 %v5884_v60, %v5884_v60 }
0x1950   :  { %5892 = vadd.xlane.f32.xlu0 %v5891_v9 }
0x1951   :  { %v5888_v41 = vsel %vm183_vm0, %v5886_v18, 0.0 }
0x1952   :  { %5889 = vadd.xlane.f32.xlu1 %v5888_v41 }
0x19d9   :  { %v5893_v32 = vpop.xlane.xlu0 %5892 }
0x19da   :  { %v5895_v38 = vmul.f32 0.03125, %v5893_v32 }
0x19db   :  { %v5890_v39 = vpop.xlane.xlu1 %5889 }
0x19dc   :  { %v5897_v11 = vadd.f32 1e-12, %v5895_v38  ;;  %v5894_v7 = vmul.f32 0.03125, %v5890_v39 }
0x19de   :  { %7241 = vrsqrt.f32 %v5897_v11  ;;  %v5896_v31 = vadd.f32 1e-12, %v5894_v7 }
0x19e0   :  { %7243 = vrsqrt.f32 %v5896_v31 }
0x19eb   :  { %v7242_v35 = vpop.eup %7241 }
0x19ec   :  { %v5901_v44 = vmul.f32 %v7242_v35, %v5885_v36 }
0x19ed   :  { %v7244_v49 = vpop.eup %7243 }
0x19ee   :  { %v5900_v48 = vmul.f32 %v7244_v49, %v5884_v60  ;;  %v5909_v25 = vmul.f32 %v6299_v40, %v5901_v44 }
0x19f0   :  { %v5908_v0 = vmul.f32 %v6299_v40, %v5900_v48  ;;  %v5917_v50 = vadd.f32 %v6300_v46, %v5909_v25 }
0x19f2   :  { %v5916_v20 = vadd.f32 %v6300_v46, %v5908_v0  ;;  %v5919_v51 = vrot.slane %v5917_v50, 7 }
0x19f4   :  { %v5922_v53 = vsel %vm5921_vm6, %v5916_v20, %v5919_v51 }
0x19f5   :  { %7105 = vmatmul.mubr.msk.f32.vlgmr.msra.gmra.mxu1 %vm183_vm0, %v5922_v53 }
0x1ab5   :  { %v6003_v57 = vpop.f32.mrf.mxu1 }
0x1ab6   :  { %v6004_v12 = vadd.f32 %v6301_v54, %v6003_v57 }
0x1ab7   :  { %v7106_v58 = vpop.f32.mrf.mxu1 }
0x1ab8   :  { %6007 = vst [vmem:[#allocation2] sm:$0x3] %v6004_v12 }
0x1ab9   :  { %7256 = shalt.err (!%p7253_p4)
}
0x1aba   :  { %6017 = dma.vmem_to_hbm [thread:$0]  %s6015_s26, 32, %s7521_s27, [#allocation3]  }
0x1abb   :  { %7265 = dma.done.wait [#allocation3], 32  }
0x1abc   :  { %7266 = vsyncadd [#allocation3], 4294967264 }
0x1abd   :  { %6021 = vsyncpa [#allocation3], 1 }

</bundles_post_ra>
